<compile_context>
chip_gen: v7x
topology: tpu7x:2x2x1
jax: 0.10.0
libtpu: 0.0.40
codegen_flags: <defaults>
</compile_context>

<pallas_src>
import math

import jax
import jax.numpy as jnp
from jax.experimental import pallas as pl
from jax.experimental.pallas import tpu as pltpu

IN_DIM = 56 * 924          # 51744

L1_TK = 3456               # K tile for encoder layer 1 (27*128, 1.77 MB f32 block)
L1_TN = 128                # 2 N blocks -> parallel axis usable by both v7x TCs
L8_TN = 3456               # lane-dense N tile for decoder layer 8


def _round_up(x, m):
    return ((x + m - 1) // m) * m


K1P = _round_up(IN_DIM, 128)   # 51840 (padded K of layer 1); divisible by L1_TK
N8P = _round_up(IN_DIM, 128)   # 51840 (padded N of layer 8); divisible by L8_TN
assert K1P % L1_TK == 0 and N8P % L8_TN == 0


# --------------------------------------------------------------------------
# Layer 1: y = relu(x @ W + b), K tiled on the last grid axis.
# --------------------------------------------------------------------------
def _enc0_kernel(x_ref, w_ref, b_ref, o_ref):
    k = pl.program_id(1)

    @pl.when(k == 0)
    def _():
        o_ref[...] = jnp.zeros_like(o_ref)

    o_ref[...] += jnp.dot(
        x_ref[...], w_ref[...], preferred_element_type=jnp.float32
    )

    @pl.when(k == pl.num_programs(1) - 1)
    def _():
        o_ref[...] = jnp.maximum(o_ref[...] + b_ref[...], 0.0)


def enc0_linear_relu(xp, w, b):
    """xp: (Mp, K1P), w: (K1P, 256), b: (1, 256) -> (Mp, 256)."""
    Mp, Kp = xp.shape
    _, N = w.shape
    grid = (N // L1_TN, Kp // L1_TK)
    return pl.pallas_call(
        _enc0_kernel,
        out_shape=jax.ShapeDtypeStruct((Mp, N), jnp.float32),
        grid_spec=pltpu.PrefetchScalarGridSpec(
            num_scalar_prefetch=0,
            grid=grid,
            in_specs=[
                pl.BlockSpec((Mp, L1_TK), lambda j, k: (0, k)),     # x
                pl.BlockSpec((L1_TK, L1_TN), lambda j, k: (k, j)),  # W
                pl.BlockSpec((1, L1_TN), lambda j, k: (0, j)),      # bias
            ],
            out_specs=pl.BlockSpec((Mp, L1_TN), lambda j, k: (0, j)),
        ),
        compiler_params=pltpu.CompilerParams(
            dimension_semantics=("parallel", "arbitrary"),
        ),
    )(xp, w, b)


# --------------------------------------------------------------------------
# Layers 2-7 fused: 256->128->64->32 (encoded) ->64->128->256, all in VMEM.
# --------------------------------------------------------------------------
def _mid_kernel(h_ref,
                w2, b2, w3, b3, w4, b4,
                w5, b5, w6, b6, w7, b7,
                enc_ref, h7_ref):
    h = h_ref[...]
    h = jnp.maximum(
        jnp.dot(h, w2[...], preferred_element_type=jnp.float32) + b2[...], 0.0)
    h = jnp.maximum(
        jnp.dot(h, w3[...], preferred_element_type=jnp.float32) + b3[...], 0.0)
    enc = jnp.dot(h, w4[...], preferred_element_type=jnp.float32) + b4[...]
    enc_ref[...] = enc
    h = jnp.maximum(
        jnp.dot(enc, w5[...], preferred_element_type=jnp.float32) + b5[...], 0.0)
    h = jnp.maximum(
        jnp.dot(h, w6[...], preferred_element_type=jnp.float32) + b6[...], 0.0)
    h = jnp.maximum(
        jnp.dot(h, w7[...], preferred_element_type=jnp.float32) + b7[...], 0.0)
    h7_ref[...] = h


def mid_fused(h1, mid_params):
    """h1: (Mp, 256) -> (encoded (Mp, 32), h7 (Mp, 256))."""
    Mp = h1.shape[0]
    flat = []
    for w, b in mid_params:
        flat.extend([w, b])
    in_specs = [pl.BlockSpec(h1.shape, lambda i: (0, 0))]
    for a in flat:
        in_specs.append(pl.BlockSpec(a.shape, lambda i: (0, 0)))
    return pl.pallas_call(
        _mid_kernel,
        out_shape=(
            jax.ShapeDtypeStruct((Mp, 32), jnp.float32),
            jax.ShapeDtypeStruct((Mp, 256), jnp.float32),
        ),
        grid_spec=pltpu.PrefetchScalarGridSpec(
            num_scalar_prefetch=0,
            grid=(1,),
            in_specs=in_specs,
            out_specs=[
                pl.BlockSpec((Mp, 32), lambda i: (0, 0)),
                pl.BlockSpec((Mp, 256), lambda i: (0, 0)),
            ],
        ),
        compiler_params=pltpu.CompilerParams(
            dimension_semantics=("arbitrary",),
        ),
    )(h1, *flat)


# --------------------------------------------------------------------------
# Layer 8: y = x @ W + b, big N tiled with lane-dense 3456-wide output blocks.
# --------------------------------------------------------------------------
def _dec_last_kernel(x_ref, w_ref, b_ref, o_ref):
    o_ref[...] = (
        jnp.dot(x_ref[...], w_ref[...], preferred_element_type=jnp.float32)
        + b_ref[...]
    )


def dec_last_linear(h7, w, b):
    """h7: (Mp, 256), w: (256, N8P), b: (1, N8P) -> (Mp, N8P)."""
    Mp, K = h7.shape
    _, Np = w.shape
    grid = (Np // L8_TN,)
    return pl.pallas_call(
        _dec_last_kernel,
        out_shape=jax.ShapeDtypeStruct((Mp, Np), jnp.float32),
        grid_spec=pltpu.PrefetchScalarGridSpec(
            num_scalar_prefetch=0,
            grid=grid,
            in_specs=[
                pl.BlockSpec((Mp, K), lambda j: (0, 0)),       # x (reused)
                pl.BlockSpec((K, L8_TN), lambda j: (0, j)),    # W
                pl.BlockSpec((1, L8_TN), lambda j: (0, j)),    # bias
            ],
            out_specs=pl.BlockSpec((Mp, L8_TN), lambda j: (0, j)),
        ),
        compiler_params=pltpu.CompilerParams(
            dimension_semantics=("parallel",),
        ),
    )(h7, w, b)


# --------------------------------------------------------------------------
# Parameters (pre-padded once, outside jit) and forward pass.
# --------------------------------------------------------------------------
def init_params(key):
    dims = [(IN_DIM, 256), (256, 128), (128, 64), (64, 32),
            (32, 64), (64, 128), (128, 256), (256, IN_DIM)]
    raw = []
    for d_in, d_out in dims:
        key, wk, bk = jax.random.split(key, 3)
        bound = 1.0 / math.sqrt(d_in)  # torch.nn.Linear default init range
        w = jax.random.uniform(wk, (d_in, d_out), jnp.float32,
                               minval=-bound, maxval=bound)
        b = jax.random.uniform(bk, (1, d_out), jnp.float32,
                               minval=-bound, maxval=bound)
        raw.append((w, b))

    w1, b1 = raw[0]
    w8, b8 = raw[7]
    params = {
        "w1": jnp.pad(w1, ((0, K1P - IN_DIM), (0, 0))),   # zero K pad, once
        "b1": b1,
        "mid": raw[1:7],
        "w8": jnp.pad(w8, ((0, 0), (0, N8P - IN_DIM))),   # zero N pad, once
        "b8": jnp.pad(b8, ((0, 0), (0, N8P - IN_DIM))),
    }
    return params, raw


@jax.jit
def self_supervised_forward(x, params):
    """Matches SelfSupervisedModel.forward: returns (encoded, decoded)."""
    M = x.shape[0]
    Mp = _round_up(M, 8)
    # Pad batch + feature dims once (zeros -> exact results after slicing).
    xp = jnp.pad(x, ((0, Mp - M), (0, K1P - IN_DIM)))

    h1 = enc0_linear_relu(xp, params["w1"], params["b1"])        # (Mp, 256)
    encoded_p, h7 = mid_fused(h1, params["mid"])                 # (Mp,32),(Mp,256)
    decoded_p = dec_last_linear(h7, params["w8"], params["b8"])  # (Mp, N8P)

    return encoded_p[:M], decoded_p[:M, :IN_DIM]


def _reference_forward(x, raw):
    """Pure-JAX reference (unpadded weights) for a sanity check."""
    hp = jax.lax.Precision.HIGHEST
    h = x
    for i, (w, b) in enumerate(raw[:4]):
        h = jnp.dot(h, w, precision=hp) + b
        if i < 3:
            h = jnp.maximum(h, 0.0)
    enc = h
    h = enc
    for i, (w, b) in enumerate(raw[4:]):
        h = jnp.dot(h, w, precision=hp) + b
        if i < 3:
            h = jnp.maximum(h, 0.0)
    return enc, h


if __name__ == "__main__":
    key = jax.random.PRNGKey(0)
    pkey, xkey = jax.random.split(key)

    params, raw = init_params(pkey)

    batch = 2
    x = jax.random.normal(xkey, (batch, IN_DIM), jnp.float32)

    encoded, decoded = self_supervised_forward(x, params)
    jax.block_until_ready((encoded, decoded))

    assert encoded.shape == (batch, 32)
    assert decoded.shape == (batch, IN_DIM)
    assert encoded.dtype == jnp.float32 and decoded.dtype == jnp.float32
    assert bool(jnp.all(jnp.isfinite(encoded))) and bool(jnp.all(jnp.isfinite(decoded)))

    enc_ref, dec_ref = _reference_forward(x, raw)
    assert bool(jnp.allclose(encoded, enc_ref, atol=2e-2, rtol=2e-2))
    assert bool(jnp.allclose(decoded, dec_ref, atol=2e-2, rtol=2e-2))

    print("KERNEL_OK")
</pallas_src>

<mosaic_0001>
module attributes {stable_mosaic.version = 11 : i64} {
  func.func @_enc0_kernel(%arg0: i32, %arg1: i32, %arg2: memref<8x3456xf32, #tpu.memory_space<vmem>>, %arg3: memref<3456x128xf32, #tpu.memory_space<vmem>>, %arg4: memref<1x128xf32, #tpu.memory_space<vmem>>, %arg5: memref<8x128xf32, #tpu.memory_space<vmem>>) attributes {dimension_semantics = [#tpu.dimension_semantics<parallel>, #tpu.dimension_semantics<arbitrary>], iteration_bounds = array<i64: 2, 15>, scalar_prefetch = 0 : i64, scratch_operands = 0 : i64, tpu.core_type = #tpu.core_type<tc>, window_params = [{transform_indices = @transform_0, window_bounds = array<i64: 8, 3456>}, {transform_indices = @transform_1, window_bounds = array<i64: 3456, 128>}, {transform_indices = @transform_2, window_bounds = array<i64: 1, 128>}, {transform_indices = @transform_3, window_bounds = array<i64: 8, 128>}]} {
    %c0_i32 = arith.constant 0 : i32
    %0 = arith.cmpi eq, %arg1, %c0_i32 : i32
    %1 = arith.extui %0 : i1 to i32
    %c0_i32_0 = arith.constant 0 : i32
    %2 = arith.cmpi ne, %1, %c0_i32_0 : i32
    scf.if %2 {
      %cst_9 = arith.constant 0.000000e+00 : f32
      %12 = vector.broadcast %cst_9 : f32 to vector<8x128xf32>
      %c0_10 = arith.constant 0 : index
      %c0_11 = arith.constant 0 : index
      %13 = vector.load %arg5[%c0_10, %c0_11] : memref<8x128xf32, #tpu.memory_space<vmem>>, vector<8x128xf32>
      tpu.vector_store %arg5[%c0_10, %c0_11], %12 {strides = array<i32>} : memref<8x128xf32, #tpu.memory_space<vmem>>, vector<8x128xf32>,
    } else {
    }
    %c0 = arith.constant 0 : index
    %c0_1 = arith.constant 0 : index
    %3 = vector.load %arg5[%c0, %c0_1] : memref<8x128xf32, #tpu.memory_space<vmem>>, vector<8x128xf32>
    %c0_2 = arith.constant 0 : index
    %c0_3 = arith.constant 0 : index
    %4 = vector.load %arg2[%c0_2, %c0_3] : memref<8x3456xf32, #tpu.memory_space<vmem>>, vector<8x3456xf32>
    %c0_4 = arith.constant 0 : index
    %c0_5 = arith.constant 0 : index
    %5 = vector.load %arg3[%c0_4, %c0_5] : memref<3456x128xf32, #tpu.memory_space<vmem>>, vector<3456x128xf32>
    %cst = arith.constant dense<0.000000e+00> : vector<8x128xf32>
    %6 = tpu.matmul %4, %5, %cst {dimension_numbers = #tpu.dot_dimension_numbers<[1], [0], [0], [1], [0, 0, 1, 1], [], []>} : vector<8x3456xf32>, vector<3456x128xf32>, vector<8x128xf32> -> vector<8x128xf32>
    %7 = arith.addf %3, %6 : vector<8x128xf32>
    %c0_6 = arith.constant 0 : index
    %c0_7 = arith.constant 0 : index
    %8 = vector.load %arg5[%c0_6, %c0_7] : memref<8x128xf32, #tpu.memory_space<vmem>>, vector<8x128xf32>
    tpu.vector_store %arg5[%c0_6, %c0_7], %7 {strides = array<i32>} : memref<8x128xf32, #tpu.memory_space<vmem>>, vector<8x128xf32>,
    %c14_i32 = arith.constant 14 : i32
    %9 = arith.cmpi eq, %arg1, %c14_i32 : i32
    %10 = arith.extui %9 : i1 to i32
    %c0_i32_8 = arith.constant 0 : i32
    %11 = arith.cmpi ne, %10, %c0_i32_8 : i32
    scf.if %11 {
      %c0_9 = arith.constant 0 : index
      %c0_10 = arith.constant 0 : index
      %12 = vector.load %arg5[%c0_9, %c0_10] : memref<8x128xf32, #tpu.memory_space<vmem>>, vector<8x128xf32>
      %c0_11 = arith.constant 0 : index
      %c0_12 = arith.constant 0 : index
      %13 = vector.load %arg4[%c0_11, %c0_12] : memref<1x128xf32, #tpu.memory_space<vmem>>, vector<1x128xf32>
      %14 = vector.broadcast %13 : vector<1x128xf32> to vector<8x128xf32>
      %15 = arith.addf %12, %14 : vector<8x128xf32>
      %cst_13 = arith.constant 0.000000e+00 : f32
      %16 = vector.broadcast %cst_13 : f32 to vector<8x128xf32>
      %17 = arith.maximumf %15, %16 : vector<8x128xf32>
      %c0_14 = arith.constant 0 : index
      %c0_15 = arith.constant 0 : index
      %18 = vector.load %arg5[%c0_14, %c0_15] : memref<8x128xf32, #tpu.memory_space<vmem>>, vector<8x128xf32>
      tpu.vector_store %arg5[%c0_14, %c0_15], %17 {strides = array<i32>} : memref<8x128xf32, #tpu.memory_space<vmem>>, vector<8x128xf32>,
    } else {
    }
    return
  }
  func.func @transform_0(%arg0: i32, %arg1: i32) -> (i32, i32) {
    %c0_i32 = arith.constant 0 : i32
    %c0_i32_0 = arith.constant 0 : i32
    return %c0_i32, %arg1 : i32, i32
  }
  func.func @transform_1(%arg0: i32, %arg1: i32) -> (i32, i32) {
    %c0_i32 = arith.constant 0 : i32
    return %arg1, %arg0 : i32, i32
  }
  func.func @transform_2(%arg0: i32, %arg1: i32) -> (i32, i32) {
    %c0_i32 = arith.constant 0 : i32
    %c0_i32_0 = arith.constant 0 : i32
    return %c0_i32, %arg0 : i32, i32
  }
  func.func @transform_3(%arg0: i32, %arg1: i32) -> (i32, i32) {
    %c0_i32 = arith.constant 0 : i32
    %c0_i32_0 = arith.constant 0 : i32
    return %c0_i32, %arg0 : i32, i32
  }
}

module attributes {stable_mosaic.version = 11 : i64} {
  func.func @_mid_kernel(%arg0: i32, %arg1: memref<8x256xf32, #tpu.memory_space<vmem>>, %arg2: memref<256x128xf32, #tpu.memory_space<vmem>>, %arg3: memref<1x128xf32, #tpu.memory_space<vmem>>, %arg4: memref<128x64xf32, #tpu.memory_space<vmem>>, %arg5: memref<1x64xf32, #tpu.memory_space<vmem>>, %arg6: memref<64x32xf32, #tpu.memory_space<vmem>>, %arg7: memref<1x32xf32, #tpu.memory_space<vmem>>, %arg8: memref<32x64xf32, #tpu.memory_space<vmem>>, %arg9: memref<1x64xf32, #tpu.memory_space<vmem>>, %arg10: memref<64x128xf32, #tpu.memory_space<vmem>>, %arg11: memref<1x128xf32, #tpu.memory_space<vmem>>, %arg12: memref<128x256xf32, #tpu.memory_space<vmem>>, %arg13: memref<1x256xf32, #tpu.memory_space<vmem>>, %arg14: memref<8x32xf32, #tpu.memory_space<vmem>>, %arg15: memref<8x256xf32, #tpu.memory_space<vmem>>) attributes {dimension_semantics = [#tpu.dimension_semantics<arbitrary>], iteration_bounds = array<i64: 1>, scalar_prefetch = 0 : i64, scratch_operands = 0 : i64, tpu.core_type = #tpu.core_type<tc>, window_params = [{pipeline_mode = #tpu.pipeline_mode<synchronous>, transform_indices = @transform_0, window_bounds = array<i64: 8, 256>}, {pipeline_mode = #tpu.pipeline_mode<synchronous>, transform_indices = @transform_1, window_bounds = array<i64: 256, 128>}, {pipeline_mode = #tpu.pipeline_mode<synchronous>, transform_indices = @transform_2, window_bounds = array<i64: 1, 128>}, {pipeline_mode = #tpu.pipeline_mode<synchronous>, transform_indices = @transform_3, window_bounds = array<i64: 128, 64>}, {pipeline_mode = #tpu.pipeline_mode<synchronous>, transform_indices = @transform_4, window_bounds = array<i64: 1, 64>}, {pipeline_mode = #tpu.pipeline_mode<synchronous>, transform_indices = @transform_5, window_bounds = array<i64: 64, 32>}, {pipeline_mode = #tpu.pipeline_mode<synchronous>, transform_indices = @transform_6, window_bounds = array<i64: 1, 32>}, {pipeline_mode = #tpu.pipeline_mode<synchronous>, transform_indices = @transform_7, window_bounds = array<i64: 32, 64>}, {pipeline_mode = #tpu.pipeline_mode<synchronous>, transform_indices = @transform_8, window_bounds = array<i64: 1, 64>}, {pipeline_mode = #tpu.pipeline_mode<synchronous>, transform_indices = @transform_9, window_bounds = array<i64: 64, 128>}, {pipeline_mode = #tpu.pipeline_mode<synchronous>, transform_indices = @transform_10, window_bounds = array<i64: 1, 128>}, {pipeline_mode = #tpu.pipeline_mode<synchronous>, transform_indices = @transform_11, window_bounds = array<i64: 128, 256>}, {pipeline_mode = #tpu.pipeline_mode<synchronous>, transform_indices = @transform_12, window_bounds = array<i64: 1, 256>}, {pipeline_mode = #tpu.pipeline_mode<synchronous>, transform_indices = @transform_13, window_bounds = array<i64: 8, 32>}, {pipeline_mode = #tpu.pipeline_mode<synchronous>, transform_indices = @transform_14, window_bounds = array<i64: 8, 256>}]} {
    %c0 = arith.constant 0 : index
    %c0_0 = arith.constant 0 : index
    %0 = vector.load %arg1[%c0, %c0_0] : memref<8x256xf32, #tpu.memory_space<vmem>>, vector<8x256xf32>
    %c0_1 = arith.constant 0 : index
    %c0_2 = arith.constant 0 : index
    %1 = vector.load %arg2[%c0_1, %c0_2] : memref<256x128xf32, #tpu.memory_space<vmem>>, vector<256x128xf32>
    %cst = arith.constant dense<0.000000e+00> : vector<8x128xf32>
    %2 = tpu.matmul %0, %1, %cst {dimension_numbers = #tpu.dot_dimension_numbers<[1], [0], [0], [1], [0, 0, 1, 1], [], []>} : vector<8x256xf32>, vector<256x128xf32>, vector<8x128xf32> -> vector<8x128xf32>
    %c0_3 = arith.constant 0 : index
    %c0_4 = arith.constant 0 : index
    %3 = vector.load %arg3[%c0_3, %c0_4] : memref<1x128xf32, #tpu.memory_space<vmem>>, vector<1x128xf32>
    %4 = vector.broadcast %3 : vector<1x128xf32> to vector<8x128xf32>
    %5 = arith.addf %2, %4 : vector<8x128xf32>
    %cst_5 = arith.constant 0.000000e+00 : f32
    %6 = vector.broadcast %cst_5 : f32 to vector<8x128xf32>
    %7 = arith.maximumf %5, %6 : vector<8x128xf32>
    %c0_6 = arith.constant 0 : index
    %c0_7 = arith.constant 0 : index
    %8 = vector.load %arg4[%c0_6, %c0_7] : memref<128x64xf32, #tpu.memory_space<vmem>>, vector<128x64xf32>
    %cst_8 = arith.constant dense<0.000000e+00> : vector<8x64xf32>
    %9 = tpu.matmul %7, %8, %cst_8 {dimension_numbers = #tpu.dot_dimension_numbers<[1], [0], [0], [1], [0, 0, 1, 1], [], []>} : vector<8x128xf32>, vector<128x64xf32>, vector<8x64xf32> -> vector<8x64xf32>
    %c0_9 = arith.constant 0 : index
    %c0_10 = arith.constant 0 : index
    %10 = vector.load %arg5[%c0_9, %c0_10] : memref<1x64xf32, #tpu.memory_space<vmem>>, vector<1x64xf32>
    %11 = vector.broadcast %10 : vector<1x64xf32> to vector<8x64xf32>
    %12 = arith.addf %9, %11 : vector<8x64xf32>
    %cst_11 = arith.constant 0.000000e+00 : f32
    %13 = vector.broadcast %cst_11 : f32 to vector<8x64xf32>
    %14 = arith.maximumf %12, %13 : vector<8x64xf32>
    %c0_12 = arith.constant 0 : index
    %c0_13 = arith.constant 0 : index
    %15 = vector.load %arg6[%c0_12, %c0_13] : memref<64x32xf32, #tpu.memory_space<vmem>>, vector<64x32xf32>
    %cst_14 = arith.constant dense<0.000000e+00> : vector<8x32xf32>
    %16 = tpu.matmul %14, %15, %cst_14 {dimension_numbers = #tpu.dot_dimension_numbers<[1], [0], [0], [1], [0, 0, 1, 1], [], []>} : vector<8x64xf32>, vector<64x32xf32>, vector<8x32xf32> -> vector<8x32xf32>
    %c0_15 = arith.constant 0 : index
    %c0_16 = arith.constant 0 : index
    %17 = vector.load %arg7[%c0_15, %c0_16] : memref<1x32xf32, #tpu.memory_space<vmem>>, vector<1x32xf32>
    %18 = vector.broadcast %17 : vector<1x32xf32> to vector<8x32xf32>
    %19 = arith.addf %16, %18 : vector<8x32xf32>
    %c0_17 = arith.constant 0 : index
    %c0_18 = arith.constant 0 : index
    %20 = vector.load %arg14[%c0_17, %c0_18] : memref<8x32xf32, #tpu.memory_space<vmem>>, vector<8x32xf32>
    tpu.vector_store %arg14[%c0_17, %c0_18], %19 {strides = array<i32>} : memref<8x32xf32, #tpu.memory_space<vmem>>, vector<8x32xf32>,
    %c0_19 = arith.constant 0 : index
    %c0_20 = arith.constant 0 : index
    %21 = vector.load %arg8[%c0_19, %c0_20] : memref<32x64xf32, #tpu.memory_space<vmem>>, vector<32x64xf32>
    %cst_21 = arith.constant dense<0.000000e+00> : vector<8x64xf32>
    %22 = tpu.matmul %19, %21, %cst_21 {dimension_numbers = #tpu.dot_dimension_numbers<[1], [0], [0], [1], [0, 0, 1, 1], [], []>} : vector<8x32xf32>, vector<32x64xf32>, vector<8x64xf32> -> vector<8x64xf32>
    %c0_22 = arith.constant 0 : index
    %c0_23 = arith.constant 0 : index
    %23 = vector.load %arg9[%c0_22, %c0_23] : memref<1x64xf32, #tpu.memory_space<vmem>>, vector<1x64xf32>
    %24 = vector.broadcast %23 : vector<1x64xf32> to vector<8x64xf32>
    %25 = arith.addf %22, %24 : vector<8x64xf32>
    %cst_24 = arith.constant 0.000000e+00 : f32
    %26 = vector.broadcast %cst_24 : f32 to vector<8x64xf32>
    %27 = arith.maximumf %25, %26 : vector<8x64xf32>
    %c0_25 = arith.constant 0 : index
    %c0_26 = arith.constant 0 : index
    %28 = vector.load %arg10[%c0_25, %c0_26] : memref<64x128xf32, #tpu.memory_space<vmem>>, vector<64x128xf32>
    %cst_27 = arith.constant dense<0.000000e+00> : vector<8x128xf32>
    %29 = tpu.matmul %27, %28, %cst_27 {dimension_numbers = #tpu.dot_dimension_numbers<[1], [0], [0], [1], [0, 0, 1, 1], [], []>} : vector<8x64xf32>, vector<64x128xf32>, vector<8x128xf32> -> vector<8x128xf32>
    %c0_28 = arith.constant 0 : index
    %c0_29 = arith.constant 0 : index
    %30 = vector.load %arg11[%c0_28, %c0_29] : memref<1x128xf32, #tpu.memory_space<vmem>>, vector<1x128xf32>
    %31 = vector.broadcast %30 : vector<1x128xf32> to vector<8x128xf32>
    %32 = arith.addf %29, %31 : vector<8x128xf32>
    %cst_30 = arith.constant 0.000000e+00 : f32
    %33 = vector.broadcast %cst_30 : f32 to vector<8x128xf32>
    %34 = arith.maximumf %32, %33 : vector<8x128xf32>
    %c0_31 = arith.constant 0 : index
    %c0_32 = arith.constant 0 : index
    %35 = vector.load %arg12[%c0_31, %c0_32] : memref<128x256xf32, #tpu.memory_space<vmem>>, vector<128x256xf32>
    %cst_33 = arith.constant dense<0.000000e+00> : vector<8x256xf32>
    %36 = tpu.matmul %34, %35, %cst_33 {dimension_numbers = #tpu.dot_dimension_numbers<[1], [0], [0], [1], [0, 0, 1, 1], [], []>} : vector<8x128xf32>, vector<128x256xf32>, vector<8x256xf32> -> vector<8x256xf32>
    %c0_34 = arith.constant 0 : index
    %c0_35 = arith.constant 0 : index
    %37 = vector.load %arg13[%c0_34, %c0_35] : memref<1x256xf32, #tpu.memory_space<vmem>>, vector<1x256xf32>
    %38 = vector.broadcast %37 : vector<1x256xf32> to vector<8x256xf32>
    %39 = arith.addf %36, %38 : vector<8x256xf32>
    %cst_36 = arith.constant 0.000000e+00 : f32
    %40 = vector.broadcast %cst_36 : f32 to vector<8x256xf32>
    %41 = arith.maximumf %39, %40 : vector<8x256xf32>
    %c0_37 = arith.constant 0 : index
    %c0_38 = arith.constant 0 : index
    %42 = vector.load %arg15[%c0_37, %c0_38] : memref<8x256xf32, #tpu.memory_space<vmem>>, vector<8x256xf32>
    tpu.vector_store %arg15[%c0_37, %c0_38], %41 {strides = array<i32>} : memref<8x256xf32, #tpu.memory_space<vmem>>, vector<8x256xf32>,
    return
  }
  func.func @transform_0(%arg0: i32) -> (i32, i32) {
    %c0_i32 = arith.constant 0 : i32
    %c0_i32_0 = arith.constant 0 : i32
    %c0_i32_1 = arith.constant 0 : i32
    return %c0_i32, %c0_i32_0 : i32, i32
  }
  func.func @transform_1(%arg0: i32) -> (i32, i32) {
    %c0_i32 = arith.constant 0 : i32
    %c0_i32_0 = arith.constant 0 : i32
    %c0_i32_1 = arith.constant 0 : i32
    return %c0_i32, %c0_i32_0 : i32, i32
  }
  func.func @transform_2(%arg0: i32) -> (i32, i32) {
    %c0_i32 = arith.constant 0 : i32
    %c0_i32_0 = arith.constant 0 : i32
    %c0_i32_1 = arith.constant 0 : i32
    return %c0_i32, %c0_i32_0 : i32, i32
  }
  func.func @transform_3(%arg0: i32) -> (i32, i32) {
    %c0_i32 = arith.constant 0 : i32
    %c0_i32_0 = arith.constant 0 : i32
    %c0_i32_1 = arith.constant 0 : i32
    return %c0_i32, %c0_i32_0 : i32, i32
  }
  func.func @transform_4(%arg0: i32) -> (i32, i32) {
    %c0_i32 = arith.constant 0 : i32
    %c0_i32_0 = arith.constant 0 : i32
    %c0_i32_1 = arith.constant 0 : i32
    return %c0_i32, %c0_i32_0 : i32, i32
  }
  func.func @transform_5(%arg0: i32) -> (i32, i32) {
    %c0_i32 = arith.constant 0 : i32
    %c0_i32_0 = arith.constant 0 : i32
    %c0_i32_1 = arith.constant 0 : i32
    return %c0_i32, %c0_i32_0 : i32, i32
  }
  func.func @transform_6(%arg0: i32) -> (i32, i32) {
    %c0_i32 = arith.constant 0 : i32
    %c0_i32_0 = arith.constant 0 : i32
    %c0_i32_1 = arith.constant 0 : i32
    return %c0_i32, %c0_i32_0 : i32, i32
  }
  func.func @transform_7(%arg0: i32) -> (i32, i32) {
    %c0_i32 = arith.constant 0 : i32
    %c0_i32_0 = arith.constant 0 : i32
    %c0_i32_1 = arith.constant 0 : i32
    return %c0_i32, %c0_i32_0 : i32, i32
  }
  func.func @transform_8(%arg0: i32) -> (i32, i32) {
    %c0_i32 = arith.constant 0 : i32
    %c0_i32_0 = arith.constant 0 : i32
    %c0_i32_1 = arith.constant 0 : i32
    return %c0_i32, %c0_i32_0 : i32, i32
  }
  func.func @transform_9(%arg0: i32) -> (i32, i32) {
    %c0_i32 = arith.constant 0 : i32
    %c0_i32_0 = arith.constant 0 : i32
    %c0_i32_1 = arith.constant 0 : i32
    return %c0_i32, %c0_i32_0 : i32, i32
  }
  func.func @transform_10(%arg0: i32) -> (i32, i32) {
    %c0_i32 = arith.constant 0 : i32
    %c0_i32_0 = arith.constant 0 : i32
    %c0_i32_1 = arith.constant 0 : i32
    return %c0_i32, %c0_i32_0 : i32, i32
  }
  func.func @transform_11(%arg0: i32) -> (i32, i32) {
    %c0_i32 = arith.constant 0 : i32
    %c0_i32_0 = arith.constant 0 : i32
    %c0_i32_1 = arith.constant 0 : i32
    return %c0_i32, %c0_i32_0 : i32, i32
  }
  func.func @transform_12(%arg0: i32) -> (i32, i32) {
    %c0_i32 = arith.constant 0 : i32
    %c0_i32_0 = arith.constant 0 : i32
    %c0_i32_1 = arith.constant 0 : i32
    return %c0_i32, %c0_i32_0 : i32, i32
  }
  func.func @transform_13(%arg0: i32) -> (i32, i32) {
    %c0_i32 = arith.constant 0 : i32
    %c0_i32_0 = arith.constant 0 : i32
    %c0_i32_1 = arith.constant 0 : i32
    return %c0_i32, %c0_i32_0 : i32, i32
  }
  func.func @transform_14(%arg0: i32) -> (i32, i32) {
    %c0_i32 = arith.constant 0 : i32
    %c0_i32_0 = arith.constant 0 : i32
    %c0_i32_1 = arith.constant 0 : i32
    return %c0_i32, %c0_i32_0 : i32, i32
  }
}

module attributes {stable_mosaic.version = 11 : i64} {
  func.func @_dec_last_kernel(%arg0: i32, %arg1: memref<8x256xf32, #tpu.memory_space<vmem>>, %arg2: memref<256x3456xf32, #tpu.memory_space<vmem>>, %arg3: memref<1x3456xf32, #tpu.memory_space<vmem>>, %arg4: memref<8x3456xf32, #tpu.memory_space<vmem>>) attributes {dimension_semantics = [#tpu.dimension_semantics<parallel>], iteration_bounds = array<i64: 15>, scalar_prefetch = 0 : i64, scratch_operands = 0 : i64, tpu.core_type = #tpu.core_type<tc>, window_params = [{pipeline_mode = #tpu.pipeline_mode<synchronous>, transform_indices = @transform_0, window_bounds = array<i64: 8, 256>}, {transform_indices = @transform_1, window_bounds = array<i64: 256, 3456>}, {transform_indices = @transform_2, window_bounds = array<i64: 1, 3456>}, {transform_indices = @transform_3, window_bounds = array<i64: 8, 3456>}]} {
    %c0 = arith.constant 0 : index
    %c0_0 = arith.constant 0 : index
    %0 = vector.load %arg1[%c0, %c0_0] : memref<8x256xf32, #tpu.memory_space<vmem>>, vector<8x256xf32>
    %c0_1 = arith.constant 0 : index
    %c0_2 = arith.constant 0 : index
    %1 = vector.load %arg2[%c0_1, %c0_2] : memref<256x3456xf32, #tpu.memory_space<vmem>>, vector<256x3456xf32>
    %cst = arith.constant dense<0.000000e+00> : vector<8x3456xf32>
    %2 = tpu.matmul %0, %1, %cst {dimension_numbers = #tpu.dot_dimension_numbers<[1], [0], [0], [1], [0, 0, 1, 1], [], []>} : vector<8x256xf32>, vector<256x3456xf32>, vector<8x3456xf32> -> vector<8x3456xf32>
    %c0_3 = arith.constant 0 : index
    %c0_4 = arith.constant 0 : index
    %3 = vector.load %arg3[%c0_3, %c0_4] : memref<1x3456xf32, #tpu.memory_space<vmem>>, vector<1x3456xf32>
    %4 = vector.broadcast %3 : vector<1x3456xf32> to vector<8x3456xf32>
    %5 = arith.addf %2, %4 : vector<8x3456xf32>
    %c0_5 = arith.constant 0 : index
    %c0_6 = arith.constant 0 : index
    %6 = vector.load %arg4[%c0_5, %c0_6] : memref<8x3456xf32, #tpu.memory_space<vmem>>, vector<8x3456xf32>
    tpu.vector_store %arg4[%c0_5, %c0_6], %5 {strides = array<i32>} : memref<8x3456xf32, #tpu.memory_space<vmem>>, vector<8x3456xf32>,
    return
  }
  func.func @transform_0(%arg0: i32) -> (i32, i32) {
    %c0_i32 = arith.constant 0 : i32
    %c0_i32_0 = arith.constant 0 : i32
    %c0_i32_1 = arith.constant 0 : i32
    return %c0_i32, %c0_i32_0 : i32, i32
  }
  func.func @transform_1(%arg0: i32) -> (i32, i32) {
    %c0_i32 = arith.constant 0 : i32
    %c0_i32_0 = arith.constant 0 : i32
    return %c0_i32, %arg0 : i32, i32
  }
  func.func @transform_2(%arg0: i32) -> (i32, i32) {
    %c0_i32 = arith.constant 0 : i32
    %c0_i32_0 = arith.constant 0 : i32
    return %c0_i32, %arg0 : i32, i32
  }
  func.func @transform_3(%arg0: i32) -> (i32, i32) {
    %c0_i32 = arith.constant 0 : i32
    %c0_i32_0 = arith.constant 0 : i32
    return %c0_i32, %arg0 : i32, i32
  }
}

</mosaic_0001>

<bundles_post_ra>
// kernel: self_supervised_forward.4
= control target key start
LH: loop header
LB: loop body
LE: loop exit
PB: predicated region body
PF: predicated region fallthrough
CT: control target
= control target key end

     0   :  { %v932_v3 = vmov 0.0|0.0   ;;  %vm933_vm0 = vmmov 0   ;;  %vm267_vm1 = vcmask 523264   ;;  %vm341_vm2 = vcmask 261120   ;;  %s1372_s1 = inlined_call_operand.vmem [shape: f32[256,128], index: 1, kind: input, shape index: {}]   ;;  %s1373_s0 = inlined_call_operand.vmem [shape: f32[8,256], index: 0, kind: input, shape index: {}]   ;;  %s1374_s3 = inlined_call_operand.vmem [shape: f32[128,64], index: 3, kind: input, shape index: {}]   ;;  %s1375_s2 = inlined_call_operand.vmem [shape: f32[1,128], index: 2, kind: input, shape index: {}]   ;;  %s1376_s5 = inlined_call_operand.vmem [shape: f32[64,32], index: 5, kind: input, shape index: {}]   ;;  %s1377_s4 = inlined_call_operand.vmem [shape: f32[1,64], index: 4, kind: input, shape index: {}]   ;;  %s1378_s7 = inlined_call_operand.vmem [shape: f32[32,64], index: 7, kind: input, shape index: {}]   ;;  %s1379_s9 = inlined_call_operand.vmem [shape: f32[64,128], index: 9, kind: input, shape index: {}]   ;;  %s1380_s6 = inlined_call_operand.vmem [shape: f32[1,32], index: 6, kind: input, shape index: {}]   ;;  %s1381_s13 = inlined_call_operand.vmem [shape: f32[8,32], index: 13, kind: output, shape index: {0}]   ;;  %s1382_s11 = inlined_call_operand.vmem [shape: f32[128,256], index: 11, kind: input, shape index: {}]   ;;  %s1383_s8 = inlined_call_operand.vmem [shape: f32[1,64], index: 8, kind: input, shape index: {}]   ;;  %s1384_s10 = inlined_call_operand.vmem [shape: f32[1,128], index: 10, kind: input, shape index: {}]   ;;  %s1385_s12 = inlined_call_operand.vmem [shape: f32[1,256], index: 12, kind: input, shape index: {}]   ;;  %s1386_s14 = inlined_call_operand.vmem [shape: f32[8,256], index: 14, kind: output, shape index: {1}]  }
   0x1   :  { %v64_v0 = vld [vmem:[%s1372_s1 + $0x80] sm:$0xff]  ;;  %v65_v1 = vld [vmem:[%s1372_s1 + $0x88] sm:$0xff]  ;;  %843 = vmatprep.subr.bf16.mxu1 %v932_v3  ;;  %v66_v6 = vld [vmem:[%s1372_s1 + $0x90] sm:$0xff] }
   0x2   :  { %v48_v2 = vld [vmem:[%s1372_s1] sm:$0xff]  ;;  %v811_v4 = vpack.c.bf16 %v65_v1, %v64_v0  ;;  %v49_v5 = vld [vmem:[%s1372_s1 + $0x8] sm:$0xff]  ;;  %v67_v7 = vld [vmem:[%s1372_s1 + $0x98] sm:$0xff] }
   0x3   :  { %v813_v8 = vpack.c.bf16 %v49_v5, %v48_v2  ;;  %v815_v9 = vpack.c.bf16 %v67_v7, %v66_v6  ;;  %v50_v10 = vld [vmem:[%s1372_s1 + $0x10] sm:$0xff]  ;;  %v51_v11 = vld [vmem:[%s1372_s1 + $0x18] sm:$0xff]  ;;  %v68_v12 = vld [vmem:[%s1372_s1 + $0xa0] sm:$0xff] }
   0x4   :  { %812 = vmatprep.subr.bf16.mxu0 %v811_v4  ;;  %v69_v13 = vld [vmem:[%s1372_s1 + $0xa8] sm:$0xff]  ;;  %v817_v14 = vpack.c.bf16 %v51_v11, %v50_v10  ;;  %v52_v16 = vld [vmem:[%s1372_s1 + $0x20] sm:$0xff]  ;;  %v70_v18 = vld [vmem:[%s1372_s1 + $0xb0] sm:$0xff] }
   0x5   :  { %814 = vmatpush3.bf16.msra.mxu0 %v813_v8  ;;  %v819_v15 = vpack.c.bf16 %v69_v13, %v68_v12  ;;  %v53_v17 = vld [vmem:[%s1372_s1 + $0x28] sm:$0xff]  ;;  %v71_v19 = vld [vmem:[%s1372_s1 + $0xb8] sm:$0xff]  ;;  %v54_v22 = vld [vmem:[%s1372_s1 + $0x30] sm:$0xff]  ;;  %v934_v12 = vmov 0.0  }
   0x6   :  { %816 = vmatprep.subr.bf16.mxu0 %v815_v9  ;;  %v821_v20 = vpack.c.bf16 %v53_v17, %v52_v16  ;;  %v823_v21 = vpack.c.bf16 %v71_v19, %v70_v18  ;;  %v55_v23 = vld [vmem:[%s1372_s1 + $0x38] sm:$0xff]  ;;  %v72_v24 = vld [vmem:[%s1372_s1 + $0xc0] sm:$0xff]  ;;  %v73_v25 = vld [vmem:[%s1372_s1 + $0xc8] sm:$0xff]  ;;  %759 = vmatprep.mubr.msk.f32.mxu1 %vm933_vm0, %v934_v12 }
   0x7   :  { %v47_v26 = vld [vmem:[%s1373_s0 + $0x8] sm:$0xff]  ;;  %v158_v27 = vld [vmem:[%s1374_s3] sm:$0xff]  ;;  %v825_v29 = vpack.c.bf16 %v55_v23, %v54_v22  ;;  %v160_v31 = vld [vmem:[%s1374_s3 + $0x10] sm:$0xff]  ;;  %v827_v33 = vpack.c.bf16 %v73_v25, %v72_v24 }
   0x8   :  { %151 = vmatprep.mubr.f32.mxu0 %v47_v26  ;;  %v159_v28 = vld [vmem:[%s1374_s3 + $0x8] sm:$0xff]  ;;  %v161_v32 = vld [vmem:[%s1374_s3 + $0x18] sm:$0xff]  ;;  %v56_v34 = vld [vmem:[%s1372_s1 + $0x40] sm:$0xff] }
   0x9   :  { %818 = vmatpush3.bf16.msra.mxu0 %v817_v14  ;;  %v844_v30 = vpack.c.bf16 %v159_v28, %v158_v27  ;;  %v57_v35 = vld [vmem:[%s1372_s1 + $0x48] sm:$0xff]  ;;  %v74_v36 = vld [vmem:[%s1372_s1 + $0xd0] sm:$0xff]  ;;  %v75_v37 = vld [vmem:[%s1372_s1 + $0xd8] sm:$0xff]  ;;  %v847_v38 = vpack.c.bf16 %v161_v32, %v160_v31 }
   0xa   :  { %820 = vmatprep.subr.bf16.mxu0 %v819_v15  ;;  %v162_v39 = vld [vmem:[%s1374_s3 + $0x20] sm:$0xff]  ;;  %v163_v40 = vld [vmem:[%s1374_s3 + $0x28] sm:$0xff]  ;;  %v829_v41 = vpack.c.bf16 %v57_v35, %v56_v34  ;;  %v831_v42 = vpack.c.bf16 %v75_v37, %v74_v36  ;;  %v58_v43 = vld [vmem:[%s1372_s1 + $0x50] sm:$0xff] }
   0xb   :  { %845 = vmatpush3.bf16.msra.mxu1 %v844_v30  ;;  %v59_v44 = vld [vmem:[%s1372_s1 + $0x58] sm:$0xff]  ;;  %v76_v45 = vld [vmem:[%s1372_s1 + $0xe0] sm:$0xff]  ;;  %v77_v46 = vld [vmem:[%s1372_s1 + $0xe8] sm:$0xff]  ;;  %v850_v47 = vpack.c.bf16 %v163_v40, %v162_v39 }
   0xc   :  { %846 = vmatprep.subr.bf16.mxu1 %v932_v3  ;;  %v164_v48 = vld [vmem:[%s1374_s3 + $0x30] sm:$0xff]  ;;  %v165_v49 = vld [vmem:[%s1374_s3 + $0x38] sm:$0xff]  ;;  %v833_v50 = vpack.c.bf16 %v59_v44, %v58_v43  ;;  %v835_v51 = vpack.c.bf16 %v77_v46, %v76_v45  ;;  %v60_v52 = vld [vmem:[%s1372_s1 + $0x60] sm:$0xff] }
   0xd   :  { %822 = vmatpush3.bf16.msra.mxu0 %v821_v20  ;;  %v61_v53 = vld [vmem:[%s1372_s1 + $0x68] sm:$0xff]  ;;  %v78_v54 = vld [vmem:[%s1372_s1 + $0xf0] sm:$0xff]  ;;  %v79_v55 = vld [vmem:[%s1372_s1 + $0xf8] sm:$0xff]  ;;  %v853_v56 = vpack.c.bf16 %v165_v49, %v164_v48 }
   0xe   :  { %824 = vmatprep.subr.bf16.mxu0 %v823_v21  ;;  %v166_v57 = vld [vmem:[%s1374_s3 + $0x40] sm:$0xff]  ;;  %v167_v58 = vld [vmem:[%s1374_s3 + $0x48] sm:$0xff]  ;;  %v837_v59 = vpack.c.bf16 %v61_v53, %v60_v52  ;;  %v839_v60 = vpack.c.bf16 %v79_v55, %v78_v54  ;;  %v62_v61 = vld [vmem:[%s1372_s1 + $0x70] sm:$0xff] }
   0xf   :  { %848 = vmatpush3.bf16.msra.mxu1 %v847_v38  ;;  %v63_v62 = vld [vmem:[%s1372_s1 + $0x78] sm:$0xff]  ;;  %v856_v63 = vpack.c.bf16 %v167_v58, %v166_v57  ;;  %v168_v0 = vld [vmem:[%s1374_s3 + $0x50] sm:$0xff]  ;;  %v46_v5 = vld [vmem:[%s1373_s0] sm:$0xff] }
  0x10   :  { %849 = vmatprep.subr.bf16.mxu1 %v932_v3  ;;  %v169_v1 = vld [vmem:[%s1374_s3 + $0x58] sm:$0xff]  ;;  %v841_v2 = vpack.c.bf16 %v63_v62, %v62_v61  ;;  %v170_v6 = vld [vmem:[%s1374_s3 + $0x60] sm:$0xff]  ;;  %v171_v7 = vld [vmem:[%s1374_s3 + $0x68] sm:$0xff] }
  0x11   :  { %826 = vmatpush3.bf16.msra.mxu0 %v825_v29  ;;  %v859_v4 = vpack.c.bf16 %v169_v1, %v168_v0  ;;  %v862_v8 = vpack.c.bf16 %v171_v7, %v170_v6  ;;  %v172_v9 = vld [vmem:[%s1374_s3 + $0x70] sm:$0xff]  ;;  %v173_v10 = vld [vmem:[%s1374_s3 + $0x78] sm:$0xff]  ;;  %v644_v14 = vld [vmem:[%s1375_s2] ss:$0 sm:$0xff] }
  0x12   :  { %828 = vmatprep.subr.bf16.mxu0 %v827_v33  ;;  %v865_v11 = vpack.c.bf16 %v173_v10, %v172_v9  ;;  %v252_v17 = vld [vmem:[%s1376_s5] sm:$0xff]  ;;  %v253_v18 = vld [vmem:[%s1376_s5 + $0x8] sm:$0xff]  ;;  %v254_v22 = vld [vmem:[%s1376_s5 + $0x10] sm:$0xff] }
  0x13   :  { %851 = vmatpush3.bf16.msra.mxu1 %v850_v47  ;;  %v868_v20 = vpack.c.bf16 %v253_v18, %v252_v17  ;;  %v255_v23 = vld [vmem:[%s1376_s5 + $0x18] sm:$0xff]  ;;  %v256_v25 = vld [vmem:[%s1376_s5 + $0x20] sm:$0xff]  ;;  %v257_v26 = vld [vmem:[%s1376_s5 + $0x28] sm:$0xff] }
  0x14   :  { %852 = vmatprep.subr.bf16.mxu1 %v932_v3  ;;  %v871_v24 = vpack.c.bf16 %v255_v23, %v254_v22  ;;  %v874_v27 = vpack.c.bf16 %v257_v26, %v256_v25  ;;  %v258_v28 = vld [vmem:[%s1376_s5 + $0x30] sm:$0xff]  ;;  %v259_v29 = vld [vmem:[%s1376_s5 + $0x38] sm:$0xff]  ;;  %v645_v31 = vld [vmem:[%s1377_s4] ss:$0 sm:$0xff] }
  0x15   :  { %830 = vmatpush3.bf16.msra.mxu0 %v829_v41  ;;  %v877_v30 = vpack.c.bf16 %v259_v29, %v258_v28  ;;  %v343_v32 = vld [vmem:[%s1378_s7] sm:$0xff]  ;;  %v344_v33 = vld [vmem:[%s1378_s7 + $0x8] sm:$0xff]  ;;  %v345_v39 = vld [vmem:[%s1378_s7 + $0x10] sm:$0xff] }
  0x16   :  { %832 = vmatprep.subr.bf16.mxu0 %v831_v42  ;;  %v880_v37 = vpack.c.bf16 %v344_v33, %v343_v32  ;;  %v346_v40 = vld [vmem:[%s1378_s7 + $0x18] sm:$0xff]  ;;  %v428_v42 = vld [vmem:[%s1379_s9] sm:$0xff]  ;;  %v429_v43 = vld [vmem:[%s1379_s9 + $0x8] sm:$0xff] }
  0x17   :  { %854 = vmatpush3.bf16.msra.mxu1 %v853_v56  ;;  %v883_v41 = vpack.c.bf16 %v346_v40, %v345_v39  ;;  %v646_v44 = vld [vmem:[%s1380_s6] ss:$0 sm:$0xff]  ;;  %v886_v46 = vpack.c.bf16 %v429_v43, %v428_v42  ;;  %v430_v49 = vld [vmem:[%s1379_s9 + $0x10] sm:$0xff]  ;;  %v433_v53 = vld [vmem:[%s1379_s9 + $0x28] sm:$0xff] }
  0x18   :  { %855 = vmatprep.subr.bf16.mxu1 %v932_v3  ;;  %v432_v52 = vld [vmem:[%s1379_s9 + $0x20] sm:$0xff]  ;;  %v434_v55 = vld [vmem:[%s1379_s9 + $0x30] sm:$0xff]  ;;  %v435_v56 = vld [vmem:[%s1379_s9 + $0x38] sm:$0xff] }
  0x19   :  { %834 = vmatpush3.bf16.msra.mxu0 %v833_v50  ;;  %v431_v50 = vld [vmem:[%s1379_s9 + $0x18] sm:$0xff]  ;;  %v892_v54 = vpack.c.bf16 %v433_v53, %v432_v52  ;;  %v895_v57 = vpack.c.bf16 %v435_v56, %v434_v55  ;;  %v518_v58 = vld [vmem:[%s1382_s11 + $0x8] sm:$0xff]  ;;  %v519_v61 = vld [vmem:[%s1382_s11 + $0x10] sm:$0xff]  ;;  %v551_v52 = vlaneseq }
  0x1a   :  { %836 = vmatprep.subr.bf16.mxu0 %v835_v51  ;;  %v889_v51 = vpack.c.bf16 %v431_v50, %v430_v49  ;;  %v522_v62 = vld [vmem:[%s1382_s11 + $0x28] sm:$0xff]  ;;  %v528_v6 = vld [vmem:[%s1382_s11 + $0x58] sm:$0xff]  ;;  %v525_v9 = vld [vmem:[%s1382_s11 + $0x40] sm:$0xff] }
  0x1b   :  { %857 = vmatpush3.bf16.msra.mxu1 %v856_v63  ;;  %v524_v63 = vld [vmem:[%s1382_s11 + $0x38] sm:$0xff]  ;;  %v527_v10 = vld [vmem:[%s1382_s11 + $0x50] sm:$0xff]  ;;  %v534_v17 = vld [vmem:[%s1382_s11 + $0x88] sm:$0xff]  ;;  %v552_v53 = vshrl.u32 %v551_v52, 7 }
  0x1c   :  { %858 = vmatprep.subr.bf16.mxu1 %v932_v3  ;;  %v901_v1 = vpack.c.bf16 %v524_v63, %v522_v62  ;;  %v536_v18 = vld [vmem:[%s1382_s11 + $0x98] sm:$0xff]  ;;  %v535_v22 = vld [vmem:[%s1382_s11 + $0x90] sm:$0xff]  ;;  %v538_v23 = vld [vmem:[%s1382_s11 + $0xa8] sm:$0xff] }
  0x1d   :  { %838 = vmatpush3.bf16.msra.mxu0 %v837_v59  ;;  %v520_v59 = vld [vmem:[%s1382_s11 + $0x18] sm:$0xff]  ;;  %v539_v28 = vld [vmem:[%s1382_s11 + $0xb0] sm:$0xff]  ;;  %v542_v29 = vld [vmem:[%s1382_s11 + $0xc8] sm:$0xff]  ;;  %v557_v56 = vsub.s32 1, %v552_v53 }
  0x1e   :  { %840 = vmatprep.subr.bf16.mxu0 %v839_v60  ;;  %v897_v60 = vpack.c.bf16 %v520_v59, %v518_v58  ;;  %v541_v33 = vld [vmem:[%s1382_s11 + $0xc0] sm:$0xff]  ;;  %v548_v42 = vld [vmem:[%s1382_s11 + $0xf8] sm:$0xff] }
  0x1f   :  { %860 = vmatpush3.bf16.msra.mxu1 %v859_v4  ;;  %v523_v4 = vld [vmem:[%s1382_s11 + $0x30] sm:$0xff]  ;;  %v549_v55 = vld [vmem:[%s1385_s12] sm:$0x3] }
  0x20   :  { %861 = vmatprep.subr.bf16.mxu1 %v932_v3  ;;  %v558_v58 = vrot.slane %v549_v55, %v557_v56 }
  0x21   :  { %842 = vmatpush3.bf16.msra.mxu0 %v841_v2  ;;  %v521_v2 = vld [vmem:[%s1382_s11 + $0x20] sm:$0xff] }
  0x22   :  { %898 = vmatprep.subr.bf16.mxu0 %v897_v60  ;;  %v903_v7 = vpack.c.bf16 %v523_v4, %v521_v2 }
  0x23   :  { %863 = vmatpush3.bf16.msra.mxu1 %v862_v8 }
  0x24   :  { %152 = vmatmul.mubr.f32.vlgmr.msra.gmra.mrb[0].mxu0 %v46_v5  ;;  %864 = vmatprep.subr.bf16.mxu1 %v932_v3  ;;  %v526_v5 = vld [vmem:[%s1382_s11 + $0x48] sm:$0xff] }
  0x25   :  { %625 = vmatprep.mubr.f32.mxu0 %v934_v12  ;;  %v905_v8 = vpack.c.bf16 %v528_v6, %v526_v5 }
  0x27   :  { %866 = vmatpush3.bf16.msra.mxu1 %v865_v11  ;;  %v530_v11 = vld [vmem:[%s1382_s11 + $0x68] sm:$0xff] }
  0x28   :  { %867 = vmatprep.subr.bf16.mxu1 %v932_v3 }
  0xf7   :  { %v684_v13 = vpop.f32.mrb[0].mxu0 }
  0xf8   :  { %v685_v15 = vpop.f32.mrb[1].mxu0 }
  0xf9   :  { %v686_v16 = vadd.f32 %v685_v15, %v684_v13  ;;  %v907_v13 = vpack.c.bf16 %v527_v10, %v525_v9  ;;  %v529_v15 = vld [vmem:[%s1382_s11 + $0x60] sm:$0xff] }
  0xfb   :  { %v154_v19 = vadd.f32 %v686_v16, %v644_v14  ;;  %v531_v16 = vld [vmem:[%s1382_s11 + $0x70] sm:$0xff] }
  0xfd   :  { %v157_v21 = vmax.f32 %v154_v19, 0.0  ;;  %v911_v19 = vpack.c.bf16 %v531_v16, %v529_v15 }
  0xff   :  { %760 = vmatmul.mubr.f32.vlgmr.msra.gmra.mrb[0].mxu1 %v157_v21  ;;  %v533_v21 = vld [vmem:[%s1382_s11 + $0x80] sm:$0xff] }
 0x100   :  { %869 = vmatpush3.bf16.msra.mxu1 %v868_v20  ;;  %778 = vmatprep.mubr.msk.f32.mxu1 %vm933_vm0, %v934_v12  ;;  %v913_v20 = vpack.c.bf16 %v536_v18, %v534_v17  ;;  %v915_v25 = vpack.c.bf16 %v535_v22, %v533_v21 }
 0x101   :  { %870 = vmatprep.subr.bf16.mxu1 %v932_v3 }
 0x104   :  { %872 = vmatpush3.bf16.msra.mxu1 %v871_v24  ;;  %v540_v24 = vld [vmem:[%s1382_s11 + $0xb8] sm:$0xff] }
 0x105   :  { %873 = vmatprep.subr.bf16.mxu1 %v932_v3  ;;  %v917_v26 = vpack.c.bf16 %v540_v24, %v538_v23 }
 0x108   :  { %875 = vmatpush3.bf16.msra.mxu1 %v874_v27  ;;  %v537_v27 = vld [vmem:[%s1382_s11 + $0xa0] sm:$0xff] }
 0x109   :  { %876 = vmatprep.subr.bf16.mxu1 %v932_v3 }
 0x10c   :  { %878 = vmatpush3.bf16.msra.mxu1 %v877_v30  ;;  %v544_v30 = vld [vmem:[%s1382_s11 + $0xd8] sm:$0xff] }
 0x10d   :  { %879 = vmatprep.subr.bf16.mxu1 %v932_v3  ;;  %v921_v32 = vpack.c.bf16 %v544_v30, %v542_v29 }
 0x1d2   :  { %v247_v34 = vpop.f32.mrb[0].mxu1 }
 0x1d3   :  { %v248_v35 = vadd.f32 %v645_v31, %v247_v34  ;;  %v761_v36 = vpop.f32.mrb[1].mxu1  ;;  %v919_v31 = vpack.c.bf16 %v539_v28, %v537_v27  ;;  %v543_v34 = vld [vmem:[%s1382_s11 + $0xd0] sm:$0xff] }
 0x1d4   :  { %v648_v36 = vld [vmem:[%s1383_s8] ss:$0 sm:$0xff] }
 0x1d5   :  { %v251_v38 = vmax.f32 %v248_v35, 0.0  ;;  %v923_v35 = vpack.c.bf16 %v543_v34, %v541_v33 }
 0x1d7   :  { %779 = vmatmul.mubr.msk.f32.vlgmr.msra.gmra.mrb[2].mxu1 %vm267_vm1, %v251_v38 }
 0x1d8   :  { %881 = vmatpush3.bf16.msra.mxu1 %v880_v37  ;;  %789 = vmatprep.mubr.msk.f32.mxu1 %vm933_vm0, %v934_v12 }
 0x1d9   :  { %882 = vmatprep.subr.bf16.mxu1 %v932_v3 }
 0x1dc   :  { %884 = vmatpush3.bf16.msra.mxu1 %v883_v41  ;;  %v546_v41 = vld [vmem:[%s1382_s11 + $0xe8] sm:$0xff] }
 0x1dd   :  { %885 = vmatprep.subr.bf16.mxu1 %v932_v3  ;;  %v925_v43 = vpack.c.bf16 %v548_v42, %v546_v41 }
 0x2aa   :  { %v337_v45 = vpop.f32.mrb[2].mxu1 }
 0x2ab   :  { %v338_v47 = vadd.f32 %v646_v44, %v337_v45  ;;  %v780_v48 = vpop.f32.mrb[3].mxu1  ;;  %v545_v44 = vld [vmem:[%s1382_s11 + $0xe0] sm:$0xff]  ;;  %v547_v45 = vld [vmem:[%s1382_s11 + $0xf0] sm:$0xff] }
 0x2ad   :  { %342 = vst.msk [vmem:[%s1381_s13] sm:$0xff] %vm341_vm2, %v338_v47  ;;  %790 = vmatmul.mubr.msk.f32.vlgmr.msra.gmra.mrb[4].mxu1 %vm341_vm2, %v338_v47  ;;  %v650_v47 = vld [vmem:[%s1384_s10] ss:$0 sm:$0xff] }
 0x2ae   :  { %887 = vmatpush3.bf16.msra.mxu1 %v886_v46  ;;  %808 = vmatprep.mubr.msk.f32.mxu1 %vm933_vm0, %v934_v12  ;;  %v532_v12 = vld [vmem:[%s1382_s11 + $0x78] sm:$0xff]  ;;  %v927_v46 = vpack.c.bf16 %v547_v45, %v545_v44 }
 0x2af   :  { %888 = vmatprep.subr.bf16.mxu1 %v932_v3  ;;  %v909_v14 = vpack.c.bf16 %v532_v12, %v530_v11 }
 0x2b2   :  { %890 = vmatpush3.bf16.msra.mxu1 %v889_v51 }
 0x2b3   :  { %891 = vmatprep.subr.bf16.mxu1 %v932_v3 }
 0x2b6   :  { %893 = vmatpush3.bf16.msra.mxu1 %v892_v54  ;;  %v553_v54 = vsub.s32 0, %v552_v53 }
 0x2b7   :  { %894 = vmatprep.subr.bf16.mxu1 %v932_v3  ;;  %v517_v3 = vld [vmem:[%s1382_s11] sm:$0xff] }
 0x2b8   :  { %v899_v0 = vpack.c.bf16 %v519_v61, %v517_v3 }
 0x2ba   :  { %896 = vmatpush3.bf16.msra.mxu1 %v895_v57  ;;  %900 = vmatpush1.bf16.msra.mxu0 %v899_v0  ;;  %v554_v57 = vrot.slane %v549_v55, %v553_v54 }
 0x2bb   :  { %902 = vmatprep.subr.bf16.mxu0 %v901_v1 }
 0x2be   :  { %904 = vmatpush1.bf16.msra.mxu0 %v903_v7 }
 0x2bf   :  { %906 = vmatprep.subr.bf16.mxu0 %v905_v8 }
 0x2c2   :  { %908 = vmatpush1.bf16.msra.mxu0 %v907_v13 }
 0x2c3   :  { %910 = vmatprep.subr.bf16.mxu0 %v909_v14 }
 0x2c6   :  { %912 = vmatpush1.bf16.msra.mxu0 %v911_v19 }
 0x2c7   :  { %914 = vmatprep.subr.bf16.mxu0 %v913_v20 }
 0x2ca   :  { %916 = vmatpush1.bf16.msra.mxu0 %v915_v25 }
 0x2cb   :  { %918 = vmatprep.subr.bf16.mxu0 %v917_v26 }
 0x2ce   :  { %920 = vmatpush1.bf16.msra.mxu0 %v919_v31 }
 0x2cf   :  { %922 = vmatprep.subr.bf16.mxu0 %v921_v32 }
 0x2d2   :  { %924 = vmatpush1.bf16.msra.mxu0 %v923_v35 }
 0x2d3   :  { %926 = vmatprep.subr.bf16.mxu0 %v925_v43 }
 0x2d6   :  { %928 = vmatpush1.bf16.msra.mxu0 %v927_v46 }
 0x380   :  { %v423_v37 = vpop.f32.mrb[4].mxu1 }
 0x381   :  { %v424_v38 = vadd.f32 %v648_v36, %v423_v37  ;;  %v791_v39 = vpop.f32.mrb[5].mxu1 }
 0x383   :  { %v427_v40 = vmax.f32 %v424_v38, 0.0 }
 0x385   :  { %809 = vmatmul.mubr.msk.f32.vlgmr.msra.gmra.mrb[6].mxu1 %vm267_vm1, %v427_v40 }
 0x458   :  { %v512_v48 = vpop.f32.mrb[6].mxu1 }
 0x459   :  { %v513_v49 = vadd.f32 %v650_v47, %v512_v48  ;;  %v810_v50 = vpop.f32.mrb[7].mxu1 }
 0x45b   :  { %v516_v51 = vmax.f32 %v513_v49, 0.0 }
 0x45d   :  { %626 = vmatmul.mubr.f32.vlgmr.msra.gmra.mrb[2].mxu0 %v516_v51 }
 0x530   :  { %v627_v59 = vpop.f32.mrb[2].mxu0 }
 0x531   :  { %v628_v3 = vadd.f32 %v627_v59, %v554_v57  ;;  %v629_v60 = vpop.f32.mrb[3].mxu0 }
 0x532   :  { %v630_v61 = vadd.f32 %v629_v60, %v558_v58 }
 0x533   :  { %v632_v62 = vmax.f32 %v628_v3, 0.0 }
 0x534   :  { %v633_v63 = vmax.f32 %v630_v61, 0.0 }
 0x535   :  { %634 = vst [vmem:[%s1386_s14] sm:$0xff] %v632_v62 }
 0x536   :  { %635 = vst [vmem:[%s1386_s14 + $0x8] sm:$0xff] %v633_v63 }

// kernel: self_supervised_forward.3
= control target key start
LH: loop header
LB: loop body
LE: loop exit
PB: predicated region body
PF: predicated region fallthrough
CT: control target
= control target key end

     0   :  { %s3834_s0 = inlined_call_operand.vmem [shape: f32[8,51840], index: 0, kind: input, shape index: {}]   ;;  %s3835_s1 = inlined_call_operand.hbm [shape: f32[51840,256], index: 1, kind: input, shape index: {}]   ;;  %s3836_s2 = inlined_call_operand.hbm [shape: f32[1,256], index: 2, kind: input, shape index: {}]   ;;  %s3837_s3 = inlined_call_operand.vmem [shape: f32[8,256], index: 3, kind: output, shape index: {}]  }
   0x1   :  { %3843 = sst [smem:[#allocation9_spill]] %s3835_s1 }
   0x2   :  { %8 = vsyncpa [#allocation3], 0 }
   0x3   :  { %10 = vsyncpa [#allocation3 + $0x1], 0 }
   0x4   :  { %11 = vsyncpa [#allocation5], 0 }
   0x5   :  { %13 = vsyncpa [#allocation5 + $0x1], 0  ;;  %s3091_s12 = smov 0   ;;  %s3093_s13 = smov 0  }
   0x6   :  { %s3095_s14 = smov 0   ;;  %s3097_s15 = smov 0  }
   0x7   :  { %s3099_s16 = smov 0   ;;  %s3101_s17 = smov 0  }
   0x8   :  { %s3103_s18 = smov 0   ;;  %s3105_s19 = smov 0  }
   0x9   :  { %s3107_s20 = smov 0   ;;  %s3109_s21 = smov 0  }
   0xa   :  { %s3111_s22 = smov 0  }
   0xb LB: > { %s28_s23 = sadd.s32 1, %s3052_s20  ;;  %p73_p1 = scmp.ne.s32.totalorder %s3040_s17, %s3036_s16  ;;  %s3060_s22 = sphi %s3111_s22, %s19_s22   ;;  %s3056_s21 = sphi %s3109_s21, %s3869_s21   ;;  %s3052_s20 = sphi %s3107_s20, %s3868_s20   ;;  %s3048_s19 = sphi %s3105_s19, %s3867_s19   ;;  %s3044_s18 = sphi %s3103_s18, %s3866_s18   ;;  %s3040_s17 = sphi %s3101_s17, %s3865_s17   ;;  %s3036_s16 = sphi %s3099_s16, %s3864_s16   ;;  %s3032_s15 = sphi %s3097_s15, %s3863_s15   ;;  %s3028_s14 = sphi %s3095_s14, %s3862_s14   ;;  %s3024_s13 = sphi %s3093_s13, %s3861_s13   ;;  %s3020_s12 = sphi %s3091_s12, %s3860_s12  }
   0xc   : > { %p3148_p0 = scmp.ge.s32.totalorder %s28_s23, 15  ;;  %p3839_p2 = scmp.eq.s32.totalorder %s3060_s22, 0 }
   0xd   : > { %p3838_p4 = scmp.lt.s32.totalorder %s3060_s22, 30  ;;  %s164_s27 = sand.u32 1, %s3040_s17  }
   0xe   : > { %s3871_s23 = smov (%p3148_p0, %s28_s23), 0  ;;  %p75_p3 = por %p3839_p2, %p73_p1 }
   0xf   : > { %s61_s26 = ssub.s32 %s3052_s20, %s3871_s23  ;;  %s2797_s28 = smul.u32 3456, %s164_s27 }
  0x10   : > { %s1849_s29 = smul.u32 864, %s3052_s20  ;;  %p3168_p5 = pnand %p3838_p4, %p75_p3 }
  0x11   : > { %s168_s5 = scalar_lea.vmem [#allocation2], %s2797_s28  ;;  %s3846_s1 = sld [smem:[#allocation9_spill]] }
  0x12   : > { %s174_s4 = sadd.s32 %s3056_s21, %s1849_s29  ;;  %s177_s6 = sshll.u32 %s168_s5, 4  ;;  %s3173_s6 = int_to_ptr.vmem [resolvable:$true] %s177_s6 }
  0x13   : > { %s1839_s7 = sshll.u32 %s174_s4, 7  ;;  %s3180_s11 = scalar_lea.sflag [#allocation3], %s164_s27 }
  0x14   : > { %p2908_p7 = pneg %p3168_p5 }
  0x17   : > { %s3178_s10 = scalar_lea.hbm %s3846_s1, %s1839_s7  ;;  %s2911_s4 = scalar_lea.hbm %s3846_s1, 1658880 }
  0x18   : > { %s2906_s24 = scalar_lea.hbm %s3178_s10, 55296  ;;  %p2912_p10 = scmp.lt.u32.totalorder %s3178_s10, %s3846_s1 }
  0x19   : > { %p2907_p6 = scmp.ne.s32.totalorder %s3178_s10, %s2906_s24  ;;  %p2913_p11 = scmp.lt.u32.totalorder %s2911_s4, %s2906_s24 }
  0x1a   : > { %p2915_p13 = scmp.lt.u32.totalorder %s2906_s24, %s3178_s10 }
  0x1b   : > { %p2909_p8 = pnand %p2908_p7, %p2907_p6  ;;  %p2914_p12 = por %p2913_p11, %p2912_p10 }
  0x1d   : > { %p2910_p9 = pneg %p2909_p8  ;;  %p2916_p1 = por %p2915_p13, %p2914_p12 }
  0x1f   : > { %p2917_p3 = pnand %p2916_p1, %p2910_p9 }
  0x21   : > { %2920 = shalt.err (!%p2917_p3)
}
  0x22   : > { %s2921_s27 = scalar_lea.vmem %s3173_s6, 55296  ;;  %s3062_s8 = smov [#allocation2]  }
  0x23   : > { %p2922_p6 = scmp.ne.s32.totalorder %s3173_s6, %s2921_s27  ;;  %s2926_s9 = sshll.u32 %s3062_s8, 4  ;;  %s2927_s9 = int_to_ptr.vmem [resolvable:$false] %s2926_s9 }
  0x24   : > { %s2928_s28 = scalar_lea.vmem %s2927_s9, 110592  ;;  %p2929_p2 = scmp.lt.s32.totalorder %s3173_s6, %s2927_s9 }
  0x25   : > { %p2924_p8 = pnand %p2922_p6, %p2908_p7  ;;  %p2930_p10 = scmp.lt.s32.totalorder %s2928_s28, %s2921_s27 }
  0x27   : > { %p2925_p4 = pneg %p2924_p8  ;;  %p2931_p11 = por %p2930_p10, %p2929_p2 }
  0x29   : > { %p2932_p12 = pnand %p2931_p11, %p2925_p4 }
  0x2b   : > { %2935 = shalt.err (!%p2932_p12)
}
  0x2c   : > { %s3063_s24 = smov 256   ;;  %s3064_s29 = smov 128  }
  0x2d   : > { %s3065_s4 = smov 8   ;;  %p1841_p2 = scmp.ge.s32.totalorder %s3060_s22, 1 }
  0x2e   : > { %2806 = dma.hbm_to_vmem [thread:$0]  (!%p3168_p5), %s3178_s10, 55296, %s3173_s6, %s3180_s11, %s3063_s24, %s3064_s29, %s3065_s4  }
  0x2f   : > { %p202_p4 = scmp.lt.s32.totalorder %s3060_s22, 31  ;;  %s1834_s7 = sadd.s32 4294967295, %s3060_s22  }
  0x30   : > { %s31_s27 = sadd.s32 1, %s3056_s21  ;;  %p79_p9 = scmp.ne.s32.totalorder %s3036_s16, %s3032_s15 }
  0x31   : > { %p3210_p7 = pnand %p1841_p2, %p202_p4  ;;  %s3873_s27 = smov (!%p3148_p0, %s31_s27), %s3056_s21 }
  0x32   : > { %p80_p13 = scmp.eq.s32.totalorder %s1834_s7, 0  ;;  %s92_s30 = sadd.s32 1, %s3028_s14 }
  0x33   : > { %p33_p5 = scmp.ge.s32.totalorder %s3873_s27, 2  ;;  %p99_p1 = scmp.ne.s32.totalorder %s3028_s14, %s3024_s13 }
  0x34   : > { %p3224_p3 = por %p80_p13, %p79_p9  ;;  %p105_p6 = scmp.ne.s32.totalorder %s3024_s13, %s3020_s12 }
  0x35   : > { %s3875_s27 = smov (%p33_p5, %s3873_s27), 0  ;;  %p3850_p8 = scmp.eq.s32.totalorder %s3060_s22, 0 }
  0x36   : > { %s3848_s6 = scalar_select %p3224_p3, 1, 0 }
  0x37   : > { %3849 = sst [smem:[#allocation8_spill]] %s3875_s27  ;;  %p3234_p10 = por %p99_p1, %p3850_p8 }
  0x38   : > { %p3238_p0 = por %p105_p6, %p80_p13  ;;  %s62_s10 = ssub.s32 %s3056_s21, %s3875_s27 }
  0x39   : > { %s187_s11 = sand.u32 1, %s3028_s14   ;;  %s63_s8 = sor.u32 %s62_s10, %s61_s26 }
  0x3a   : > { %s3852_s25 = scalar_select %p3238_p0, 1, 0 }
  0x3b   : > { %p90_p11 = scmp.eq.s32.totalorder %s62_s10, 0  ;;  %p64_p12 = scmp.eq.s32.totalorder %s63_s8, 0 }
  0x3c   : > { %s3853_s9 = sadd.s32 1, %s3040_s17  ;;  %s1840_s24 = sshll.u32 %s3056_s21, 4 }
  0x3d   : > { %s3249_s12 = scalar_select %p90_p11, %s3028_s14, %s92_s30  }
  0x3e   : > { %s3254_s28 = scalar_select %p64_p12, %s3040_s17, %s3853_s9  }
  0x3f   : > { %s3260_s7 = scalar_lea.hbm %s3836_s2, %s1840_s24  ;;  %s190_s1 = scalar_lea.vmem [#allocation4], %s187_s11 }
  0x40   : > { %s197_s27 = sshll.u32 %s190_s1, 4  ;;  %p3854_p2 = scmp.lt.s32.totalorder %s3060_s22, 30  ;;  %s3262_s27 = int_to_ptr.vmem [resolvable:$true] %s197_s27 }
  0x41   : > { %s188_s30 = scalar_lea.sflag [#allocation5], %s187_s11  ;;  %s2936_s10 = scalar_lea.hbm %s3260_s7, 16 }
  0x42   : > { %p3268_p4 = pnand %p3854_p2, %p3234_p10  ;;  %p2937_p9 = scmp.ne.s32.totalorder %s3260_s7, %s2936_s10 }
  0x43   : > { %s2941_s15 = scalar_lea.hbm %s3836_s2, 32  ;;  %p2942_p6 = scmp.lt.u32.totalorder %s3260_s7, %s3836_s2 }
  0x44   : > { %p2938_p13 = pneg %p3268_p4  ;;  %p2943_p8 = scmp.lt.u32.totalorder %s2941_s15, %s2936_s10 }
  0x45   : > { %p2945_p11 = scmp.lt.u32.totalorder %s2936_s10, %s3260_s7 }
  0x46   : > { %p2939_p5 = pnand %p2938_p13, %p2937_p9  ;;  %p2944_p10 = por %p2943_p8, %p2942_p6 }
  0x48   : > { %p2940_p1 = pneg %p2939_p5  ;;  %p2946_p12 = por %p2945_p11, %p2944_p10 }
  0x4a   : > { %p2947_p2 = pnand %p2946_p12, %p2940_p1 }
  0x4c   : > { %2950 = shalt.err (!%p2947_p2)
}
  0x4d   : > { %s2951_s11 = scalar_lea.vmem %s3262_s27, 16  ;;  %s3066_s29 = smov [#allocation4]  }
  0x4e   : > { %p2952_p9 = scmp.ne.s32.totalorder %s3262_s27, %s2951_s11  ;;  %s2956_s4 = sshll.u32 %s3066_s29, 4  ;;  %s2957_s4 = int_to_ptr.vmem [resolvable:$false] %s2956_s4 }
  0x4f   : > { %s2958_s1 = scalar_lea.vmem %s2957_s4, 32  ;;  %p2959_p3 = scmp.lt.s32.totalorder %s3262_s27, %s2957_s4 }
  0x50   : > { %p2954_p5 = pnand %p2952_p9, %p2938_p13  ;;  %p2960_p6 = scmp.lt.s32.totalorder %s2958_s1, %s2951_s11 }
  0x52   : > { %p2955_p0 = pneg %p2954_p5  ;;  %p2961_p8 = por %p2960_p6, %p2959_p3 }
  0x54   : > { %p2962_p10 = pnand %p2961_p8, %p2955_p0 }
  0x56   : > { %2965 = shalt.err (!%p2962_p10)
}
  0x57   : > { %2809 = dma.hbm_to_vmem [thread:$0]  (!%p3268_p4), %s3260_s7, 16, %s3262_s27, %s188_s30  }
  0x58   : > { %206 = sbr.rel (%p3210_p7) target bundleno = 571 (0x23b), region = 32  ;;  %s208_s10 = sand.u32 (!%p3210_p7), 1, %s3036_s16  }
  0x59   : > { %s2798_s8 = smul.u32 (!%p3210_p7), 3456, %s208_s10  ;;  %s209_s15 = scalar_lea.sflag (!%p3210_p7), [#allocation3], %s208_s10 }
  0x5a   : > { %p3856_p13 = scmp.ne.s32.totalorder (!%p3210_p7), %s3848_s6, 0 }
  0x5b   : > { %s3300_s9 = scalar_lea.vmem (!%p3210_p7), [#allocation2], %s2798_s8 }
  0x5f   : > { %3011 = dma.done.wait (%p3856_p13), %s209_s15, 55296  }
  0x60   : > { %3013 = vsyncadd (%p3856_p13), %s209_s15, 4294912000  ;;  %s217_s26 = sand.u32 1, %s3024_s13   ;;  %p3857_p3 = scmp.ne.s32.totalorder %s3852_s25, 0 }
  0x61   : > { %s218_s24 = scalar_lea.sflag [#allocation5], %s217_s26  ;;  %s3307_s27 = scalar_lea.vmem [#allocation4], %s217_s26 }
  0x62   : > { %3015 = dma.done.wait (%p3857_p3), %s218_s24, 16  }
  0x63   : > { %3017 = vsyncadd (%p3857_p3), %s218_s24, 4294967280  ;;  %s251_s5 = smul.u32 27, %s3044_s18  ;;  %p258_p7 = scmp.lt.s32.totalorder %s3048_s19, 1 }
  0x64   : > { %p1844_p4 = scmp.ne.s32.totalorder %s3044_s18, 0 }
  0x65   : > { %p252_p0 = scmp.lt.s32.totalorder %s251_s5, 404  ;;  %s3877_s19 = smov (!%p258_p7, %s3048_s19), 1  ;;  %v3067_v0 = vmov (!%p1844_p4), 0.0  }
  0x66   : > { %s1843_s6 = sshll.u32 %s3877_s19, 3  ;;  %265 = sbr.rel (%p1844_p4) target bundleno = 109 (0x6d), region = 44 }
  0x67   : > { %s3879_s5 = smov (!%p252_p0, %s251_s5), 404  ;;  %s3319_s29 = scalar_lea.vmem %s3837_s3, %s1843_s6 }
  0x68   : > { %s1842_s7 = sshll.u32 %s3879_s5, 3  ;;  %266 = vst [vmem:[%s3319_s29] sm:$0xff] (!%p1844_p4), %v3067_v0 }
  0x69   : > { %s3324_s25 = scalar_lea.vmem %s3834_s0, %s1842_s7 }
  0x6d PF: > { %v311_v1 = vld [vmem:[%s3300_s9 + $0x80] sm:$0xff]  ;;  %v312_v2 = vld [vmem:[%s3300_s9 + $0x88] sm:$0xff]  ;;  %v313_v12 = vld [vmem:[%s3300_s9 + $0x90] sm:$0xff]  ;;  %vm3069_vm0 = vmmov 0   ;;  %p1845_p1 = scmp.ne.s32.totalorder %s3044_s18, 14 }
  0x6e   : > { %v343_v3 = vld [vmem:[%s3300_s9 + $0x180] sm:$0xff]  ;;  %v2357_v4 = vpack.c.bf16 %v312_v2, %v311_v1  ;;  %v344_v5 = vld [vmem:[%s3300_s9 + $0x188] sm:$0xff]  ;;  %v314_v14 = vld [vmem:[%s3300_s9 + $0x98] sm:$0xff] }
  0x6f   : > { %v295_v6 = vld [vmem:[%s3300_s9] sm:$0xff]  ;;  %v296_v7 = vld [vmem:[%s3300_s9 + $0x8] sm:$0xff]  ;;  %v2389_v8 = vpack.c.bf16 %v344_v5, %v343_v3  ;;  %v345_v15 = vld [vmem:[%s3300_s9 + $0x190] sm:$0xff]  ;;  %v2361_v17 = vpack.c.bf16 %v314_v14, %v313_v12 }
  0x70   : > { %v2359_v9 = vpack.c.bf16 %v296_v7, %v295_v6  ;;  %v327_v10 = vld [vmem:[%s3300_s9 + $0x100] sm:$0xff]  ;;  %v328_v11 = vld [vmem:[%s3300_s9 + $0x108] sm:$0xff]  ;;  %2358 = vmatprep.subr.bf16.mxu0 %v2357_v4  ;;  %v346_v16 = vld [vmem:[%s3300_s9 + $0x198] sm:$0xff] }
  0x71   : > { %v2391_v13 = vpack.c.bf16 %v328_v11, %v327_v10  ;;  %2390 = vmatprep.subr.bf16.mxu1 %v2389_v8  ;;  %v2393_v18 = vpack.c.bf16 %v346_v16, %v345_v15  ;;  %v297_v19 = vld [vmem:[%s3300_s9 + $0x10] sm:$0xff]  ;;  %v298_v20 = vld [vmem:[%s3300_s9 + $0x18] sm:$0xff]  ;;  %v315_v24 = vld [vmem:[%s3300_s9 + $0xa0] sm:$0xff] }
  0x72   : > { %2360 = vmatpush3.bf16.msra.mxu0 %v2359_v9  ;;  %v329_v21 = vld [vmem:[%s3300_s9 + $0x110] sm:$0xff]  ;;  %v2363_v22 = vpack.c.bf16 %v298_v20, %v297_v19  ;;  %v330_v23 = vld [vmem:[%s3300_s9 + $0x118] sm:$0xff]  ;;  %v316_v25 = vld [vmem:[%s3300_s9 + $0xa8] sm:$0xff] }
  0x73   : > { %2392 = vmatpush3.bf16.msra.mxu1 %v2391_v13  ;;  %2362 = vmatprep.subr.bf16.mxu0 %v2361_v17  ;;  %v2395_v26 = vpack.c.bf16 %v330_v23, %v329_v21  ;;  %v2365_v27 = vpack.c.bf16 %v316_v25, %v315_v24  ;;  %v347_v28 = vld [vmem:[%s3300_s9 + $0x1a0] sm:$0xff]  ;;  %v348_v29 = vld [vmem:[%s3300_s9 + $0x1a8] sm:$0xff]  ;;  %v317_v36 = vld [vmem:[%s3300_s9 + $0xb0] sm:$0xff] }
  0x74   : > { %2394 = vmatprep.subr.bf16.mxu1 %v2393_v18  ;;  %v299_v30 = vld [vmem:[%s3300_s9 + $0x20] sm:$0xff]  ;;  %v2397_v31 = vpack.c.bf16 %v348_v29, %v347_v28  ;;  %v300_v32 = vld [vmem:[%s3300_s9 + $0x28] sm:$0xff]  ;;  %v318_v37 = vld [vmem:[%s3300_s9 + $0xb8] sm:$0xff] }
  0x75   : > { %v331_v33 = vld [vmem:[%s3300_s9 + $0x120] sm:$0xff]  ;;  %v332_v34 = vld [vmem:[%s3300_s9 + $0x128] sm:$0xff]  ;;  %v2367_v35 = vpack.c.bf16 %v300_v32, %v299_v30  ;;  %v349_v38 = vld [vmem:[%s3300_s9 + $0x1b0] sm:$0xff]  ;;  %v2369_v40 = vpack.c.bf16 %v318_v37, %v317_v36 }
  0x76   : > { %2364 = vmatpush3.bf16.msra.mxu0 %v2363_v22  ;;  %v2399_v39 = vpack.c.bf16 %v332_v34, %v331_v33  ;;  %v350_v41 = vld [vmem:[%s3300_s9 + $0x1b8] sm:$0xff]  ;;  %v301_v42 = vld [vmem:[%s3300_s9 + $0x30] sm:$0xff]  ;;  %v319_v47 = vld [vmem:[%s3300_s9 + $0xc0] sm:$0xff] }
  0x77   : > { %2396 = vmatpush3.bf16.msra.mxu1 %v2395_v26  ;;  %2366 = vmatprep.subr.bf16.mxu0 %v2365_v27  ;;  %v302_v43 = vld [vmem:[%s3300_s9 + $0x38] sm:$0xff]  ;;  %v2401_v44 = vpack.c.bf16 %v350_v41, %v349_v38  ;;  %v333_v45 = vld [vmem:[%s3300_s9 + $0x130] sm:$0xff]  ;;  %v320_v48 = vld [vmem:[%s3300_s9 + $0xc8] sm:$0xff] }
  0x78   : > { %2398 = vmatprep.subr.bf16.mxu1 %v2397_v31  ;;  %v334_v46 = vld [vmem:[%s3300_s9 + $0x138] sm:$0xff]  ;;  %v351_v49 = vld [vmem:[%s3300_s9 + $0x1c0] sm:$0xff]  ;;  %v352_v50 = vld [vmem:[%s3300_s9 + $0x1c8] sm:$0xff]  ;;  %v2371_v51 = vpack.c.bf16 %v302_v43, %v301_v42  ;;  %v2373_v53 = vpack.c.bf16 %v320_v48, %v319_v47 }
  0x79   : > { %v2403_v52 = vpack.c.bf16 %v334_v46, %v333_v45  ;;  %v303_v54 = vld [vmem:[%s3300_s9 + $0x40] sm:$0xff]  ;;  %v304_v55 = vld [vmem:[%s3300_s9 + $0x48] sm:$0xff]  ;;  %v2405_v57 = vpack.c.bf16 %v352_v50, %v351_v49  ;;  %v321_v59 = vld [vmem:[%s3300_s9 + $0xd0] sm:$0xff] }
  0x7a   : > { %2368 = vmatpush3.bf16.msra.mxu0 %v2367_v35  ;;  %v335_v56 = vld [vmem:[%s3300_s9 + $0x140] sm:$0xff]  ;;  %v336_v58 = vld [vmem:[%s3300_s9 + $0x148] sm:$0xff]  ;;  %v322_v60 = vld [vmem:[%s3300_s9 + $0xd8] sm:$0xff]  ;;  %v2375_v63 = vpack.c.bf16 %v304_v55, %v303_v54 }
  0x7b   : > { %2400 = vmatpush3.bf16.msra.mxu1 %v2399_v39  ;;  %2370 = vmatprep.subr.bf16.mxu0 %v2369_v40  ;;  %v353_v61 = vld [vmem:[%s3300_s9 + $0x1d0] sm:$0xff]  ;;  %v354_v62 = vld [vmem:[%s3300_s9 + $0x1d8] sm:$0xff]  ;;  %v2407_v0 = vpack.c.bf16 %v336_v58, %v335_v56  ;;  %v2377_v1 = vpack.c.bf16 %v322_v60, %v321_v59  ;;  %v323_v7 = vld [vmem:[%s3300_s9 + $0xe0] sm:$0xff] }
  0x7c   : > { %2402 = vmatprep.subr.bf16.mxu1 %v2401_v44  ;;  %v305_v2 = vld [vmem:[%s3300_s9 + $0x50] sm:$0xff]  ;;  %v306_v3 = vld [vmem:[%s3300_s9 + $0x58] sm:$0xff]  ;;  %v2409_v5 = vpack.c.bf16 %v354_v62, %v353_v61  ;;  %v324_v8 = vld [vmem:[%s3300_s9 + $0xe8] sm:$0xff] }
  0x7d   : > { %v337_v4 = vld [vmem:[%s3300_s9 + $0x150] sm:$0xff]  ;;  %v338_v6 = vld [vmem:[%s3300_s9 + $0x158] sm:$0xff]  ;;  %v355_v9 = vld [vmem:[%s3300_s9 + $0x1e0] sm:$0xff]  ;;  %v2379_v11 = vpack.c.bf16 %v306_v3, %v305_v2  ;;  %v2381_v15 = vpack.c.bf16 %v324_v8, %v323_v7 }
  0x7e   : > { %2372 = vmatpush3.bf16.msra.mxu0 %v2371_v51  ;;  %v356_v10 = vld [vmem:[%s3300_s9 + $0x1e8] sm:$0xff]  ;;  %v307_v12 = vld [vmem:[%s3300_s9 + $0x60] sm:$0xff]  ;;  %v2411_v14 = vpack.c.bf16 %v338_v6, %v337_v4  ;;  %v271_v18 = vld [vmem:[%s3324_s25 + $0x18] sm:$0xff] }
  0x7f   : > { %2404 = vmatpush3.bf16.msra.mxu1 %v2403_v52  ;;  %2374 = vmatprep.subr.bf16.mxu0 %v2373_v53  ;;  %v308_v13 = vld [vmem:[%s3300_s9 + $0x68] sm:$0xff]  ;;  %v339_v16 = vld [vmem:[%s3300_s9 + $0x160] sm:$0xff]  ;;  %v2413_v19 = vpack.c.bf16 %v356_v10, %v355_v9  ;;  %v325_v21 = vld [vmem:[%s3300_s9 + $0xf0] sm:$0xff] }
  0x80   : > { %2406 = vmatprep.subr.bf16.mxu1 %v2405_v57  ;;  %v269_v17 = vld [vmem:[%s3324_s25 + $0x8] sm:$0xff]  ;;  %v326_v22 = vld [vmem:[%s3300_s9 + $0xf8] sm:$0xff]  ;;  %v357_v23 = vld [vmem:[%s3300_s9 + $0x1f0] sm:$0xff]  ;;  %861 = vmatprep.mubr.f32.mxu1 %v271_v18  ;;  %v2383_v25 = vpack.c.bf16 %v308_v13, %v307_v12 }
  0x81   : > { %v340_v20 = vld [vmem:[%s3300_s9 + $0x168] sm:$0xff]  ;;  %791 = vmatprep.mubr.f32.mxu0 %v269_v17  ;;  %v358_v24 = vld [vmem:[%s3300_s9 + $0x1f8] sm:$0xff]  ;;  %v2385_v27 = vpack.c.bf16 %v326_v22, %v325_v21  ;;  %v309_v28 = vld [vmem:[%s3300_s9 + $0x70] sm:$0xff] }
  0x82   : > { %2376 = vmatpush3.bf16.msra.mxu0 %v2375_v63  ;;  %v2415_v26 = vpack.c.bf16 %v340_v20, %v339_v16  ;;  %v310_v29 = vld [vmem:[%s3300_s9 + $0x78] sm:$0xff]  ;;  %v341_v30 = vld [vmem:[%s3300_s9 + $0x170] sm:$0xff]  ;;  %v2417_v31 = vpack.c.bf16 %v358_v24, %v357_v23  ;;  %v375_v33 = vld [vmem:[%s3300_s9 + $0x280] sm:$0xff] }
  0x83   : > { %2408 = vmatpush3.bf16.msra.mxu1 %v2407_v0  ;;  %2378 = vmatprep.subr.bf16.mxu0 %v2377_v1  ;;  %v342_v32 = vld [vmem:[%s3300_s9 + $0x178] sm:$0xff]  ;;  %v376_v34 = vld [vmem:[%s3300_s9 + $0x288] sm:$0xff]  ;;  %v407_v35 = vld [vmem:[%s3300_s9 + $0x380] sm:$0xff]  ;;  %v2387_v37 = vpack.c.bf16 %v310_v29, %v309_v28 }
  0x84   : > { %2410 = vmatprep.subr.bf16.mxu1 %v2409_v5  ;;  %v408_v36 = vld [vmem:[%s3300_s9 + $0x388] sm:$0xff]  ;;  %v2419_v38 = vpack.c.bf16 %v342_v32, %v341_v30  ;;  %v2421_v39 = vpack.c.bf16 %v376_v34, %v375_v33  ;;  %v359_v40 = vld [vmem:[%s3300_s9 + $0x200] sm:$0xff]  ;;  %v377_v45 = vld [vmem:[%s3300_s9 + $0x290] sm:$0xff] }
  0x85   : > { %v360_v41 = vld [vmem:[%s3300_s9 + $0x208] sm:$0xff]  ;;  %v391_v42 = vld [vmem:[%s3300_s9 + $0x300] sm:$0xff]  ;;  %v2453_v43 = vpack.c.bf16 %v408_v36, %v407_v35  ;;  %v378_v46 = vld [vmem:[%s3300_s9 + $0x298] sm:$0xff] }
  0x86   : > { %2380 = vmatpush3.bf16.msra.mxu0 %v2379_v11  ;;  %v392_v44 = vld [vmem:[%s3300_s9 + $0x308] sm:$0xff]  ;;  %v409_v47 = vld [vmem:[%s3300_s9 + $0x390] sm:$0xff]  ;;  %v410_v48 = vld [vmem:[%s3300_s9 + $0x398] sm:$0xff]  ;;  %v2423_v51 = vpack.c.bf16 %v360_v41, %v359_v40  ;;  %v2425_v53 = vpack.c.bf16 %v378_v46, %v377_v45 }
  0x87   : > { %2412 = vmatpush3.bf16.msra.mxu1 %v2411_v14  ;;  %2382 = vmatprep.subr.bf16.mxu0 %v2381_v15  ;;  %v268_v49 = vld [vmem:[%s3324_s25] sm:$0xff]  ;;  %v270_v50 = vld [vmem:[%s3324_s25 + $0x10] sm:$0xff]  ;;  %v2455_v52 = vpack.c.bf16 %v392_v44, %v391_v42  ;;  %v362_v55 = vld [vmem:[%s3300_s9 + $0x218] sm:$0xff]  ;;  %v2457_v57 = vpack.c.bf16 %v410_v48, %v409_v47 }
  0x88   : > { %2414 = vmatprep.subr.bf16.mxu1 %v2413_v19  ;;  %v361_v54 = vld [vmem:[%s3300_s9 + $0x210] sm:$0xff]  ;;  %v394_v58 = vld [vmem:[%s3300_s9 + $0x318] sm:$0xff]  ;;  %v379_v59 = vld [vmem:[%s3300_s9 + $0x2a0] sm:$0xff] }
  0x89   : > { %v393_v56 = vld [vmem:[%s3300_s9 + $0x310] sm:$0xff]  ;;  %v380_v60 = vld [vmem:[%s3300_s9 + $0x2a8] sm:$0xff]  ;;  %v411_v61 = vld [vmem:[%s3300_s9 + $0x3a0] sm:$0xff]  ;;  %v2427_v63 = vpack.c.bf16 %v362_v55, %v361_v54 }
  0x8a   : > { %2384 = vmatpush3.bf16.msra.mxu0 %v2383_v25  ;;  %v412_v62 = vld [vmem:[%s3300_s9 + $0x3a8] sm:$0xff]  ;;  %v2459_v0 = vpack.c.bf16 %v394_v58, %v393_v56  ;;  %v2429_v1 = vpack.c.bf16 %v380_v60, %v379_v59  ;;  %v363_v2 = vld [vmem:[%s3300_s9 + $0x220] sm:$0xff]  ;;  %v381_v7 = vld [vmem:[%s3300_s9 + $0x2b0] sm:$0xff] }
  0x8b   : > { %2416 = vmatpush3.bf16.msra.mxu1 %v2415_v26  ;;  %2386 = vmatprep.subr.bf16.mxu0 %v2385_v27  ;;  %v364_v3 = vld [vmem:[%s3300_s9 + $0x228] sm:$0xff]  ;;  %v395_v4 = vld [vmem:[%s3300_s9 + $0x320] sm:$0xff]  ;;  %v2461_v5 = vpack.c.bf16 %v412_v62, %v411_v61  ;;  %v382_v8 = vld [vmem:[%s3300_s9 + $0x2b8] sm:$0xff] }
  0x8c   : > { %2418 = vmatprep.subr.bf16.mxu1 %v2417_v31  ;;  %v396_v6 = vld [vmem:[%s3300_s9 + $0x328] sm:$0xff]  ;;  %v413_v9 = vld [vmem:[%s3300_s9 + $0x3b0] sm:$0xff]  ;;  %v414_v10 = vld [vmem:[%s3300_s9 + $0x3b8] sm:$0xff]  ;;  %v2431_v11 = vpack.c.bf16 %v364_v3, %v363_v2  ;;  %v2433_v13 = vpack.c.bf16 %v382_v8, %v381_v7 }
  0x8d   : > { %v2463_v12 = vpack.c.bf16 %v396_v6, %v395_v4  ;;  %v365_v14 = vld [vmem:[%s3300_s9 + $0x230] sm:$0xff]  ;;  %v366_v15 = vld [vmem:[%s3300_s9 + $0x238] sm:$0xff]  ;;  %v2465_v17 = vpack.c.bf16 %v414_v10, %v413_v9  ;;  %v383_v19 = vld [vmem:[%s3300_s9 + $0x2c0] sm:$0xff] }
  0x8e   : > { %2388 = vmatpush3.bf16.msra.mxu0 %v2387_v37  ;;  %v397_v16 = vld [vmem:[%s3300_s9 + $0x330] sm:$0xff]  ;;  %v398_v18 = vld [vmem:[%s3300_s9 + $0x338] sm:$0xff]  ;;  %v384_v20 = vld [vmem:[%s3300_s9 + $0x2c8] sm:$0xff]  ;;  %v2435_v24 = vpack.c.bf16 %v366_v15, %v365_v14 }
  0x8f   : > { %2420 = vmatpush3.bf16.msra.mxu1 %v2419_v38  ;;  %2422 = vmatprep.subr.bf16.mxu0 %v2421_v39  ;;  %v415_v21 = vld [vmem:[%s3300_s9 + $0x3c0] sm:$0xff]  ;;  %v416_v22 = vld [vmem:[%s3300_s9 + $0x3c8] sm:$0xff]  ;;  %v2467_v26 = vpack.c.bf16 %v398_v18, %v397_v16  ;;  %v2437_v27 = vpack.c.bf16 %v384_v20, %v383_v19  ;;  %v275_v30 = vld [vmem:[%s3324_s25 + $0x38] sm:$0xff] }
  0x90   : > { %2454 = vmatprep.subr.bf16.mxu1 %v2453_v43  ;;  %v273_v23 = vld [vmem:[%s3324_s25 + $0x28] sm:$0xff]  ;;  %v367_v25 = vld [vmem:[%s3300_s9 + $0x240] sm:$0xff]  ;;  %v2469_v31 = vpack.c.bf16 %v416_v22, %v415_v21  ;;  %v385_v33 = vld [vmem:[%s3300_s9 + $0x2d0] sm:$0xff] }
  0x91   : > { %792 = vmatmul.mubr.f32.vlgmr.msra.gmra.mrb[0].mxu0 %v268_v49  ;;  %v368_v28 = vld [vmem:[%s3300_s9 + $0x248] sm:$0xff]  ;;  %v399_v29 = vld [vmem:[%s3300_s9 + $0x340] sm:$0xff]  ;;  %v386_v34 = vld [vmem:[%s3300_s9 + $0x2d8] sm:$0xff] }
  0x92   : > { %862 = vmatmul.mubr.f32.vlgmr.msra.gmra.mrb[0].mxu1 %v270_v50  ;;  %2424 = vmatpush3.bf16.msra.mxu0 %v2423_v51  ;;  %v400_v32 = vld [vmem:[%s3300_s9 + $0x348] sm:$0xff]  ;;  %v417_v35 = vld [vmem:[%s3300_s9 + $0x3d0] sm:$0xff]  ;;  %v418_v36 = vld [vmem:[%s3300_s9 + $0x3d8] sm:$0xff]  ;;  %v2439_v37 = vpack.c.bf16 %v368_v28, %v367_v25  ;;  %v2441_v39 = vpack.c.bf16 %v386_v34, %v385_v33 }
  0x93   : > { %2456 = vmatpush3.bf16.msra.mxu1 %v2455_v52  ;;  %2426 = vmatprep.subr.bf16.mxu0 %v2425_v53  ;;  %v2471_v38 = vpack.c.bf16 %v400_v32, %v399_v29  ;;  %v369_v40 = vld [vmem:[%s3300_s9 + $0x250] sm:$0xff]  ;;  %v370_v41 = vld [vmem:[%s3300_s9 + $0x258] sm:$0xff]  ;;  %v2473_v43 = vpack.c.bf16 %v418_v36, %v417_v35  ;;  %v387_v45 = vld [vmem:[%s3300_s9 + $0x2e0] sm:$0xff] }
  0x94   : > { %2458 = vmatprep.subr.bf16.mxu1 %v2457_v57  ;;  %931 = vmatprep.mubr.f32.mxu0 %v273_v23  ;;  %v401_v42 = vld [vmem:[%s3300_s9 + $0x350] sm:$0xff]  ;;  %v402_v44 = vld [vmem:[%s3300_s9 + $0x358] sm:$0xff]  ;;  %v388_v46 = vld [vmem:[%s3300_s9 + $0x2e8] sm:$0xff]  ;;  %v2443_v49 = vpack.c.bf16 %v370_v41, %v369_v40 }
  0x95   : > { %1001 = vmatprep.mubr.f32.mxu1 %v275_v30  ;;  %v419_v47 = vld [vmem:[%s3300_s9 + $0x3e0] sm:$0xff]  ;;  %v420_v48 = vld [vmem:[%s3300_s9 + $0x3e8] sm:$0xff]  ;;  %v2475_v50 = vpack.c.bf16 %v402_v44, %v401_v42  ;;  %v2445_v51 = vpack.c.bf16 %v388_v46, %v387_v45  ;;  %v389_v57 = vld [vmem:[%s3300_s9 + $0x2f0] sm:$0xff] }
  0x96   : > { %2428 = vmatpush3.bf16.msra.mxu0 %v2427_v63  ;;  %v371_v52 = vld [vmem:[%s3300_s9 + $0x260] sm:$0xff]  ;;  %v372_v53 = vld [vmem:[%s3300_s9 + $0x268] sm:$0xff]  ;;  %v2477_v55 = vpack.c.bf16 %v420_v48, %v419_v47  ;;  %v390_v58 = vld [vmem:[%s3300_s9 + $0x2f8] sm:$0xff] }
  0x97   : > { %2460 = vmatpush3.bf16.msra.mxu1 %v2459_v0  ;;  %2430 = vmatprep.subr.bf16.mxu0 %v2429_v1  ;;  %v403_v54 = vld [vmem:[%s3300_s9 + $0x360] sm:$0xff]  ;;  %v404_v56 = vld [vmem:[%s3300_s9 + $0x368] sm:$0xff]  ;;  %v421_v59 = vld [vmem:[%s3300_s9 + $0x3f0] sm:$0xff]  ;;  %v2447_v61 = vpack.c.bf16 %v372_v53, %v371_v52  ;;  %v2449_v63 = vpack.c.bf16 %v390_v58, %v389_v57 }
  0x98   : > { %2462 = vmatprep.subr.bf16.mxu1 %v2461_v5  ;;  %v422_v60 = vld [vmem:[%s3300_s9 + $0x3f8] sm:$0xff]  ;;  %v2479_v62 = vpack.c.bf16 %v404_v56, %v403_v54  ;;  %v373_v0 = vld [vmem:[%s3300_s9 + $0x270] sm:$0xff]  ;;  %v439_v5 = vld [vmem:[%s3300_s9 + $0x480] sm:$0xff] }
  0x99   : > { %v374_v1 = vld [vmem:[%s3300_s9 + $0x278] sm:$0xff]  ;;  %v405_v2 = vld [vmem:[%s3300_s9 + $0x370] sm:$0xff]  ;;  %v2481_v3 = vpack.c.bf16 %v422_v60, %v421_v59  ;;  %v440_v6 = vld [vmem:[%s3300_s9 + $0x488] sm:$0xff] }
  0x9a   : > { %2432 = vmatpush3.bf16.msra.mxu0 %v2431_v11  ;;  %v406_v4 = vld [vmem:[%s3300_s9 + $0x378] sm:$0xff]  ;;  %v471_v7 = vld [vmem:[%s3300_s9 + $0x580] sm:$0xff]  ;;  %v472_v8 = vld [vmem:[%s3300_s9 + $0x588] sm:$0xff]  ;;  %v2451_v9 = vpack.c.bf16 %v374_v1, %v373_v0  ;;  %v2485_v11 = vpack.c.bf16 %v440_v6, %v439_v5 }
  0x9b   : > { %2464 = vmatpush3.bf16.msra.mxu1 %v2463_v12  ;;  %2434 = vmatprep.subr.bf16.mxu0 %v2433_v13  ;;  %v2483_v10 = vpack.c.bf16 %v406_v4, %v405_v2  ;;  %v423_v12 = vld [vmem:[%s3300_s9 + $0x400] sm:$0xff]  ;;  %v424_v13 = vld [vmem:[%s3300_s9 + $0x408] sm:$0xff]  ;;  %v2517_v15 = vpack.c.bf16 %v472_v8, %v471_v7  ;;  %v442_v18 = vld [vmem:[%s3300_s9 + $0x498] sm:$0xff] }
  0x9c   : > { %2466 = vmatprep.subr.bf16.mxu1 %v2465_v17  ;;  %v455_v14 = vld [vmem:[%s3300_s9 + $0x500] sm:$0xff]  ;;  %v456_v16 = vld [vmem:[%s3300_s9 + $0x508] sm:$0xff]  ;;  %v441_v17 = vld [vmem:[%s3300_s9 + $0x490] sm:$0xff]  ;;  %v2487_v22 = vpack.c.bf16 %v424_v13, %v423_v12 }
  0x9d   : > { %v473_v19 = vld [vmem:[%s3300_s9 + $0x590] sm:$0xff]  ;;  %v474_v20 = vld [vmem:[%s3300_s9 + $0x598] sm:$0xff]  ;;  %v272_v21 = vld [vmem:[%s3324_s25 + $0x20] sm:$0xff]  ;;  %v2489_v25 = vpack.c.bf16 %v442_v18, %v441_v17 }
  0x9e   : > { %2436 = vmatpush3.bf16.msra.mxu0 %v2435_v24  ;;  %v274_v23 = vld [vmem:[%s3324_s25 + $0x30] sm:$0xff]  ;;  %v2519_v24 = vpack.c.bf16 %v456_v16, %v455_v14  ;;  %v2521_v29 = vpack.c.bf16 %v474_v20, %v473_v19  ;;  %v458_v30 = vld [vmem:[%s3300_s9 + $0x518] sm:$0xff]  ;;  %v444_v32 = vld [vmem:[%s3300_s9 + $0x4a8] sm:$0xff] }
  0x9f   : > { %2468 = vmatpush3.bf16.msra.mxu1 %v2467_v26  ;;  %2438 = vmatprep.subr.bf16.mxu0 %v2437_v27  ;;  %v425_v26 = vld [vmem:[%s3300_s9 + $0x410] sm:$0xff]  ;;  %v426_v27 = vld [vmem:[%s3300_s9 + $0x418] sm:$0xff]  ;;  %v475_v33 = vld [vmem:[%s3300_s9 + $0x5a0] sm:$0xff] }
  0xa0   : > { %2470 = vmatprep.subr.bf16.mxu1 %v2469_v31  ;;  %v457_v28 = vld [vmem:[%s3300_s9 + $0x510] sm:$0xff]  ;;  %v443_v31 = vld [vmem:[%s3300_s9 + $0x4a0] sm:$0xff]  ;;  %v476_v34 = vld [vmem:[%s3300_s9 + $0x5a8] sm:$0xff]  ;;  %v2491_v36 = vpack.c.bf16 %v426_v27, %v425_v26 }
  0xa1   : > { %v277_v35 = vld [vmem:[%s3324_s25 + $0x48] sm:$0xff]  ;;  %v427_v40 = vld [vmem:[%s3300_s9 + $0x420] sm:$0xff]  ;;  %v445_v45 = vld [vmem:[%s3300_s9 + $0x4b0] sm:$0xff] }
  0xa2   : > { %2440 = vmatpush3.bf16.msra.mxu0 %v2439_v37  ;;  %v279_v37 = vld [vmem:[%s3324_s25 + $0x58] sm:$0xff]  ;;  %v428_v41 = vld [vmem:[%s3300_s9 + $0x428] sm:$0xff]  ;;  %v459_v42 = vld [vmem:[%s3300_s9 + $0x520] sm:$0xff] }
  0xa3   : > { %2472 = vmatpush3.bf16.msra.mxu1 %v2471_v38  ;;  %2442 = vmatprep.subr.bf16.mxu0 %v2441_v39  ;;  %v2523_v38 = vpack.c.bf16 %v458_v30, %v457_v28  ;;  %v2493_v39 = vpack.c.bf16 %v444_v32, %v443_v31  ;;  %v460_v44 = vld [vmem:[%s3300_s9 + $0x528] sm:$0xff]  ;;  %v446_v46 = vld [vmem:[%s3300_s9 + $0x4b8] sm:$0xff]  ;;  %v477_v47 = vld [vmem:[%s3300_s9 + $0x5b0] sm:$0xff] }
  0xa4   : > { %2474 = vmatprep.subr.bf16.mxu1 %v2473_v43  ;;  %v2525_v43 = vpack.c.bf16 %v476_v34, %v475_v33  ;;  %v478_v48 = vld [vmem:[%s3300_s9 + $0x5b8] sm:$0xff]  ;;  %v429_v52 = vld [vmem:[%s3300_s9 + $0x430] sm:$0xff]  ;;  %v447_v57 = vld [vmem:[%s3300_s9 + $0x4c0] sm:$0xff] }
  0xa5   : > { %v430_v53 = vld [vmem:[%s3300_s9 + $0x438] sm:$0xff]  ;;  %v461_v54 = vld [vmem:[%s3300_s9 + $0x530] sm:$0xff]  ;;  %v448_v58 = vld [vmem:[%s3300_s9 + $0x4c8] sm:$0xff] }
  0xa6   : > { %2444 = vmatpush3.bf16.msra.mxu0 %v2443_v49  ;;  %v2495_v49 = vpack.c.bf16 %v428_v41, %v427_v40  ;;  %v462_v56 = vld [vmem:[%s3300_s9 + $0x538] sm:$0xff]  ;;  %v479_v59 = vld [vmem:[%s3300_s9 + $0x5c0] sm:$0xff]  ;;  %v480_v60 = vld [vmem:[%s3300_s9 + $0x5c8] sm:$0xff] }
  0xa7   : > { %2476 = vmatpush3.bf16.msra.mxu1 %v2475_v50  ;;  %2446 = vmatprep.subr.bf16.mxu0 %v2445_v51  ;;  %v2527_v50 = vpack.c.bf16 %v460_v44, %v459_v42  ;;  %v2497_v51 = vpack.c.bf16 %v446_v46, %v445_v45  ;;  %v431_v0 = vld [vmem:[%s3300_s9 + $0x440] sm:$0xff]  ;;  %v432_v1 = vld [vmem:[%s3300_s9 + $0x448] sm:$0xff]  ;;  %v449_v5 = vld [vmem:[%s3300_s9 + $0x4d0] sm:$0xff] }
  0xa8   : > { %2478 = vmatprep.subr.bf16.mxu1 %v2477_v55  ;;  %v2529_v55 = vpack.c.bf16 %v478_v48, %v477_v47  ;;  %v463_v2 = vld [vmem:[%s3300_s9 + $0x540] sm:$0xff]  ;;  %v464_v4 = vld [vmem:[%s3300_s9 + $0x548] sm:$0xff]  ;;  %v450_v6 = vld [vmem:[%s3300_s9 + $0x4d8] sm:$0xff] }
  0xa9   : > { %v481_v7 = vld [vmem:[%s3300_s9 + $0x5d0] sm:$0xff]  ;;  %v482_v8 = vld [vmem:[%s3300_s9 + $0x5d8] sm:$0xff]  ;;  %v451_v17 = vld [vmem:[%s3300_s9 + $0x4e0] sm:$0xff] }
  0xaa   : > { %2448 = vmatpush3.bf16.msra.mxu0 %v2447_v61  ;;  %v2499_v61 = vpack.c.bf16 %v430_v53, %v429_v52  ;;  %v433_v12 = vld [vmem:[%s3300_s9 + $0x450] sm:$0xff]  ;;  %v434_v13 = vld [vmem:[%s3300_s9 + $0x458] sm:$0xff]  ;;  %v452_v18 = vld [vmem:[%s3300_s9 + $0x4e8] sm:$0xff] }
  0xab   : > { %2480 = vmatpush3.bf16.msra.mxu1 %v2479_v62  ;;  %2450 = vmatprep.subr.bf16.mxu0 %v2449_v63  ;;  %v2531_v62 = vpack.c.bf16 %v462_v56, %v461_v54  ;;  %v2501_v63 = vpack.c.bf16 %v448_v58, %v447_v57  ;;  %v465_v14 = vld [vmem:[%s3300_s9 + $0x550] sm:$0xff]  ;;  %v466_v16 = vld [vmem:[%s3300_s9 + $0x558] sm:$0xff]  ;;  %v483_v19 = vld [vmem:[%s3300_s9 + $0x5e0] sm:$0xff] }
  0xac   : > { %2482 = vmatprep.subr.bf16.mxu1 %v2481_v3  ;;  %v2533_v3 = vpack.c.bf16 %v480_v60, %v479_v59  ;;  %v484_v20 = vld [vmem:[%s3300_s9 + $0x5e8] sm:$0xff]  ;;  %v467_v26 = vld [vmem:[%s3300_s9 + $0x560] sm:$0xff]  ;;  %v454_v30 = vld [vmem:[%s3300_s9 + $0x4f8] sm:$0xff] }
  0xad   : > { %v2541_v27 = vpack.c.bf16 %v484_v20, %v483_v19  ;;  %v468_v28 = vld [vmem:[%s3300_s9 + $0x568] sm:$0xff]  ;;  %v485_v31 = vld [vmem:[%s3300_s9 + $0x5f0] sm:$0xff]  ;;  %v486_v32 = vld [vmem:[%s3300_s9 + $0x5f8] sm:$0xff] }
  0xae   : > { %2452 = vmatpush3.bf16.msra.mxu0 %v2451_v9  ;;  %v2503_v9 = vpack.c.bf16 %v432_v1, %v431_v0  ;;  %v2543_v34 = vpack.c.bf16 %v468_v28, %v467_v26  ;;  %v470_v40 = vld [vmem:[%s3300_s9 + $0x578] sm:$0xff]  ;;  %v503_v41 = vld [vmem:[%s3300_s9 + $0x680] sm:$0xff]  ;;  %v504_v42 = vld [vmem:[%s3300_s9 + $0x688] sm:$0xff] }
  0xaf   : > { %2484 = vmatpush3.bf16.msra.mxu1 %v2483_v10  ;;  %2486 = vmatprep.subr.bf16.mxu0 %v2485_v11  ;;  %v2535_v10 = vpack.c.bf16 %v464_v4, %v463_v2  ;;  %v2505_v11 = vpack.c.bf16 %v450_v6, %v449_v5  ;;  %v536_v44 = vld [vmem:[%s3300_s9 + $0x788] sm:$0xff]  ;;  %v2549_v47 = vpack.c.bf16 %v504_v42, %v503_v41  ;;  %v487_v48 = vld [vmem:[%s3300_s9 + $0x600] sm:$0xff]  ;;  %v505_v53 = vld [vmem:[%s3300_s9 + $0x690] sm:$0xff] }
  0xb0   : > { %2518 = vmatprep.subr.bf16.mxu1 %v2517_v15  ;;  %v2537_v15 = vpack.c.bf16 %v482_v8, %v481_v7  ;;  %v520_v52 = vld [vmem:[%s3300_s9 + $0x708] sm:$0xff]  ;;  %v506_v54 = vld [vmem:[%s3300_s9 + $0x698] sm:$0xff]  ;;  %v276_v57 = vld [vmem:[%s3324_s25 + $0x40] sm:$0xff] }
  0xb1   : > { %932 = vmatmul.mubr.f32.vlgmr.msra.gmra.mrb[2].mxu0 %v272_v21  ;;  %v2507_v21 = vpack.c.bf16 %v434_v13, %v433_v12  ;;  %v538_v56 = vld [vmem:[%s3300_s9 + $0x798] sm:$0xff]  ;;  %v278_v59 = vld [vmem:[%s3324_s25 + $0x50] sm:$0xff]  ;;  %v508_v4 = vld [vmem:[%s3300_s9 + $0x6a8] sm:$0xff] }
  0xb2   : > { %2488 = vmatpush3.bf16.msra.mxu0 %v2487_v22  ;;  %1002 = vmatmul.mubr.f32.vlgmr.msra.gmra.mrb[2].mxu1 %v274_v23  ;;  %v2539_v22 = vpack.c.bf16 %v466_v16, %v465_v14  ;;  %v2509_v23 = vpack.c.bf16 %v452_v18, %v451_v17  ;;  %v521_v0 = vld [vmem:[%s3300_s9 + $0x710] sm:$0xff]  ;;  %v522_v2 = vld [vmem:[%s3300_s9 + $0x718] sm:$0xff]  ;;  %v539_v5 = vld [vmem:[%s3300_s9 + $0x7a0] sm:$0xff] }
  0xb3   : > { %2520 = vmatpush3.bf16.msra.mxu1 %v2519_v24  ;;  %2490 = vmatprep.subr.bf16.mxu0 %v2489_v25  ;;  %v435_v24 = vld [vmem:[%s3300_s9 + $0x460] sm:$0xff]  ;;  %v436_v25 = vld [vmem:[%s3300_s9 + $0x468] sm:$0xff]  ;;  %v509_v17 = vld [vmem:[%s3300_s9 + $0x6b0] sm:$0xff] }
  0xb4   : > { %2522 = vmatprep.subr.bf16.mxu1 %v2521_v29  ;;  %1071 = vmatprep.mubr.f32.mxu0 %v277_v35  ;;  %v453_v29 = vld [vmem:[%s3300_s9 + $0x4f0] sm:$0xff]  ;;  %v2511_v33 = vpack.c.bf16 %v436_v25, %v435_v24  ;;  %v540_v6 = vld [vmem:[%s3300_s9 + $0x7a8] sm:$0xff]  ;;  %v491_v12 = vld [vmem:[%s3300_s9 + $0x620] sm:$0xff] }
  0xb5   : > { %1141 = vmatprep.mubr.f32.mxu1 %v279_v37  ;;  %v2513_v35 = vpack.c.bf16 %v454_v30, %v453_v29  ;;  %v438_v37 = vld [vmem:[%s3300_s9 + $0x478] sm:$0xff]  ;;  %v281_v7 = vld [vmem:[%s3324_s25 + $0x68] sm:$0xff]  ;;  %v523_v14 = vld [vmem:[%s3300_s9 + $0x720] sm:$0xff] }
  0xb6   : > { %2492 = vmatpush3.bf16.msra.mxu0 %v2491_v36  ;;  %v437_v36 = vld [vmem:[%s3300_s9 + $0x470] sm:$0xff]  ;;  %v492_v13 = vld [vmem:[%s3300_s9 + $0x628] sm:$0xff]  ;;  %v510_v18 = vld [vmem:[%s3300_s9 + $0x6b8] sm:$0xff] }
  0xb7   : > { %2524 = vmatpush3.bf16.msra.mxu1 %v2523_v38  ;;  %2494 = vmatprep.subr.bf16.mxu0 %v2493_v39  ;;  %v469_v38 = vld [vmem:[%s3300_s9 + $0x570] sm:$0xff]  ;;  %v2545_v39 = vpack.c.bf16 %v486_v32, %v485_v31  ;;  %v2515_v45 = vpack.c.bf16 %v438_v37, %v437_v36  ;;  %v524_v16 = vld [vmem:[%s3300_s9 + $0x728] sm:$0xff]  ;;  %v542_v20 = vld [vmem:[%s3300_s9 + $0x7b8] sm:$0xff] }
  0xb8   : > { %2526 = vmatprep.subr.bf16.mxu1 %v2525_v43  ;;  %v535_v43 = vld [vmem:[%s3300_s9 + $0x780] sm:$0xff]  ;;  %v2547_v46 = vpack.c.bf16 %v470_v40, %v469_v38  ;;  %v541_v19 = vld [vmem:[%s3300_s9 + $0x7b0] sm:$0xff]  ;;  %v494_v25 = vld [vmem:[%s3300_s9 + $0x638] sm:$0xff] }
  0xb9   : > { %v493_v24 = vld [vmem:[%s3300_s9 + $0x630] sm:$0xff]  ;;  %v526_v28 = vld [vmem:[%s3300_s9 + $0x738] sm:$0xff]  ;;  %v511_v29 = vld [vmem:[%s3300_s9 + $0x6c0] sm:$0xff] }
  0xba   : > { %2496 = vmatpush3.bf16.msra.mxu0 %v2495_v49  ;;  %v488_v49 = vld [vmem:[%s3300_s9 + $0x608] sm:$0xff]  ;;  %v525_v26 = vld [vmem:[%s3300_s9 + $0x730] sm:$0xff]  ;;  %v543_v31 = vld [vmem:[%s3300_s9 + $0x7c0] sm:$0xff] }
  0xbb   : > { %2528 = vmatpush3.bf16.msra.mxu1 %v2527_v50  ;;  %2498 = vmatprep.subr.bf16.mxu0 %v2497_v51  ;;  %v519_v50 = vld [vmem:[%s3300_s9 + $0x700] sm:$0xff]  ;;  %v2581_v51 = vpack.c.bf16 %v536_v44, %v535_v43  ;;  %v2551_v58 = vpack.c.bf16 %v488_v49, %v487_v48  ;;  %v512_v30 = vld [vmem:[%s3300_s9 + $0x6c8] sm:$0xff]  ;;  %v513_v41 = vld [vmem:[%s3300_s9 + $0x6d0] sm:$0xff] }
  0xbc   : > { %2530 = vmatprep.subr.bf16.mxu1 %v2529_v55  ;;  %v537_v55 = vld [vmem:[%s3300_s9 + $0x790] sm:$0xff]  ;;  %v2583_v60 = vpack.c.bf16 %v520_v52, %v519_v50  ;;  %v544_v32 = vld [vmem:[%s3300_s9 + $0x7c8] sm:$0xff]  ;;  %v495_v36 = vld [vmem:[%s3300_s9 + $0x640] sm:$0xff] }
  0xbd   : > { %v2585_v1 = vpack.c.bf16 %v538_v56, %v537_v55  ;;  %v496_v37 = vld [vmem:[%s3300_s9 + $0x648] sm:$0xff]  ;;  %v527_v38 = vld [vmem:[%s3300_s9 + $0x740] sm:$0xff]  ;;  %v514_v42 = vld [vmem:[%s3300_s9 + $0x6d8] sm:$0xff] }
  0xbe   : > { %2500 = vmatpush3.bf16.msra.mxu0 %v2499_v61  ;;  %v2553_v61 = vpack.c.bf16 %v506_v54, %v505_v53  ;;  %v528_v40 = vld [vmem:[%s3300_s9 + $0x748] sm:$0xff]  ;;  %v545_v43 = vld [vmem:[%s3300_s9 + $0x7d0] sm:$0xff]  ;;  %v546_v44 = vld [vmem:[%s3300_s9 + $0x7d8] sm:$0xff] }
  0xbf   : > { %2532 = vmatpush3.bf16.msra.mxu1 %v2531_v62  ;;  %2502 = vmatprep.subr.bf16.mxu0 %v2501_v63  ;;  %v489_v62 = vld [vmem:[%s3300_s9 + $0x610] sm:$0xff]  ;;  %v490_v63 = vld [vmem:[%s3300_s9 + $0x618] sm:$0xff]  ;;  %v515_v53 = vld [vmem:[%s3300_s9 + $0x6e0] sm:$0xff] }
  0xc0   : > { %2534 = vmatprep.subr.bf16.mxu1 %v2533_v3  ;;  %v507_v3 = vld [vmem:[%s3300_s9 + $0x6a0] sm:$0xff]  ;;  %v2555_v8 = vpack.c.bf16 %v490_v63, %v489_v62  ;;  %v497_v48 = vld [vmem:[%s3300_s9 + $0x650] sm:$0xff]  ;;  %v498_v49 = vld [vmem:[%s3300_s9 + $0x658] sm:$0xff] }
  0xc1   : > { %v529_v50 = vld [vmem:[%s3300_s9 + $0x750] sm:$0xff]  ;;  %v530_v52 = vld [vmem:[%s3300_s9 + $0x758] sm:$0xff]  ;;  %v516_v54 = vld [vmem:[%s3300_s9 + $0x6e8] sm:$0xff] }
  0xc2   : > { %2504 = vmatpush3.bf16.msra.mxu0 %v2503_v9  ;;  %v283_v9 = vld [vmem:[%s3324_s25 + $0x78] sm:$0xff]  ;;  %v547_v55 = vld [vmem:[%s3300_s9 + $0x7e0] sm:$0xff]  ;;  %v548_v56 = vld [vmem:[%s3300_s9 + $0x7e8] sm:$0xff] }
  0xc3   : > { %2536 = vmatpush3.bf16.msra.mxu1 %v2535_v10  ;;  %2506 = vmatprep.subr.bf16.mxu0 %v2505_v11  ;;  %v2587_v10 = vpack.c.bf16 %v522_v2, %v521_v0  ;;  %v2557_v11 = vpack.c.bf16 %v508_v4, %v507_v3  ;;  %v531_v62 = vld [vmem:[%s3300_s9 + $0x760] sm:$0xff]  ;;  %v2605_v63 = vpack.c.bf16 %v548_v56, %v547_v55  ;;  %v532_v0 = vld [vmem:[%s3300_s9 + $0x768] sm:$0xff]  ;;  %v518_v2 = vld [vmem:[%s3300_s9 + $0x6f8] sm:$0xff] }
  0xc4   : > { %2538 = vmatprep.subr.bf16.mxu1 %v2537_v15  ;;  %v2589_v15 = vpack.c.bf16 %v540_v6, %v539_v5  ;;  %v549_v3 = vld [vmem:[%s3300_s9 + $0x7f0] sm:$0xff]  ;;  %v550_v4 = vld [vmem:[%s3300_s9 + $0x7f8] sm:$0xff]  ;;  %v2607_v6 = vpack.c.bf16 %v532_v0, %v531_v62 }
  0xc5   : > { %v605_v55 = vld [vmem:[%s3300_s9 + $0x9b0] sm:$0xff]  ;;  %v606_v56 = vld [vmem:[%s3300_s9 + $0x9b8] sm:$0xff] }
  0xc6   : > { %2508 = vmatpush3.bf16.msra.mxu0 %v2507_v21  ;;  %v2559_v21 = vpack.c.bf16 %v492_v13, %v491_v12  ;;  %v534_v12 = vld [vmem:[%s3300_s9 + $0x778] sm:$0xff]  ;;  %v567_v13 = vld [vmem:[%s3300_s9 + $0x880] sm:$0xff]  ;;  %v589_v62 = vld [vmem:[%s3300_s9 + $0x930] sm:$0xff] }
  0xc7   : > { %2540 = vmatpush3.bf16.msra.mxu1 %v2539_v22  ;;  %2510 = vmatprep.subr.bf16.mxu0 %v2509_v23  ;;  %v2591_v22 = vpack.c.bf16 %v524_v16, %v523_v14  ;;  %v2561_v23 = vpack.c.bf16 %v510_v18, %v509_v17  ;;  %v568_v14 = vld [vmem:[%s3300_s9 + $0x888] sm:$0xff]  ;;  %v590_v0 = vld [vmem:[%s3300_s9 + $0x938] sm:$0xff] }
  0xc8   : > { %2542 = vmatprep.subr.bf16.mxu1 %v2541_v27  ;;  %v2593_v27 = vpack.c.bf16 %v542_v20, %v541_v19  ;;  %v600_v16 = vld [vmem:[%s3300_s9 + $0x988] sm:$0xff]  ;;  %v2613_v19 = vpack.c.bf16 %v568_v14, %v567_v13  ;;  %v551_v20 = vld [vmem:[%s3300_s9 + $0x800] sm:$0xff]  ;;  %v577_v13 = vld [vmem:[%s3300_s9 + $0x8d0] sm:$0xff] }
  0xc9   : > { %v578_v14 = vld [vmem:[%s3300_s9 + $0x8d8] sm:$0xff] }
  0xca   : > { %2512 = vmatpush3.bf16.msra.mxu0 %v2511_v33  ;;  %v2563_v33 = vpack.c.bf16 %v494_v25, %v493_v24  ;;  %v584_v24 = vld [vmem:[%s3300_s9 + $0x908] sm:$0xff]  ;;  %v569_v25 = vld [vmem:[%s3300_s9 + $0x890] sm:$0xff] }
  0xcb   : > { %2544 = vmatpush3.bf16.msra.mxu1 %v2543_v34  ;;  %2514 = vmatprep.subr.bf16.mxu0 %v2513_v35  ;;  %v2595_v34 = vpack.c.bf16 %v526_v28, %v525_v26  ;;  %v2565_v35 = vpack.c.bf16 %v512_v30, %v511_v29  ;;  %v570_v26 = vld [vmem:[%s3300_s9 + $0x898] sm:$0xff]  ;;  %v280_v29 = vld [vmem:[%s3324_s25 + $0x60] sm:$0xff] }
  0xcc   : > { %2546 = vmatprep.subr.bf16.mxu1 %v2545_v39  ;;  %v2597_v39 = vpack.c.bf16 %v544_v32, %v543_v31  ;;  %v602_v28 = vld [vmem:[%s3300_s9 + $0x998] sm:$0xff]  ;;  %v282_v31 = vld [vmem:[%s3324_s25 + $0x70] sm:$0xff] }
  0xce   : > { %2516 = vmatpush3.bf16.msra.mxu0 %v2515_v45  ;;  %v2567_v45 = vpack.c.bf16 %v496_v37, %v495_v36  ;;  %v585_v36 = vld [vmem:[%s3300_s9 + $0x910] sm:$0xff] }
  0xcf   : > { %2548 = vmatpush3.bf16.msra.mxu1 %v2547_v46  ;;  %2550 = vmatprep.subr.bf16.mxu0 %v2549_v47  ;;  %v2599_v46 = vpack.c.bf16 %v528_v40, %v527_v38  ;;  %v2569_v47 = vpack.c.bf16 %v514_v42, %v513_v41  ;;  %v586_v38 = vld [vmem:[%s3300_s9 + $0x918] sm:$0xff]  ;;  %v572_v40 = vld [vmem:[%s3300_s9 + $0x8a8] sm:$0xff]  ;;  %v603_v41 = vld [vmem:[%s3300_s9 + $0x9a0] sm:$0xff] }
  0xd0   : > { %2582 = vmatprep.subr.bf16.mxu1 %v2581_v51  ;;  %v2601_v51 = vpack.c.bf16 %v546_v44, %v545_v43  ;;  %v604_v42 = vld [vmem:[%s3300_s9 + $0x9a8] sm:$0xff] }
  0xd1   : > { %1072 = vmatmul.mubr.f32.vlgmr.msra.gmra.mrb[4].mxu0 %v276_v57  ;;  %v2571_v57 = vpack.c.bf16 %v498_v49, %v497_v48  ;;  %v285_v43 = vld [vmem:[%s3324_s25 + $0x88] sm:$0xff]  ;;  %v555_v48 = vld [vmem:[%s3300_s9 + $0x820] sm:$0xff] }
  0xd2   : > { %2552 = vmatpush3.bf16.msra.mxu0 %v2551_v58  ;;  %1142 = vmatmul.mubr.f32.vlgmr.msra.gmra.mrb[4].mxu1 %v278_v59  ;;  %v2603_v58 = vpack.c.bf16 %v530_v52, %v529_v50  ;;  %v2573_v59 = vpack.c.bf16 %v516_v54, %v515_v53  ;;  %v556_v49 = vld [vmem:[%s3300_s9 + $0x828] sm:$0xff]  ;;  %v587_v50 = vld [vmem:[%s3300_s9 + $0x920] sm:$0xff]  ;;  %v573_v53 = vld [vmem:[%s3300_s9 + $0x8b0] sm:$0xff] }
  0xd3   : > { %2584 = vmatpush3.bf16.msra.mxu1 %v2583_v60  ;;  %2554 = vmatprep.subr.bf16.mxu0 %v2553_v61  ;;  %v499_v60 = vld [vmem:[%s3300_s9 + $0x660] sm:$0xff]  ;;  %v500_v61 = vld [vmem:[%s3300_s9 + $0x668] sm:$0xff]  ;;  %v574_v54 = vld [vmem:[%s3300_s9 + $0x8b8] sm:$0xff] }
  0xd4   : > { %2586 = vmatprep.subr.bf16.mxu1 %v2585_v1  ;;  %1211 = vmatprep.mubr.f32.mxu0 %v281_v7  ;;  %v517_v1 = vld [vmem:[%s3300_s9 + $0x6f0] sm:$0xff]  ;;  %v2575_v5 = vpack.c.bf16 %v500_v61, %v499_v60  ;;  %v588_v52 = vld [vmem:[%s3300_s9 + $0x928] sm:$0xff]  ;;  %v558_v61 = vld [vmem:[%s3300_s9 + $0x838] sm:$0xff] }
  0xd5   : > { %1281 = vmatprep.mubr.f32.mxu1 %v283_v9  ;;  %v2577_v7 = vpack.c.bf16 %v518_v2, %v517_v1  ;;  %v502_v9 = vld [vmem:[%s3300_s9 + $0x678] sm:$0xff]  ;;  %v557_v60 = vld [vmem:[%s3300_s9 + $0x830] sm:$0xff]  ;;  %v575_v1 = vld [vmem:[%s3300_s9 + $0x8c0] sm:$0xff] }
  0xd6   : > { %2556 = vmatpush3.bf16.msra.mxu0 %v2555_v8  ;;  %v501_v8 = vld [vmem:[%s3300_s9 + $0x670] sm:$0xff]  ;;  %v576_v2 = vld [vmem:[%s3300_s9 + $0x8c8] sm:$0xff] }
  0xd7   : > { %2588 = vmatpush3.bf16.msra.mxu1 %v2587_v10  ;;  %2558 = vmatprep.subr.bf16.mxu0 %v2557_v11  ;;  %v533_v10 = vld [vmem:[%s3300_s9 + $0x770] sm:$0xff]  ;;  %v2609_v11 = vpack.c.bf16 %v550_v4, %v549_v3  ;;  %v2579_v17 = vpack.c.bf16 %v502_v9, %v501_v8  ;;  %v607_v3 = vld [vmem:[%s3300_s9 + $0x9c0] sm:$0xff]  ;;  %v608_v4 = vld [vmem:[%s3300_s9 + $0x9c8] sm:$0xff] }
  0xd8   : > { %2590 = vmatprep.subr.bf16.mxu1 %v2589_v15  ;;  %v599_v15 = vld [vmem:[%s3300_s9 + $0x980] sm:$0xff]  ;;  %v2611_v18 = vpack.c.bf16 %v534_v12, %v533_v10  ;;  %v560_v9 = vld [vmem:[%s3300_s9 + $0x848] sm:$0xff] }
  0xd9   : > { %v559_v8 = vld [vmem:[%s3300_s9 + $0x840] sm:$0xff]  ;;  %v592_v12 = vld [vmem:[%s3300_s9 + $0x948] sm:$0xff] }
  0xda   : > { %2560 = vmatpush3.bf16.msra.mxu0 %v2559_v21  ;;  %v552_v21 = vld [vmem:[%s3300_s9 + $0x808] sm:$0xff]  ;;  %v591_v10 = vld [vmem:[%s3300_s9 + $0x940] sm:$0xff] }
  0xdb   : > { %2592 = vmatpush3.bf16.msra.mxu1 %v2591_v22  ;;  %2562 = vmatprep.subr.bf16.mxu0 %v2561_v23  ;;  %v583_v22 = vld [vmem:[%s3300_s9 + $0x900] sm:$0xff]  ;;  %v2645_v23 = vpack.c.bf16 %v600_v16, %v599_v15  ;;  %v2615_v30 = vpack.c.bf16 %v552_v21, %v551_v20  ;;  %v609_v15 = vld [vmem:[%s3300_s9 + $0x9d0] sm:$0xff]  ;;  %v610_v16 = vld [vmem:[%s3300_s9 + $0x9d8] sm:$0xff] }
  0xdc   : > { %2594 = vmatprep.subr.bf16.mxu1 %v2593_v27  ;;  %v601_v27 = vld [vmem:[%s3300_s9 + $0x990] sm:$0xff]  ;;  %v2647_v32 = vpack.c.bf16 %v584_v24, %v583_v22  ;;  %v562_v21 = vld [vmem:[%s3300_s9 + $0x858] sm:$0xff] }
  0xdd   : > { %v2649_v37 = vpack.c.bf16 %v602_v28, %v601_v27  ;;  %v561_v20 = vld [vmem:[%s3300_s9 + $0x850] sm:$0xff]  ;;  %v594_v24 = vld [vmem:[%s3300_s9 + $0x958] sm:$0xff]  ;;  %v611_v27 = vld [vmem:[%s3300_s9 + $0x9e0] sm:$0xff] }
  0xde   : > { %2564 = vmatpush3.bf16.msra.mxu0 %v2563_v33  ;;  %v2617_v33 = vpack.c.bf16 %v570_v26, %v569_v25  ;;  %v593_v22 = vld [vmem:[%s3300_s9 + $0x950] sm:$0xff]  ;;  %v579_v25 = vld [vmem:[%s3300_s9 + $0x8e0] sm:$0xff]  ;;  %v580_v26 = vld [vmem:[%s3300_s9 + $0x8e8] sm:$0xff] }
  0xdf   : > { %2596 = vmatpush3.bf16.msra.mxu1 %v2595_v34  ;;  %2566 = vmatprep.subr.bf16.mxu0 %v2565_v35  ;;  %v553_v34 = vld [vmem:[%s3300_s9 + $0x810] sm:$0xff]  ;;  %v554_v35 = vld [vmem:[%s3300_s9 + $0x818] sm:$0xff]  ;;  %v612_v28 = vld [vmem:[%s3300_s9 + $0x9e8] sm:$0xff] }
  0xe0   : > { %2598 = vmatprep.subr.bf16.mxu1 %v2597_v39  ;;  %v571_v39 = vld [vmem:[%s3300_s9 + $0x8a0] sm:$0xff]  ;;  %v2619_v44 = vpack.c.bf16 %v554_v35, %v553_v34  ;;  %v2669_v35 = vpack.c.bf16 %v612_v28, %v611_v27  ;;  %v669_v27 = vld [vmem:[%s3300_s9 + $0xbb0] sm:$0xff]  ;;  %v670_v28 = vld [vmem:[%s3300_s9 + $0xbb8] sm:$0xff] }
  0xe1   : > { %v595_v34 = vld [vmem:[%s3300_s9 + $0x960] sm:$0xff] }
  0xe2   : > { %2568 = vmatpush3.bf16.msra.mxu0 %v2567_v45  ;;  %v287_v45 = vld [vmem:[%s3324_s25 + $0x98] sm:$0xff] }
  0xe3   : > { %2600 = vmatpush3.bf16.msra.mxu1 %v2599_v46  ;;  %2570 = vmatprep.subr.bf16.mxu0 %v2569_v47  ;;  %v2651_v46 = vpack.c.bf16 %v586_v38, %v585_v36  ;;  %v2621_v47 = vpack.c.bf16 %v572_v40, %v571_v39  ;;  %v596_v36 = vld [vmem:[%s3300_s9 + $0x968] sm:$0xff]  ;;  %v582_v38 = vld [vmem:[%s3300_s9 + $0x8f8] sm:$0xff]  ;;  %v613_v39 = vld [vmem:[%s3300_s9 + $0x9f0] sm:$0xff] }
  0xe4   : > { %2602 = vmatprep.subr.bf16.mxu1 %v2601_v51  ;;  %v2653_v51 = vpack.c.bf16 %v604_v42, %v603_v41  ;;  %v614_v40 = vld [vmem:[%s3300_s9 + $0x9f8] sm:$0xff]  ;;  %v2671_v42 = vpack.c.bf16 %v596_v36, %v595_v34  ;;  %v653_v34 = vld [vmem:[%s3300_s9 + $0xb30] sm:$0xff] }
  0xe5   : > { %v654_v36 = vld [vmem:[%s3300_s9 + $0xb38] sm:$0xff] }
  0xe6   : > { %2572 = vmatpush3.bf16.msra.mxu0 %v2571_v57  ;;  %v2623_v57 = vpack.c.bf16 %v556_v49, %v555_v48  ;;  %v598_v48 = vld [vmem:[%s3300_s9 + $0x978] sm:$0xff]  ;;  %v631_v49 = vld [vmem:[%s3300_s9 + $0xa80] sm:$0xff] }
  0xe7   : > { %2604 = vmatpush3.bf16.msra.mxu1 %v2603_v58  ;;  %2574 = vmatprep.subr.bf16.mxu0 %v2573_v59  ;;  %v2655_v58 = vpack.c.bf16 %v588_v52, %v587_v50  ;;  %v2625_v59 = vpack.c.bf16 %v574_v54, %v573_v53  ;;  %v632_v50 = vld [vmem:[%s3300_s9 + $0xa88] sm:$0xff] }
  0xe8   : > { %2606 = vmatprep.subr.bf16.mxu1 %v2605_v63  ;;  %v2657_v63 = vpack.c.bf16 %v606_v56, %v605_v55  ;;  %v664_v52 = vld [vmem:[%s3300_s9 + $0xb88] sm:$0xff]  ;;  %v2677_v55 = vpack.c.bf16 %v632_v50, %v631_v49  ;;  %v615_v56 = vld [vmem:[%s3300_s9 + $0xa00] sm:$0xff]  ;;  %v641_v49 = vld [vmem:[%s3300_s9 + $0xad0] sm:$0xff] }
  0xe9   : > { %v642_v50 = vld [vmem:[%s3300_s9 + $0xad8] sm:$0xff] }
  0xea   : > { %2576 = vmatpush3.bf16.msra.mxu0 %v2575_v5  ;;  %v2627_v5 = vpack.c.bf16 %v558_v61, %v557_v60  ;;  %v648_v60 = vld [vmem:[%s3300_s9 + $0xb08] sm:$0xff]  ;;  %v633_v61 = vld [vmem:[%s3300_s9 + $0xa90] sm:$0xff] }
  0xeb   : > { %2608 = vmatpush3.bf16.msra.mxu1 %v2607_v6  ;;  %2578 = vmatprep.subr.bf16.mxu0 %v2577_v7  ;;  %v2659_v6 = vpack.c.bf16 %v590_v0, %v589_v62  ;;  %v2629_v7 = vpack.c.bf16 %v576_v2, %v575_v1  ;;  %v634_v62 = vld [vmem:[%s3300_s9 + $0xa98] sm:$0xff]  ;;  %v284_v1 = vld [vmem:[%s3324_s25 + $0x80] sm:$0xff] }
  0xec   : > { %2610 = vmatprep.subr.bf16.mxu1 %v2609_v11  ;;  %v2661_v11 = vpack.c.bf16 %v608_v4, %v607_v3  ;;  %v666_v0 = vld [vmem:[%s3300_s9 + $0xb98] sm:$0xff]  ;;  %v286_v3 = vld [vmem:[%s3324_s25 + $0x90] sm:$0xff] }
  0xee   : > { %2580 = vmatpush3.bf16.msra.mxu0 %v2579_v17  ;;  %v2631_v17 = vpack.c.bf16 %v560_v9, %v559_v8  ;;  %v649_v8 = vld [vmem:[%s3300_s9 + $0xb10] sm:$0xff] }
  0xef   : > { %2612 = vmatpush3.bf16.msra.mxu1 %v2611_v18  ;;  %2614 = vmatprep.subr.bf16.mxu0 %v2613_v19  ;;  %v2663_v18 = vpack.c.bf16 %v592_v12, %v591_v10  ;;  %v2633_v19 = vpack.c.bf16 %v578_v14, %v577_v13  ;;  %v650_v10 = vld [vmem:[%s3300_s9 + $0xb18] sm:$0xff]  ;;  %v636_v12 = vld [vmem:[%s3300_s9 + $0xaa8] sm:$0xff]  ;;  %v667_v13 = vld [vmem:[%s3300_s9 + $0xba0] sm:$0xff] }
  0xf0   : > { %2646 = vmatprep.subr.bf16.mxu1 %v2645_v23  ;;  %v2665_v23 = vpack.c.bf16 %v610_v16, %v609_v15  ;;  %v668_v14 = vld [vmem:[%s3300_s9 + $0xba8] sm:$0xff] }
  0xf1   : > { %1212 = vmatmul.mubr.f32.vlgmr.msra.gmra.mrb[6].mxu0 %v280_v29  ;;  %v2635_v29 = vpack.c.bf16 %v562_v21, %v561_v20  ;;  %v289_v15 = vld [vmem:[%s3324_s25 + $0xa8] sm:$0xff]  ;;  %v619_v20 = vld [vmem:[%s3300_s9 + $0xa20] sm:$0xff] }
  0xf2   : > { %2616 = vmatpush3.bf16.msra.mxu0 %v2615_v30  ;;  %1282 = vmatmul.mubr.f32.vlgmr.msra.gmra.mrb[6].mxu1 %v282_v31  ;;  %v2667_v30 = vpack.c.bf16 %v594_v24, %v593_v22  ;;  %v2637_v31 = vpack.c.bf16 %v580_v26, %v579_v25  ;;  %v620_v21 = vld [vmem:[%s3300_s9 + $0xa28] sm:$0xff]  ;;  %v651_v22 = vld [vmem:[%s3300_s9 + $0xb20] sm:$0xff]  ;;  %v637_v25 = vld [vmem:[%s3300_s9 + $0xab0] sm:$0xff] }
  0xf3   : > { %2648 = vmatpush3.bf16.msra.mxu1 %v2647_v32  ;;  %2618 = vmatprep.subr.bf16.mxu0 %v2617_v33  ;;  %v563_v32 = vld [vmem:[%s3300_s9 + $0x860] sm:$0xff]  ;;  %v564_v33 = vld [vmem:[%s3300_s9 + $0x868] sm:$0xff]  ;;  %v638_v26 = vld [vmem:[%s3300_s9 + $0xab8] sm:$0xff] }
  0xf4   : > { %2650 = vmatprep.subr.bf16.mxu1 %v2649_v37  ;;  %1351 = vmatprep.mubr.f32.mxu0 %v285_v43  ;;  %v581_v37 = vld [vmem:[%s3300_s9 + $0x8f0] sm:$0xff]  ;;  %v2639_v41 = vpack.c.bf16 %v564_v33, %v563_v32  ;;  %v652_v24 = vld [vmem:[%s3300_s9 + $0xb28] sm:$0xff]  ;;  %v622_v33 = vld [vmem:[%s3300_s9 + $0xa38] sm:$0xff] }
  0xf5   : > { %1421 = vmatprep.mubr.f32.mxu1 %v287_v45  ;;  %v2641_v43 = vpack.c.bf16 %v582_v38, %v581_v37  ;;  %v566_v45 = vld [vmem:[%s3300_s9 + $0x878] sm:$0xff]  ;;  %v621_v32 = vld [vmem:[%s3300_s9 + $0xa30] sm:$0xff]  ;;  %v639_v37 = vld [vmem:[%s3300_s9 + $0xac0] sm:$0xff] }
  0xf6   : > { %2620 = vmatpush3.bf16.msra.mxu0 %v2619_v44  ;;  %v565_v44 = vld [vmem:[%s3300_s9 + $0x870] sm:$0xff]  ;;  %v640_v38 = vld [vmem:[%s3300_s9 + $0xac8] sm:$0xff] }
  0xf7   : > { %2652 = vmatpush3.bf16.msra.mxu1 %v2651_v46  ;;  %2622 = vmatprep.subr.bf16.mxu0 %v2621_v47  ;;  %v597_v46 = vld [vmem:[%s3300_s9 + $0x970] sm:$0xff]  ;;  %v2673_v47 = vpack.c.bf16 %v614_v40, %v613_v39  ;;  %v2643_v53 = vpack.c.bf16 %v566_v45, %v565_v44  ;;  %v671_v39 = vld [vmem:[%s3300_s9 + $0xbc0] sm:$0xff]  ;;  %v672_v40 = vld [vmem:[%s3300_s9 + $0xbc8] sm:$0xff] }
  0xf8   : > { %2654 = vmatprep.subr.bf16.mxu1 %v2653_v51  ;;  %v663_v51 = vld [vmem:[%s3300_s9 + $0xb80] sm:$0xff]  ;;  %v2675_v54 = vpack.c.bf16 %v598_v48, %v597_v46  ;;  %v624_v45 = vld [vmem:[%s3300_s9 + $0xa48] sm:$0xff] }
  0xf9   : > { %v623_v44 = vld [vmem:[%s3300_s9 + $0xa40] sm:$0xff]  ;;  %v656_v48 = vld [vmem:[%s3300_s9 + $0xb48] sm:$0xff] }
  0xfa   : > { %2624 = vmatpush3.bf16.msra.mxu0 %v2623_v57  ;;  %v616_v57 = vld [vmem:[%s3300_s9 + $0xa08] sm:$0xff]  ;;  %v655_v46 = vld [vmem:[%s3300_s9 + $0xb40] sm:$0xff] }
  0xfb   : > { %2656 = vmatpush3.bf16.msra.mxu1 %v2655_v58  ;;  %2626 = vmatprep.subr.bf16.mxu0 %v2625_v59  ;;  %v647_v58 = vld [vmem:[%s3300_s9 + $0xb00] sm:$0xff]  ;;  %v2709_v59 = vpack.c.bf16 %v664_v52, %v663_v51  ;;  %v2679_v2 = vpack.c.bf16 %v616_v57, %v615_v56  ;;  %v673_v51 = vld [vmem:[%s3300_s9 + $0xbd0] sm:$0xff]  ;;  %v674_v52 = vld [vmem:[%s3300_s9 + $0xbd8] sm:$0xff] }
  0xfc   : > { %2658 = vmatprep.subr.bf16.mxu1 %v2657_v63  ;;  %v665_v63 = vld [vmem:[%s3300_s9 + $0xb90] sm:$0xff]  ;;  %v2711_v4 = vpack.c.bf16 %v648_v60, %v647_v58  ;;  %v626_v57 = vld [vmem:[%s3300_s9 + $0xa58] sm:$0xff] }
  0xfd   : > { %v2713_v9 = vpack.c.bf16 %v666_v0, %v665_v63  ;;  %v625_v56 = vld [vmem:[%s3300_s9 + $0xa50] sm:$0xff]  ;;  %v658_v60 = vld [vmem:[%s3300_s9 + $0xb58] sm:$0xff]  ;;  %v675_v63 = vld [vmem:[%s3300_s9 + $0xbe0] sm:$0xff] }
  0xfe   : > { %2628 = vmatpush3.bf16.msra.mxu0 %v2627_v5  ;;  %v2681_v5 = vpack.c.bf16 %v634_v62, %v633_v61  ;;  %v657_v58 = vld [vmem:[%s3300_s9 + $0xb50] sm:$0xff]  ;;  %v643_v61 = vld [vmem:[%s3300_s9 + $0xae0] sm:$0xff]  ;;  %v644_v62 = vld [vmem:[%s3300_s9 + $0xae8] sm:$0xff] }
  0xff   : > { %2660 = vmatpush3.bf16.msra.mxu1 %v2659_v6  ;;  %2630 = vmatprep.subr.bf16.mxu0 %v2629_v7  ;;  %v617_v6 = vld [vmem:[%s3300_s9 + $0xa10] sm:$0xff]  ;;  %v618_v7 = vld [vmem:[%s3300_s9 + $0xa18] sm:$0xff]  ;;  %v676_v0 = vld [vmem:[%s3300_s9 + $0xbe8] sm:$0xff] }
 0x100   : > { %2662 = vmatprep.subr.bf16.mxu1 %v2661_v11  ;;  %v635_v11 = vld [vmem:[%s3300_s9 + $0xaa0] sm:$0xff]  ;;  %v2683_v16 = vpack.c.bf16 %v618_v7, %v617_v6  ;;  %v2733_v7 = vpack.c.bf16 %v676_v0, %v675_v63  ;;  %v718_v63 = vld [vmem:[%s3300_s9 + $0xd38] sm:$0xff] }
 0x101   : > { %v659_v6 = vld [vmem:[%s3300_s9 + $0xb60] sm:$0xff] }
 0x102   : > { %2632 = vmatpush3.bf16.msra.mxu0 %v2631_v17  ;;  %v291_v17 = vld [vmem:[%s3324_s25 + $0xb8] sm:$0xff] }
 0x103   : > { %2664 = vmatpush3.bf16.msra.mxu1 %v2663_v18  ;;  %2634 = vmatprep.subr.bf16.mxu0 %v2633_v19  ;;  %v2715_v18 = vpack.c.bf16 %v650_v10, %v649_v8  ;;  %v2685_v19 = vpack.c.bf16 %v636_v12, %v635_v11  ;;  %v660_v8 = vld [vmem:[%s3300_s9 + $0xb68] sm:$0xff]  ;;  %v646_v10 = vld [vmem:[%s3300_s9 + $0xaf8] sm:$0xff]  ;;  %v677_v11 = vld [vmem:[%s3300_s9 + $0xbf0] sm:$0xff] }
 0x104   : > { %2666 = vmatprep.subr.bf16.mxu1 %v2665_v23  ;;  %v2717_v23 = vpack.c.bf16 %v668_v14, %v667_v13  ;;  %v678_v12 = vld [vmem:[%s3300_s9 + $0xbf8] sm:$0xff]  ;;  %v2735_v14 = vpack.c.bf16 %v660_v8, %v659_v6  ;;  %v720_v8 = vld [vmem:[%s3300_s9 + $0xd48] sm:$0xff] }
 0x105   : > { %v706_v6 = vld [vmem:[%s3300_s9 + $0xcd8] sm:$0xff] }
 0x106   : > { %2636 = vmatpush3.bf16.msra.mxu0 %v2635_v29  ;;  %v2687_v29 = vpack.c.bf16 %v620_v21, %v619_v20  ;;  %v662_v20 = vld [vmem:[%s3300_s9 + $0xb78] sm:$0xff]  ;;  %v695_v21 = vld [vmem:[%s3300_s9 + $0xc80] sm:$0xff] }
 0x107   : > { %2668 = vmatpush3.bf16.msra.mxu1 %v2667_v30  ;;  %2638 = vmatprep.subr.bf16.mxu0 %v2637_v31  ;;  %v2719_v30 = vpack.c.bf16 %v652_v24, %v651_v22  ;;  %v2689_v31 = vpack.c.bf16 %v638_v26, %v637_v25  ;;  %v696_v22 = vld [vmem:[%s3300_s9 + $0xc88] sm:$0xff]  ;;  %v679_v26 = vld [vmem:[%s3300_s9 + $0xc00] sm:$0xff] }
 0x108   : > { %2670 = vmatprep.subr.bf16.mxu1 %v2669_v35  ;;  %v2721_v35 = vpack.c.bf16 %v670_v28, %v669_v27  ;;  %v2741_v25 = vpack.c.bf16 %v696_v22, %v695_v21  ;;  %v680_v27 = vld [vmem:[%s3300_s9 + $0xc08] sm:$0xff]  ;;  %v697_v28 = vld [vmem:[%s3300_s9 + $0xc90] sm:$0xff] }
 0x109   : > { %v692_v21 = vld [vmem:[%s3300_s9 + $0xc68] sm:$0xff] }
 0x10a   : > { %2640 = vmatpush3.bf16.msra.mxu0 %v2639_v41  ;;  %v2691_v41 = vpack.c.bf16 %v622_v33, %v621_v32  ;;  %v288_v32 = vld [vmem:[%s3324_s25 + $0xa0] sm:$0xff]  ;;  %v2743_v33 = vpack.c.bf16 %v680_v27, %v679_v26  ;;  %v724_v26 = vld [vmem:[%s3300_s9 + $0xd68] sm:$0xff] }
 0x10b   : > { %2672 = vmatpush3.bf16.msra.mxu1 %v2671_v42  ;;  %2642 = vmatprep.subr.bf16.mxu0 %v2641_v43  ;;  %v2723_v42 = vpack.c.bf16 %v654_v36, %v653_v34  ;;  %v2693_v43 = vpack.c.bf16 %v640_v38, %v639_v37  ;;  %v290_v34 = vld [vmem:[%s3324_s25 + $0xb0] sm:$0xff]  ;;  %v682_v37 = vld [vmem:[%s3300_s9 + $0xc18] sm:$0xff] }
 0x10c   : > { %2674 = vmatprep.subr.bf16.mxu1 %v2673_v47  ;;  %v2725_v47 = vpack.c.bf16 %v672_v40, %v671_v39  ;;  %v681_v36 = vld [vmem:[%s3300_s9 + $0xc10] sm:$0xff]  ;;  %v699_v39 = vld [vmem:[%s3300_s9 + $0xca0] sm:$0xff]  ;;  %v3068_v40 = vmov 0.0|0.0  }
 0x10e   : > { %2644 = vmatpush3.bf16.msra.mxu0 %v2643_v53  ;;  %v2695_v53 = vpack.c.bf16 %v624_v45, %v623_v44  ;;  %v293_v44 = vld [vmem:[%s3324_s25 + $0xc8] sm:$0xff]  ;;  %v2747_v45 = vpack.c.bf16 %v682_v37, %v681_v36  ;;  %v292_v36 = vld [vmem:[%s3324_s25 + $0xc0] sm:$0xff]  ;;  %v294_v37 = vld [vmem:[%s3324_s25 + $0xd0] sm:$0xff] }
 0x10f   : > { %2676 = vmatpush3.bf16.msra.mxu1 %v2675_v54  ;;  %2678 = vmatprep.subr.bf16.mxu0 %v2677_v55  ;;  %v2727_v54 = vpack.c.bf16 %v656_v48, %v655_v46  ;;  %v2697_v55 = vpack.c.bf16 %v642_v50, %v641_v49  ;;  %v684_v48 = vld [vmem:[%s3300_s9 + $0xc28] sm:$0xff]  ;;  %v701_v50 = vld [vmem:[%s3300_s9 + $0xcb0] sm:$0xff] }
 0x110   : > { %2710 = vmatprep.subr.bf16.mxu1 %v2709_v59  ;;  %v2729_v59 = vpack.c.bf16 %v674_v52, %v673_v51  ;;  %v702_v51 = vld [vmem:[%s3300_s9 + $0xcb8] sm:$0xff]  ;;  %v715_v52 = vld [vmem:[%s3300_s9 + $0xd20] sm:$0xff] }
 0x111   : > { %1352 = vmatmul.mubr.f32.vlgmr.msra.gmra.mrb[8].mxu0 %v284_v1  ;;  %v2699_v1 = vpack.c.bf16 %v626_v57, %v625_v56  ;;  %v2753_v56 = vpack.c.bf16 %v702_v51, %v701_v50  ;;  %v685_v57 = vld [vmem:[%s3300_s9 + $0xc30] sm:$0xff] }
 0x112   : > { %2680 = vmatpush3.bf16.msra.mxu0 %v2679_v2  ;;  %1422 = vmatmul.mubr.f32.vlgmr.msra.gmra.mrb[8].mxu1 %v286_v3  ;;  %v2731_v2 = vpack.c.bf16 %v658_v60, %v657_v58  ;;  %v2701_v3 = vpack.c.bf16 %v644_v62, %v643_v61  ;;  %v686_v58 = vld [vmem:[%s3300_s9 + $0xc38] sm:$0xff]  ;;  %v703_v60 = vld [vmem:[%s3300_s9 + $0xcc0] sm:$0xff]  ;;  %v704_v61 = vld [vmem:[%s3300_s9 + $0xcc8] sm:$0xff] }
 0x113   : > { %2712 = vmatpush3.bf16.msra.mxu1 %v2711_v4  ;;  %2682 = vmatprep.subr.bf16.mxu0 %v2681_v5  ;;  %v627_v4 = vld [vmem:[%s3300_s9 + $0xa60] sm:$0xff]  ;;  %v628_v5 = vld [vmem:[%s3300_s9 + $0xa68] sm:$0xff]  ;;  %v717_v62 = vld [vmem:[%s3300_s9 + $0xd30] sm:$0xff]  ;;  %v2755_v0 = vpack.c.bf16 %v686_v58, %v685_v57 }
 0x114   : > { %2714 = vmatprep.subr.bf16.mxu1 %v2713_v9  ;;  %1491 = vmatprep.mubr.f32.mxu0 %v289_v15  ;;  %v645_v9 = vld [vmem:[%s3300_s9 + $0xaf0] sm:$0xff]  ;;  %v2703_v13 = vpack.c.bf16 %v628_v5, %v627_v4  ;;  %v2783_v4 = vpack.c.bf16 %v718_v63, %v717_v62 }
 0x115   : > { %1561 = vmatprep.mubr.f32.mxu1 %v291_v17  ;;  %v2705_v15 = vpack.c.bf16 %v646_v10, %v645_v9  ;;  %v630_v17 = vld [vmem:[%s3300_s9 + $0xa78] sm:$0xff]  ;;  %v705_v5 = vld [vmem:[%s3300_s9 + $0xcd0] sm:$0xff] }
 0x116   : > { %2684 = vmatpush3.bf16.msra.mxu0 %v2683_v16  ;;  %v629_v16 = vld [vmem:[%s3300_s9 + $0xa70] sm:$0xff]  ;;  %v2761_v10 = vpack.c.bf16 %v706_v6, %v705_v5 }
 0x117   : > { %2716 = vmatpush3.bf16.msra.mxu1 %v2715_v18  ;;  %2686 = vmatprep.subr.bf16.mxu0 %v2685_v19  ;;  %v661_v18 = vld [vmem:[%s3300_s9 + $0xb70] sm:$0xff]  ;;  %v2737_v19 = vpack.c.bf16 %v678_v12, %v677_v11  ;;  %v690_v12 = vld [vmem:[%s3300_s9 + $0xc58] sm:$0xff] }
 0x118   : > { %2718 = vmatprep.subr.bf16.mxu1 %v2717_v23  ;;  %v2707_v23 = vpack.c.bf16 %v630_v17, %v629_v16  ;;  %v2739_v24 = vpack.c.bf16 %v662_v20, %v661_v18  ;;  %v689_v11 = vld [vmem:[%s3300_s9 + $0xc50] sm:$0xff]  ;;  %v722_v17 = vld [vmem:[%s3300_s9 + $0xd58] sm:$0xff]  ;;  %v691_v20 = vld [vmem:[%s3300_s9 + $0xc60] sm:$0xff] }
 0x119   : > { %v721_v16 = vld [vmem:[%s3300_s9 + $0xd50] sm:$0xff]  ;;  %v2763_v18 = vpack.c.bf16 %v690_v12, %v689_v11  ;;  %v2767_v27 = vpack.c.bf16 %v692_v21, %v691_v20 }
 0x11a   : > { %2688 = vmatpush3.bf16.msra.mxu0 %v2687_v29  ;;  %v698_v29 = vld [vmem:[%s3300_s9 + $0xc98] sm:$0xff]  ;;  %v2789_v22 = vpack.c.bf16 %v722_v17, %v721_v16 }
 0x11b   : > { %2720 = vmatpush3.bf16.msra.mxu1 %v2719_v30  ;;  %2690 = vmatprep.subr.bf16.mxu0 %v2689_v31  ;;  %v711_v30 = vld [vmem:[%s3300_s9 + $0xd00] sm:$0xff]  ;;  %v712_v31 = vld [vmem:[%s3300_s9 + $0xd08] sm:$0xff] }
 0x11c   : > { %2722 = vmatprep.subr.bf16.mxu1 %v2721_v35  ;;  %v2745_v35 = vpack.c.bf16 %v698_v29, %v697_v28  ;;  %v2774_v38 = vpack.c.bf16 %v712_v31, %v711_v30  ;;  %v693_v29 = vld [vmem:[%s3300_s9 + $0xc70] sm:$0xff]  ;;  %v694_v30 = vld [vmem:[%s3300_s9 + $0xc78] sm:$0xff] }
 0x11e   : > { %2692 = vmatpush3.bf16.msra.mxu0 %v2691_v41  ;;  %v700_v41 = vld [vmem:[%s3300_s9 + $0xca8] sm:$0xff] }
 0x11f   : > { %2724 = vmatpush3.bf16.msra.mxu1 %v2723_v42  ;;  %2694 = vmatprep.subr.bf16.mxu0 %v2693_v43  ;;  %v713_v42 = vld [vmem:[%s3300_s9 + $0xd10] sm:$0xff]  ;;  %v714_v43 = vld [vmem:[%s3300_s9 + $0xd18] sm:$0xff]  ;;  %v2749_v46 = vpack.c.bf16 %v700_v41, %v699_v39 }
 0x120   : > { %2726 = vmatprep.subr.bf16.mxu1 %v2725_v47  ;;  %v683_v47 = vld [vmem:[%s3300_s9 + $0xc20] sm:$0xff]  ;;  %v2777_v49 = vpack.c.bf16 %v714_v43, %v713_v42 }
 0x122   : > { %2696 = vmatpush3.bf16.msra.mxu0 %v2695_v53  ;;  %v716_v53 = vld [vmem:[%s3300_s9 + $0xd28] sm:$0xff] }
 0x123   : > { %2728 = vmatpush3.bf16.msra.mxu1 %v2727_v54  ;;  %2698 = vmatprep.subr.bf16.mxu0 %v2697_v55  ;;  %v3070_v54 = vmov 0.0   ;;  %v2751_v55 = vpack.c.bf16 %v684_v48, %v683_v47 }
 0x124   : > { %2730 = vmatprep.subr.bf16.mxu1 %v2729_v59  ;;  %v2780_v59 = vpack.c.bf16 %v716_v53, %v715_v52 }
 0x126   : > { %2700 = vmatpush3.bf16.msra.mxu0 %v2699_v1  ;;  %v2757_v1 = vpack.c.bf16 %v704_v61, %v703_v60 }
 0x127   : > { %2732 = vmatpush3.bf16.msra.mxu1 %v2731_v2  ;;  %2702 = vmatprep.subr.bf16.mxu0 %v2701_v3  ;;  %v687_v2 = vld [vmem:[%s3300_s9 + $0xc40] sm:$0xff]  ;;  %v688_v3 = vld [vmem:[%s3300_s9 + $0xc48] sm:$0xff] }
 0x128   : > { %2734 = vmatprep.subr.bf16.mxu1 %v2733_v7  ;;  %v719_v7 = vld [vmem:[%s3300_s9 + $0xd40] sm:$0xff]  ;;  %v2759_v9 = vpack.c.bf16 %v688_v3, %v687_v2 }
 0x12a   : > { %2704 = vmatpush3.bf16.msra.mxu0 %v2703_v13  ;;  %v2786_v13 = vpack.c.bf16 %v720_v8, %v719_v7 }
 0x12b   : > { %2736 = vmatpush3.bf16.msra.mxu1 %v2735_v14  ;;  %2706 = vmatprep.subr.bf16.mxu0 %v2705_v15  ;;  %v707_v14 = vld [vmem:[%s3300_s9 + $0xce0] sm:$0xff]  ;;  %v708_v15 = vld [vmem:[%s3300_s9 + $0xce8] sm:$0xff] }
 0x12c   : > { %2738 = vmatprep.subr.bf16.mxu1 %v2737_v19  ;;  %v2765_v19 = vpack.c.bf16 %v708_v15, %v707_v14 }
 0x12e   : > { %2708 = vmatpush3.bf16.msra.mxu0 %v2707_v23  ;;  %v709_v23 = vld [vmem:[%s3300_s9 + $0xcf0] sm:$0xff] }
 0x12f   : > { %2740 = vmatpush3.bf16.msra.mxu1 %v2739_v24  ;;  %2742 = vmatprep.subr.bf16.mxu0 %v2741_v25  ;;  %v710_v24 = vld [vmem:[%s3300_s9 + $0xcf8] sm:$0xff]  ;;  %v723_v25 = vld [vmem:[%s3300_s9 + $0xd60] sm:$0xff] }
 0x130   : > { %2773 = vmatprep.subr.bf16.mxu1 %v3068_v40  ;;  %v2769_v28 = vpack.c.bf16 %v710_v24, %v709_v23  ;;  %v2792_v31 = vpack.c.bf16 %v724_v26, %v723_v25 }
 0x131   : > { %1492 = vmatmul.mubr.f32.vlgmr.msra.gmra.mrb[10].mxu0 %v288_v32  ;;  %v725_v32 = vld [vmem:[%s3300_s9 + $0xd70] sm:$0xff] }
 0x132   : > { %2744 = vmatpush3.bf16.msra.mxu0 %v2743_v33  ;;  %1562 = vmatmul.mubr.f32.vlgmr.msra.gmra.mrb[10].mxu1 %v290_v34  ;;  %v726_v33 = vld [vmem:[%s3300_s9 + $0xd78] sm:$0xff]  ;;  %v2771_v34 = vpack.c.bf16 %v694_v30, %v693_v29 }
 0x133   : > { %2746 = vmatprep.subr.bf16.mxu0 %v2745_v35  ;;  %2775 = vmatpush3.bf16.msra.mxu1 %v2774_v38  ;;  %v2795_v35 = vpack.c.bf16 %v726_v33, %v725_v32 }
 0x134   : > { %2776 = vmatprep.subr.bf16.mxu1 %v3068_v40  ;;  %1631 = vmatprep.mubr.f32.mxu0 %v293_v44 }
 0x135   : > { %2354 = vmatprep.mubr.msk.f32.mxu1 %vm3069_vm0, %v3070_v54 }
 0x136   : > { %2748 = vmatpush3.bf16.msra.mxu0 %v2747_v45 }
 0x137   : > { %2750 = vmatprep.subr.bf16.mxu0 %v2749_v46  ;;  %2778 = vmatpush3.bf16.msra.mxu1 %v2777_v49 }
 0x138   : > { %2779 = vmatprep.subr.bf16.mxu1 %v3068_v40 }
 0x13a   : > { %2752 = vmatpush3.bf16.msra.mxu0 %v2751_v55 }
 0x13b   : > { %2754 = vmatprep.subr.bf16.mxu0 %v2753_v56  ;;  %2781 = vmatpush3.bf16.msra.mxu1 %v2780_v59 }
 0x13c   : > { %2782 = vmatprep.subr.bf16.mxu1 %v3068_v40 }
 0x13e   : > { %2756 = vmatpush3.bf16.msra.mxu0 %v2755_v0 }
 0x13f   : > { %2758 = vmatprep.subr.bf16.mxu0 %v2757_v1  ;;  %2784 = vmatpush3.bf16.msra.mxu1 %v2783_v4 }
 0x140   : > { %2785 = vmatprep.subr.bf16.mxu1 %v3068_v40 }
 0x142   : > { %2760 = vmatpush3.bf16.msra.mxu0 %v2759_v9 }
 0x143   : > { %2762 = vmatprep.subr.bf16.mxu0 %v2761_v10  ;;  %2787 = vmatpush3.bf16.msra.mxu1 %v2786_v13 }
 0x144   : > { %2788 = vmatprep.subr.bf16.mxu1 %v3068_v40 }
 0x146   : > { %2764 = vmatpush3.bf16.msra.mxu0 %v2763_v18 }
 0x147   : > { %2766 = vmatprep.subr.bf16.mxu0 %v2765_v19  ;;  %2790 = vmatpush3.bf16.msra.mxu1 %v2789_v22 }
 0x148   : > { %2791 = vmatprep.subr.bf16.mxu1 %v3068_v40 }
 0x14a   : > { %2768 = vmatpush3.bf16.msra.mxu0 %v2767_v27  ;;  %v267_v27 = vld [vmem:[%s3319_s29] sm:$0xff] }
 0x14b   : > { %2770 = vmatprep.subr.bf16.mxu0 %v2769_v28  ;;  %2793 = vmatpush3.bf16.msra.mxu1 %v2792_v31  ;;  %v1846_v31 = vld [vmem:[%s3307_s27] ss:$0 sm:$0xff] (!%p1845_p1) }
 0x14c   : > { %2794 = vmatprep.subr.bf16.mxu1 %v3068_v40 }
 0x14e   : > { %2772 = vmatpush3.bf16.msra.mxu0 %v2771_v34 }
 0x14f   : > { %2796 = vmatpush3.bf16.msra.mxu1 %v2795_v35 }
 0x151   : > { %1632 = vmatmul.mubr.f32.vlgmr.msra.gmra.mrb[12].mxu0 %v292_v36 }
 0x152   : > { %2355 = vmatmul.mubr.f32.vlgmr.msra.gmra.mrb[12].mxu1 %v294_v37 }
 0x164   : > { %v1882_v38 = vpop.f32.mrb[0].mxu0 }
 0x165   : > { %v1917_v39 = vpop.f32.mrb[0].mxu1  ;;  %v1883_v41 = vpop.f32.mrb[1].mxu0 }
 0x166   : > { %v1884_v42 = vadd.f32 %v1883_v41, %v1882_v38  ;;  %v1918_v43 = vpop.f32.mrb[1].mxu1 }
 0x167   : > { %v1919_v44 = vadd.f32 %v1918_v43, %v1917_v39 }
 0x169   : > { %v864_v45 = vadd.f32 %v1919_v44, %v1884_v42 }
 0x184   : > { %v1952_v46 = vpop.f32.mrb[2].mxu0 }
 0x185   : > { %v1953_v47 = vpop.f32.mrb[3].mxu0  ;;  %v1987_v48 = vpop.f32.mrb[2].mxu1 }
 0x186   : > { %v1954_v49 = vadd.f32 %v1953_v47, %v1952_v46  ;;  %v1988_v50 = vpop.f32.mrb[3].mxu1 }
 0x187   : > { %v1989_v51 = vadd.f32 %v1988_v50, %v1987_v48 }
 0x188   : > { %v934_v40 = vadd.f32 %v1954_v49, %v864_v45 }
 0x18a   : > { %v1004_v52 = vadd.f32 %v1989_v51, %v934_v40 }
 0x1a4   : > { %v2022_v53 = vpop.f32.mrb[4].mxu0 }
 0x1a5   : > { %v2023_v54 = vpop.f32.mrb[5].mxu0  ;;  %v2057_v55 = vpop.f32.mrb[4].mxu1 }
 0x1a6   : > { %v2024_v56 = vadd.f32 %v2023_v54, %v2022_v53  ;;  %v2058_v57 = vpop.f32.mrb[5].mxu1 }
 0x1a7   : > { %v2059_v58 = vadd.f32 %v2058_v57, %v2057_v55 }
 0x1a8   : > { %v1074_v59 = vadd.f32 %v2024_v56, %v1004_v52 }
 0x1aa   : > { %v1144_v60 = vadd.f32 %v2059_v58, %v1074_v59 }
 0x1c4   : > { %v2092_v61 = vpop.f32.mrb[6].mxu0 }
 0x1c5   : > { %v2093_v62 = vpop.f32.mrb[7].mxu0  ;;  %v2127_v63 = vpop.f32.mrb[6].mxu1 }
 0x1c6   : > { %v2094_v0 = vadd.f32 %v2093_v62, %v2092_v61  ;;  %v2128_v1 = vpop.f32.mrb[7].mxu1 }
 0x1c7   : > { %v2129_v2 = vadd.f32 %v2128_v1, %v2127_v63 }
 0x1c8   : > { %v1214_v3 = vadd.f32 %v2094_v0, %v1144_v60 }
 0x1ca   : > { %v1284_v4 = vadd.f32 %v2129_v2, %v1214_v3 }
 0x1e4   : > { %v2162_v5 = vpop.f32.mrb[8].mxu0 }
 0x1e5   : > { %v2163_v6 = vpop.f32.mrb[9].mxu0  ;;  %v2197_v7 = vpop.f32.mrb[8].mxu1 }
 0x1e6   : > { %v2164_v8 = vadd.f32 %v2163_v6, %v2162_v5  ;;  %v2198_v9 = vpop.f32.mrb[9].mxu1 }
 0x1e7   : > { %v2199_v10 = vadd.f32 %v2198_v9, %v2197_v7 }
 0x1e8   : > { %v1354_v11 = vadd.f32 %v2164_v8, %v1284_v4 }
 0x1ea   : > { %v1424_v12 = vadd.f32 %v2199_v10, %v1354_v11 }
 0x204   : > { %v2232_v13 = vpop.f32.mrb[10].mxu0 }
 0x205   : > { %v2233_v14 = vpop.f32.mrb[11].mxu0  ;;  %v2267_v15 = vpop.f32.mrb[10].mxu1 }
 0x206   : > { %v2234_v16 = vadd.f32 %v2233_v14, %v2232_v13  ;;  %v2268_v17 = vpop.f32.mrb[11].mxu1 }
 0x207   : > { %v2269_v18 = vadd.f32 %v2268_v17, %v2267_v15 }
 0x208   : > { %v1494_v19 = vadd.f32 %v2234_v16, %v1424_v12 }
 0x20a   : > { %v1564_v20 = vadd.f32 %v2269_v18, %v1494_v19 }
 0x224   : > { %v2302_v21 = vpop.f32.mrb[12].mxu0 }
 0x225   : > { %v2303_v22 = vpop.f32.mrb[13].mxu0  ;;  %v1703_v23 = vpop.f32.mrb[12].mxu1 }
 0x226   : > { %v2304_v24 = vadd.f32 %v2303_v22, %v2302_v21  ;;  %v2356_v25 = vpop.f32.mrb[13].mxu1 }
 0x228   : > { %v1634_v26 = vadd.f32 %v2304_v24, %v1564_v20  ;;  %1712 = sbr.rel (%p1845_p1) target bundleno = 571 (0x23b), region = 48 }
 0x22a   : > { %v1704_v28 = vadd.f32 %v1703_v23, %v1634_v26 }
 0x22c   : > { %v1707_v29 = vadd.f32 %v1704_v28, %v267_v27 }
 0x22e   : > { %1708 = vst [vmem:[%s3319_s29] sm:$0xff] %v1707_v29 }
 0x235   : > { %v1713_v30 = vld [vmem:[%s3319_s29] sm:$0xff] }
 0x236   : > { %v1721_v32 = vadd.f32 %v1846_v31, %v1713_v30 }
 0x238   : > { %v1722_v33 = vmax.f32 %v1721_v32, 0.0 }
 0x23a   : > { %1723 = vst [vmem:[%s3319_s29] sm:$0xff] %v1722_v33 }
 0x23b PF: > { %s19_s22 = sadd.s32 1, %s3060_s22   ;;  %s3858_s19 = smov %s3249_s12 }
 0x23c   : > { %p16_p11 = scmp.ge.s32.totalorder %s19_s22, 32   ;;  %s3859_s10 = sld [smem:[#allocation8_spill]] }
 0x23d   : > { %s3860_s12 = smov %s3024_s13  ;;  %s3861_s13 = smov %s3028_s14 }
 0x23e   : > { %s3862_s14 = smov %s3858_s19  ;;  %s3863_s15 = smov %s3036_s16 }
 0x23f   : > { %s3864_s16 = smov %s3040_s17  ;;  %s3865_s17 = smov %s3254_s28 }
 0x240   : > { %s3866_s18 = smov %s3052_s20  ;;  %s3867_s19 = smov %s3056_s21 }
 0x241   : > { %s3868_s20 = smov %s3871_s23  ;;  %18 = sbr.rel (!%p16_p11) target bundleno = 11 (0xb), region = 96 }
 0x242   : > { %s3869_s21 = smov %s3859_s10 }
 0x248   :  { %1743 = vsyncpa [#allocation3], 1 }
 0x249   :  { %1745 = vsyncpa [#allocation3 + $0x1], 1 }
 0x24a   :  { %1746 = vsyncpa [#allocation5], 1 }
 0x24b   :  { %1748 = vsyncpa [#allocation5 + $0x1], 1 }

// kernel: self_supervised_forward.5
= control target key start
LH: loop header
LB: loop body
LE: loop exit
PB: predicated region body
PF: predicated region fallthrough
CT: control target
= control target key end

     0   :  { %8 = vsyncpa [#allocation3], 0  ;;  %s4514_s0 = inlined_call_operand.vmem [shape: f32[8,256], index: 0, kind: input, shape index: {}]   ;;  %s4515_s1 = inlined_call_operand.hbm [shape: f32[256,51840], index: 1, kind: input, shape index: {}]   ;;  %s4516_s2 = inlined_call_operand.vmem [shape: f32[1,51840], index: 2, kind: input, shape index: {}]   ;;  %s4517_s3 = inlined_call_operand.vmem [shape: f32[8,51840], index: 3, kind: output, shape index: {}]  }
   0x1   :  { %10 = vsyncpa [#allocation3 + $0x1], 0  ;;  %s3364_s12 = smov 0   ;;  %s3366_s13 = smov 0  }
   0x2   :  { %s3368_s14 = smov 0   ;;  %s3370_s15 = smov 0  }
   0x3 LB: > { %s2317_s16 = sadd.s32 4294967295, %s3338_s15   ;;  %s3384_s17 = sadd.s32 1, %s3338_s15   ;;  %s3338_s15 = sphi %s3370_s15, %s4523_s15   ;;  %s3334_s14 = sphi %s3368_s14, %s4522_s14   ;;  %s3330_s13 = sphi %s3366_s13, %s4521_s13   ;;  %s3326_s12 = sphi %s3364_s12, %s4520_s12  }
   0x4   : > { %s41_s18 = ssub.s32 %s3338_s15, %s3384_s17  ;;  %s44_s19 = sadd.s32 1, %s3334_s14 }
   0x5   : > { %p42_p0 = scmp.eq.s32.totalorder %s41_s18, 0  ;;  %p51_p1 = scmp.ne.s32.totalorder %s3334_s14, %s3330_s13 }
   0x6   : > { %p52_p2 = scmp.eq.s32.totalorder %s3338_s15, 0  ;;  %p57_p3 = scmp.ne.s32.totalorder %s3330_s13, %s3326_s12 }
   0x7   : > { %s3394_s20 = scalar_select %p42_p0, %s3334_s14, %s44_s19  }
   0x8   : > { %p53_p4 = por %p52_p2, %p51_p1  ;;  %p58_p5 = scmp.eq.s32.totalorder %s2317_s16, 0 }
   0x9   : > { %p3234_p6 = scmp.lt.s32.totalorder %s3338_s15, 15  ;;  %s136_s22 = sand.u32 1, %s3334_s14  }
   0xa   : > { %p3399_p7 = por %p58_p5, %p57_p3  ;;  %s3226_s23 = smul.u32 6912, %s136_s22 }
   0xb   : > { %s2326_s24 = smul.u32 3456, %s3338_s15  ;;  %p3405_p8 = pnand %p3234_p6, %p53_p4 }
   0xc   : > { %s140_s29 = scalar_lea.vmem [#allocation2], %s3226_s23  ;;  %s3416_s4 = scalar_lea.sflag [#allocation3], %s136_s22 }
   0xd   : > { %s3412_s28 = scalar_lea.hbm %s4515_s1, %s2326_s24  ;;  %s147_s30 = sshll.u32 %s140_s29, 4  ;;  %s3414_s30 = int_to_ptr.vmem [resolvable:$true] %s147_s30 }
   0xe   : > { %s3274_s5 = scalar_lea.hbm %s3412_s28, 110592  ;;  %p3276_p10 = pneg %p3405_p8 }
   0xf   : > { %p3275_p9 = scmp.ne.s32.totalorder %s3412_s28, %s3274_s5  ;;  %s3279_s8 = scalar_lea.hbm %s4515_s1, 1658880 }
  0x10   : > { %p3280_p13 = scmp.lt.u32.totalorder %s3412_s28, %s4515_s1  ;;  %p3281_p0 = scmp.lt.u32.totalorder %s3279_s8, %s3274_s5 }
  0x11   : > { %p3277_p11 = pnand %p3276_p10, %p3275_p9  ;;  %p3283_p2 = scmp.lt.u32.totalorder %s3274_s5, %s3412_s28 }
  0x12   : > { %p3282_p1 = por %p3281_p0, %p3280_p13 }
  0x13   : > { %p3278_p12 = pneg %p3277_p11 }
  0x14   : > { %p3284_p3 = por %p3283_p2, %p3282_p1 }
  0x16   : > { %p3285_p4 = pnand %p3284_p3, %p3278_p12 }
  0x18   : > { %3288 = shalt.err (!%p3285_p4)
}
  0x19   : > { %s3289_s11 = scalar_lea.vmem %s3414_s30, 110592  ;;  %s3340_s12 = smov [#allocation2]  }
  0x1a   : > { %p3290_p5 = scmp.ne.s32.totalorder %s3414_s30, %s3289_s11  ;;  %s3294_s18 = sshll.u32 %s3340_s12, 4  ;;  %s3295_s18 = int_to_ptr.vmem [resolvable:$false] %s3294_s18 }
  0x1b   : > { %s3296_s19 = scalar_lea.vmem %s3295_s18, 221184  ;;  %p3297_p11 = scmp.lt.s32.totalorder %s3414_s30, %s3295_s18 }
  0x1c   : > { %p3292_p6 = pnand %p3290_p5, %p3276_p10  ;;  %p3298_p13 = scmp.lt.s32.totalorder %s3296_s19, %s3289_s11 }
  0x1e   : > { %p3293_p9 = pneg %p3292_p6  ;;  %p3299_p0 = por %p3298_p13, %p3297_p11 }
  0x20   : > { %p3300_p1 = pnand %p3299_p0, %p3293_p9 }
  0x22   : > { %3303 = shalt.err (!%p3300_p1)
}
  0x23   : > { %s3341_s22 = smov 51840   ;;  %s3342_s23 = smov 3456  }
  0x24   : > { %s3343_s24 = smov 216   ;;  %p2322_p10 = scmp.ge.s32.totalorder %s3338_s15, 1 }
  0x25   : > { %3233 = dma.hbm_to_vmem [thread:$0]  (!%p3405_p8), %s3412_s28, 110592, %s3414_s30, %s3416_s4, %s3341_s22, %s3342_s23, %s3343_s24  }
  0x26   : > { %p163_p12 = scmp.lt.s32.totalorder %s3338_s15, 16 }
  0x28   : > { %p164_p2 = pnand %p2322_p10, %p163_p12 }
  0x29   : > { %s169_s26 = sand.u32 (!%p164_p2), 1, %s3330_s13  }
  0x2a   : > { %167 = sbr.rel (%p164_p2) target bundleno = 717 (0x2cd), region = 32  ;;  %s170_s29 = scalar_lea.sflag (!%p164_p2), [#allocation3], %s169_s26 }
  0x2b   : > { %s3227_s27 = smul.u32 (!%p164_p2), 6912, %s169_s26 }
  0x2d   : > { %s3447_s5 = scalar_lea.vmem (!%p164_p2), [#allocation2], %s3227_s27 }
  0x31   : > { %3321 = dma.done.wait (%p3399_p7), %s170_s29, 110592  }
  0x32   : > { %3323 = vsyncadd (%p3399_p7), %s170_s29, 4294856704  ;;  %v215_v0 = vld [vmem:[%s3447_s5 + $0x8] sm:$0xff]  ;;  %v242_v1 = vld [vmem:[%s3447_s5 + $0xe0] sm:$0xff]  ;;  %s4002_s9 = smul.u32 27, %s2317_s16 }
  0x33   : > { %v214_v2 = vld [vmem:[%s3447_s5] sm:$0xff]  ;;  %v2362_v3 = vpack.c.bf16 %v242_v1, %v215_v0  ;;  %v241_v4 = vld [vmem:[%s3447_s5 + $0xd8] sm:$0xff]  ;;  %v296_v6 = vld [vmem:[%s3447_s5 + $0x290] sm:$0xff] }
  0x34   : > { %v269_v5 = vld [vmem:[%s3447_s5 + $0x1b8] sm:$0xff]  ;;  %v2364_v7 = vpack.c.bf16 %v241_v4, %v214_v2  ;;  %v268_v9 = vld [vmem:[%s3447_s5 + $0x1b0] sm:$0xff]  ;;  %v295_v10 = vld [vmem:[%s3447_s5 + $0x288] sm:$0xff]  ;;  %p202_p7 = scmp.lt.s32.totalorder %s4002_s9, 404 }
  0x35   : > { %v2366_v8 = vpack.c.bf16 %v296_v6, %v269_v5  ;;  %v323_v11 = vld [vmem:[%s3447_s5 + $0x368] sm:$0xff]  ;;  %2363 = vmatprep.subr.bf16.mxu0 %v2362_v3  ;;  %v350_v12 = vld [vmem:[%s3447_s5 + $0x440] sm:$0xff]  ;;  %v2368_v13 = vpack.c.bf16 %v295_v10, %v268_v9  ;;  %v349_v16 = vld [vmem:[%s3447_s5 + $0x438] sm:$0xff] }
  0x36   : > { %2365 = vmatpush1.bf16.msra.mxu0 %v2364_v7  ;;  %v2370_v14 = vpack.c.bf16 %v350_v12, %v323_v11  ;;  %v322_v15 = vld [vmem:[%s3447_s5 + $0x360] sm:$0xff]  ;;  %v377_v17 = vld [vmem:[%s3447_s5 + $0x518] sm:$0xff]  ;;  %v404_v18 = vld [vmem:[%s3447_s5 + $0x5f0] sm:$0xff]  ;;  %s4525_s9 = smov (!%p202_p7, %s4002_s9), 404 }
  0x37   : > { %2367 = vmatprep.subr.bf16.mxu0 %v2366_v8  ;;  %v2372_v19 = vpack.c.bf16 %v349_v16, %v322_v15  ;;  %v2374_v20 = vpack.c.bf16 %v404_v18, %v377_v17  ;;  %v376_v21 = vld [vmem:[%s3447_s5 + $0x510] sm:$0xff]  ;;  %v403_v22 = vld [vmem:[%s3447_s5 + $0x5e8] sm:$0xff]  ;;  %v458_v24 = vld [vmem:[%s3447_s5 + $0x7a0] sm:$0xff]  ;;  %s4042_s10 = scalar_lea.vmem %s4516_s2, %s4525_s9  ;;  %s2323_s11 = sshll.u32 %s4525_s9, 3 }
  0x38   : > { %v431_v23 = vld [vmem:[%s3447_s5 + $0x6c8] sm:$0xff]  ;;  %v217_v25 = vld [vmem:[%s3447_s5 + $0x18] sm:$0xff]  ;;  %v244_v26 = vld [vmem:[%s3447_s5 + $0xf0] sm:$0xff]  ;;  %v2376_v29 = vpack.c.bf16 %v403_v22, %v376_v21  ;;  %s4084_s19 = scalar_lea.vmem %s4517_s3, %s2323_s11 }
  0x39   : > { %v216_v27 = vld [vmem:[%s3447_s5 + $0x10] sm:$0xff]  ;;  %v243_v28 = vld [vmem:[%s3447_s5 + $0xe8] sm:$0xff]  ;;  %v430_v30 = vld [vmem:[%s3447_s5 + $0x6c0] sm:$0xff]  ;;  %v2426_v32 = vpack.c.bf16 %v244_v26, %v217_v25  ;;  %v2378_v34 = vpack.c.bf16 %v458_v24, %v431_v23 }
  0x3a   : > { %2369 = vmatpush1.bf16.msra.mxu0 %v2368_v13  ;;  %v457_v31 = vld [vmem:[%s3447_s5 + $0x798] sm:$0xff]  ;;  %v2428_v33 = vpack.c.bf16 %v243_v28, %v216_v27  ;;  %v271_v36 = vld [vmem:[%s3447_s5 + $0x1c8] sm:$0xff]  ;;  %v298_v37 = vld [vmem:[%s3447_s5 + $0x2a0] sm:$0xff] }
  0x3b   : > { %2371 = vmatprep.subr.bf16.mxu0 %v2370_v14  ;;  %v485_v35 = vld [vmem:[%s3447_s5 + $0x878] sm:$0xff]  ;;  %v512_v38 = vld [vmem:[%s3447_s5 + $0x950] sm:$0xff]  ;;  %2427 = vmatprep.subr.bf16.mxu1 %v2426_v32  ;;  %v2430_v39 = vpack.c.bf16 %v298_v37, %v271_v36  ;;  %v270_v40 = vld [vmem:[%s3447_s5 + $0x1c0] sm:$0xff]  ;;  %v2380_v43 = vpack.c.bf16 %v457_v31, %v430_v30 }
  0x3c   : > { %v297_v41 = vld [vmem:[%s3447_s5 + $0x298] sm:$0xff]  ;;  %2429 = vmatpush1.bf16.msra.mxu1 %v2428_v33  ;;  %v352_v45 = vld [vmem:[%s3447_s5 + $0x450] sm:$0xff]  ;;  %v2382_v47 = vpack.c.bf16 %v512_v38, %v485_v35  ;;  %v511_v49 = vld [vmem:[%s3447_s5 + $0x948] sm:$0xff] }
  0x3d   : > { %v2432_v42 = vpack.c.bf16 %v297_v41, %v270_v40  ;;  %2431 = vmatprep.subr.bf16.mxu1 %v2430_v39  ;;  %v325_v44 = vld [vmem:[%s3447_s5 + $0x378] sm:$0xff]  ;;  %v324_v46 = vld [vmem:[%s3447_s5 + $0x370] sm:$0xff]  ;;  %v351_v51 = vld [vmem:[%s3447_s5 + $0x448] sm:$0xff] }
  0x3e   : > { %2373 = vmatpush1.bf16.msra.mxu0 %v2372_v19  ;;  %v484_v48 = vld [vmem:[%s3447_s5 + $0x870] sm:$0xff]  ;;  %v2434_v50 = vpack.c.bf16 %v352_v45, %v325_v44  ;;  %v539_v52 = vld [vmem:[%s3447_s5 + $0xa28] sm:$0xff]  ;;  %v566_v53 = vld [vmem:[%s3447_s5 + $0xb00] sm:$0xff]  ;;  %v2436_v55 = vpack.c.bf16 %v351_v51, %v324_v46 }
  0x3f   : > { %2375 = vmatprep.subr.bf16.mxu0 %v2374_v20  ;;  %v379_v54 = vld [vmem:[%s3447_s5 + $0x528] sm:$0xff]  ;;  %v406_v56 = vld [vmem:[%s3447_s5 + $0x600] sm:$0xff]  ;;  %v2384_v57 = vpack.c.bf16 %v511_v49, %v484_v48  ;;  %v405_v61 = vld [vmem:[%s3447_s5 + $0x5f8] sm:$0xff]  ;;  %v2386_v62 = vpack.c.bf16 %v566_v53, %v539_v52 }
  0x40   : > { %2433 = vmatpush1.bf16.msra.mxu1 %v2432_v42  ;;  %v538_v58 = vld [vmem:[%s3447_s5 + $0xa20] sm:$0xff]  ;;  %v2438_v59 = vpack.c.bf16 %v406_v56, %v379_v54  ;;  %v565_v63 = vld [vmem:[%s3447_s5 + $0xaf8] sm:$0xff]  ;;  %v460_v1 = vld [vmem:[%s3447_s5 + $0x7b0] sm:$0xff] }
  0x41   : > { %2435 = vmatprep.subr.bf16.mxu1 %v2434_v50  ;;  %v378_v60 = vld [vmem:[%s3447_s5 + $0x520] sm:$0xff]  ;;  %v433_v0 = vld [vmem:[%s3447_s5 + $0x6d8] sm:$0xff]  ;;  %v620_v3 = vld [vmem:[%s3447_s5 + $0xcb0] sm:$0xff]  ;;  %v2388_v5 = vpack.c.bf16 %v565_v63, %v538_v58 }
  0x42   : > { %2377 = vmatpush1.bf16.msra.mxu0 %v2376_v29  ;;  %v593_v2 = vld [vmem:[%s3447_s5 + $0xbd8] sm:$0xff]  ;;  %v2440_v4 = vpack.c.bf16 %v405_v61, %v378_v60  ;;  %v592_v6 = vld [vmem:[%s3447_s5 + $0xbd0] sm:$0xff]  ;;  %v2442_v7 = vpack.c.bf16 %v460_v1, %v433_v0  ;;  %v459_v9 = vld [vmem:[%s3447_s5 + $0x7a8] sm:$0xff] }
  0x43   : > { %2379 = vmatprep.subr.bf16.mxu0 %v2378_v34  ;;  %v432_v8 = vld [vmem:[%s3447_s5 + $0x6d0] sm:$0xff]  ;;  %v2390_v10 = vpack.c.bf16 %v620_v3, %v593_v2  ;;  %v619_v11 = vld [vmem:[%s3447_s5 + $0xca8] sm:$0xff]  ;;  %v514_v13 = vld [vmem:[%s3447_s5 + $0x960] sm:$0xff] }
  0x44   : > { %2437 = vmatpush1.bf16.msra.mxu1 %v2436_v55  ;;  %v487_v12 = vld [vmem:[%s3447_s5 + $0x888] sm:$0xff]  ;;  %v674_v15 = vld [vmem:[%s3447_s5 + $0xe60] sm:$0xff]  ;;  %v2444_v16 = vpack.c.bf16 %v459_v9, %v432_v8  ;;  %v2392_v17 = vpack.c.bf16 %v619_v11, %v592_v6  ;;  %v513_v21 = vld [vmem:[%s3447_s5 + $0x958] sm:$0xff] }
  0x45   : > { %2439 = vmatprep.subr.bf16.mxu1 %v2438_v59  ;;  %v647_v14 = vld [vmem:[%s3447_s5 + $0xd88] sm:$0xff]  ;;  %v646_v18 = vld [vmem:[%s3447_s5 + $0xd80] sm:$0xff]  ;;  %v2446_v19 = vpack.c.bf16 %v514_v13, %v487_v12  ;;  %v673_v23 = vld [vmem:[%s3447_s5 + $0xe58] sm:$0xff] }
  0x46   : > { %2381 = vmatpush1.bf16.msra.mxu0 %v2380_v43  ;;  %v486_v20 = vld [vmem:[%s3447_s5 + $0x880] sm:$0xff]  ;;  %v2394_v22 = vpack.c.bf16 %v674_v15, %v647_v14  ;;  %v541_v24 = vld [vmem:[%s3447_s5 + $0xa38] sm:$0xff]  ;;  %v568_v25 = vld [vmem:[%s3447_s5 + $0xb10] sm:$0xff]  ;;  %v2396_v30 = vpack.c.bf16 %v673_v23, %v646_v18 }
  0x47   : > { %2383 = vmatprep.subr.bf16.mxu0 %v2382_v47  ;;  %v701_v26 = vld [vmem:[%s3447_s5 + $0xf38] sm:$0xff]  ;;  %v728_v27 = vld [vmem:[%s3447_s5 + $0x1010] sm:$0xff]  ;;  %v2448_v29 = vpack.c.bf16 %v513_v21, %v486_v20  ;;  %v727_v31 = vld [vmem:[%s3447_s5 + $0x1008] sm:$0xff]  ;;  %v2450_v32 = vpack.c.bf16 %v568_v25, %v541_v24 }
  0x48   : > { %2441 = vmatpush1.bf16.msra.mxu1 %v2440_v4  ;;  %v700_v28 = vld [vmem:[%s3447_s5 + $0xf30] sm:$0xff]  ;;  %v567_v34 = vld [vmem:[%s3447_s5 + $0xb08] sm:$0xff]  ;;  %v2398_v35 = vpack.c.bf16 %v728_v27, %v701_v26  ;;  %v622_v37 = vld [vmem:[%s3447_s5 + $0xcc0] sm:$0xff] }
  0x49   : > { %2443 = vmatprep.subr.bf16.mxu1 %v2442_v7  ;;  %v540_v33 = vld [vmem:[%s3447_s5 + $0xa30] sm:$0xff]  ;;  %v595_v36 = vld [vmem:[%s3447_s5 + $0xbe8] sm:$0xff]  ;;  %v782_v40 = vld [vmem:[%s3447_s5 + $0x11c0] sm:$0xff]  ;;  %v2400_v42 = vpack.c.bf16 %v727_v31, %v700_v28 }
  0x4a   : > { %2385 = vmatpush1.bf16.msra.mxu0 %v2384_v57  ;;  %v3526_v38 = vld [vmem:[%s4514_s0 + $0x8] sm:$0xff]  ;;  %v2452_v41 = vpack.c.bf16 %v567_v34, %v540_v33  ;;  %v754_v43 = vld [vmem:[%s3447_s5 + $0x10e0] sm:$0xff]  ;;  %v2454_v44 = vpack.c.bf16 %v622_v37, %v595_v36  ;;  %v621_v46 = vld [vmem:[%s3447_s5 + $0xcb8] sm:$0xff] }
  0x4b   : > { %2387 = vmatprep.subr.bf16.mxu0 %v2386_v62  ;;  %v755_v39 = vld [vmem:[%s3447_s5 + $0x10e8] sm:$0xff]  ;;  %1285 = vmatprep.mubr.f32.mxu0 %v3526_v38  ;;  %v594_v45 = vld [vmem:[%s3447_s5 + $0xbe0] sm:$0xff]  ;;  %v781_v48 = vld [vmem:[%s3447_s5 + $0x11b8] sm:$0xff] }
  0x4c   : > { %2445 = vmatpush1.bf16.msra.mxu1 %v2444_v16  ;;  %1356 = vmatprep.mubr.f32.mxu1 %v3526_v38  ;;  %v2402_v47 = vpack.c.bf16 %v782_v40, %v755_v39  ;;  %v649_v49 = vld [vmem:[%s3447_s5 + $0xd98] sm:$0xff]  ;;  %v676_v50 = vld [vmem:[%s3447_s5 + $0xe70] sm:$0xff]  ;;  %v2456_v53 = vpack.c.bf16 %v621_v46, %v594_v45  ;;  %v2404_v54 = vpack.c.bf16 %v781_v48, %v754_v43  ;;  %v675_v58 = vld [vmem:[%s3447_s5 + $0xe68] sm:$0xff] }
  0x4d   : > { %2447 = vmatprep.subr.bf16.mxu1 %v2446_v19  ;;  %v809_v51 = vld [vmem:[%s3447_s5 + $0x1298] sm:$0xff]  ;;  %v836_v52 = vld [vmem:[%s3447_s5 + $0x1370] sm:$0xff]  ;;  %v2458_v56 = vpack.c.bf16 %v676_v50, %v649_v49  ;;  %v835_v60 = vld [vmem:[%s3447_s5 + $0x1368] sm:$0xff] }
  0x4e   : > { %2389 = vmatpush1.bf16.msra.mxu0 %v2388_v5  ;;  %v808_v55 = vld [vmem:[%s3447_s5 + $0x1290] sm:$0xff]  ;;  %v2406_v59 = vpack.c.bf16 %v836_v52, %v809_v51  ;;  %v703_v61 = vld [vmem:[%s3447_s5 + $0xf48] sm:$0xff]  ;;  %v730_v62 = vld [vmem:[%s3447_s5 + $0x1020] sm:$0xff] }
  0x4f   : > { %2391 = vmatprep.subr.bf16.mxu0 %v2390_v10  ;;  %v648_v57 = vld [vmem:[%s3447_s5 + $0xd90] sm:$0xff]  ;;  %v863_v63 = vld [vmem:[%s3447_s5 + $0x1448] sm:$0xff]  ;;  %v890_v0 = vld [vmem:[%s3447_s5 + $0x1520] sm:$0xff]  ;;  %v2408_v2 = vpack.c.bf16 %v835_v60, %v808_v55  ;;  %v2462_v4 = vpack.c.bf16 %v730_v62, %v703_v61 }
  0x50   : > { %2449 = vmatpush1.bf16.msra.mxu1 %v2448_v29  ;;  %v2460_v1 = vpack.c.bf16 %v675_v58, %v648_v57  ;;  %v862_v3 = vld [vmem:[%s3447_s5 + $0x1440] sm:$0xff]  ;;  %v729_v6 = vld [vmem:[%s3447_s5 + $0x1018] sm:$0xff]  ;;  %v2410_v7 = vpack.c.bf16 %v890_v0, %v863_v63  ;;  %v784_v10 = vld [vmem:[%s3447_s5 + $0x11d0] sm:$0xff] }
  0x51   : > { %2451 = vmatprep.subr.bf16.mxu1 %v2450_v32  ;;  %v702_v5 = vld [vmem:[%s3447_s5 + $0xf40] sm:$0xff]  ;;  %v889_v8 = vld [vmem:[%s3447_s5 + $0x1518] sm:$0xff]  ;;  %v944_v12 = vld [vmem:[%s3447_s5 + $0x16d0] sm:$0xff] }
  0x52   : > { %2393 = vmatpush1.bf16.msra.mxu0 %v2392_v17  ;;  %v757_v9 = vld [vmem:[%s3447_s5 + $0x10f8] sm:$0xff]  ;;  %v2464_v13 = vpack.c.bf16 %v729_v6, %v702_v5  ;;  %v2412_v14 = vpack.c.bf16 %v889_v8, %v862_v3  ;;  %v916_v15 = vld [vmem:[%s3447_s5 + $0x15f0] sm:$0xff]  ;;  %v783_v18 = vld [vmem:[%s3447_s5 + $0x11c8] sm:$0xff] }
  0x53   : > { %2395 = vmatprep.subr.bf16.mxu0 %v2394_v22  ;;  %v917_v11 = vld [vmem:[%s3447_s5 + $0x15f8] sm:$0xff]  ;;  %v2466_v16 = vpack.c.bf16 %v784_v10, %v757_v9  ;;  %v756_v17 = vld [vmem:[%s3447_s5 + $0x10f0] sm:$0xff]  ;;  %v943_v20 = vld [vmem:[%s3447_s5 + $0x16c8] sm:$0xff] }
  0x54   : > { %2453 = vmatpush1.bf16.msra.mxu1 %v2452_v41  ;;  %v2414_v19 = vpack.c.bf16 %v944_v12, %v917_v11  ;;  %v811_v21 = vld [vmem:[%s3447_s5 + $0x12a8] sm:$0xff]  ;;  %v838_v22 = vld [vmem:[%s3447_s5 + $0x1380] sm:$0xff]  ;;  %v2468_v25 = vpack.c.bf16 %v783_v18, %v756_v17  ;;  %v2416_v26 = vpack.c.bf16 %v943_v20, %v916_v15  ;;  %v997_v32 = vld [vmem:[%s3447_s5 + $0x1878] sm:$0xff] }
  0x55   : > { %2455 = vmatprep.subr.bf16.mxu1 %v2454_v44  ;;  %v971_v23 = vld [vmem:[%s3447_s5 + $0x17a8] sm:$0xff]  ;;  %v998_v24 = vld [vmem:[%s3447_s5 + $0x1880] sm:$0xff]  ;;  %v2470_v28 = vpack.c.bf16 %v838_v22, %v811_v21  ;;  %v865_v33 = vld [vmem:[%s3447_s5 + $0x1458] sm:$0xff] }
  0x56   : > { %2397 = vmatpush1.bf16.msra.mxu0 %v2396_v30  ;;  %v970_v27 = vld [vmem:[%s3447_s5 + $0x17a0] sm:$0xff]  ;;  %v837_v30 = vld [vmem:[%s3447_s5 + $0x1378] sm:$0xff]  ;;  %v2418_v31 = vpack.c.bf16 %v998_v24, %v971_v23  ;;  %v892_v34 = vld [vmem:[%s3447_s5 + $0x1530] sm:$0xff] }
  0x57   : > { %2399 = vmatprep.subr.bf16.mxu0 %v2398_v35  ;;  %v810_v29 = vld [vmem:[%s3447_s5 + $0x12a0] sm:$0xff]  ;;  %v1025_v35 = vld [vmem:[%s3447_s5 + $0x1958] sm:$0xff]  ;;  %v1052_v36 = vld [vmem:[%s3447_s5 + $0x1a30] sm:$0xff]  ;;  %v2420_v39 = vpack.c.bf16 %v997_v32, %v970_v27  ;;  %v2474_v41 = vpack.c.bf16 %v892_v34, %v865_v33 }
  0x58   : > { %2457 = vmatpush1.bf16.msra.mxu1 %v2456_v53  ;;  %v2472_v37 = vpack.c.bf16 %v837_v30, %v810_v29  ;;  %v1024_v40 = vld [vmem:[%s3447_s5 + $0x1950] sm:$0xff]  ;;  %v891_v43 = vld [vmem:[%s3447_s5 + $0x1528] sm:$0xff]  ;;  %v2422_v44 = vpack.c.bf16 %v1052_v36, %v1025_v35  ;;  %v246_v49 = vld [vmem:[%s3447_s5 + $0x100] sm:$0xff] }
  0x59   : > { %2459 = vmatprep.subr.bf16.mxu1 %v2458_v56  ;;  %v1051_v45 = vld [vmem:[%s3447_s5 + $0x1a28] sm:$0xff]  ;;  %v218_v52 = vld [vmem:[%s3447_s5 + $0x20] sm:$0xff]  ;;  %v945_v55 = vld [vmem:[%s3447_s5 + $0x16d8] sm:$0xff] }
  0x5a   : > { %2401 = vmatpush1.bf16.msra.mxu0 %v2400_v42  ;;  %v864_v42 = vld [vmem:[%s3447_s5 + $0x1450] sm:$0xff]  ;;  %v919_v46 = vld [vmem:[%s3447_s5 + $0x1608] sm:$0xff]  ;;  %v2424_v51 = vpack.c.bf16 %v1051_v45, %v1024_v40  ;;  %v245_v57 = vld [vmem:[%s3447_s5 + $0xf8] sm:$0xff] }
  0x5b   : > { %2403 = vmatprep.subr.bf16.mxu0 %v2402_v47  ;;  %v946_v47 = vld [vmem:[%s3447_s5 + $0x16e0] sm:$0xff]  ;;  %v219_v48 = vld [vmem:[%s3447_s5 + $0x28] sm:$0xff]  ;;  %v2476_v50 = vpack.c.bf16 %v891_v43, %v864_v42  ;;  %v973_v58 = vld [vmem:[%s3447_s5 + $0x17b8] sm:$0xff]  ;;  %v2492_v0 = vpack.c.bf16 %v245_v57, %v218_v52 }
  0x5c   : > { %2461 = vmatpush1.bf16.msra.mxu1 %v2460_v1  ;;  %v2478_v53 = vpack.c.bf16 %v946_v47, %v919_v46  ;;  %v2490_v56 = vpack.c.bf16 %v246_v49, %v219_v48  ;;  %v273_v60 = vld [vmem:[%s3447_s5 + $0x1d8] sm:$0xff]  ;;  %v300_v61 = vld [vmem:[%s3447_s5 + $0x2b0] sm:$0xff]  ;;  %v3591_v62 = vld [vmem:[%s4514_s0] sm:$0xff] }
  0x5d   : > { %2463 = vmatprep.subr.bf16.mxu1 %v2462_v4  ;;  %v272_v1 = vld [vmem:[%s3447_s5 + $0x1d0] sm:$0xff]  ;;  %v999_v4 = vld [vmem:[%s3447_s5 + $0x1888] sm:$0xff]  ;;  %v2494_v5 = vpack.c.bf16 %v300_v61, %v273_v60  ;;  %v1054_v8 = vld [vmem:[%s3447_s5 + $0x1a40] sm:$0xff] }
  0x5e   : > { %2405 = vmatpush1.bf16.msra.mxu0 %v2404_v54  ;;  %v918_v54 = vld [vmem:[%s3447_s5 + $0x1600] sm:$0xff]  ;;  %v972_v3 = vld [vmem:[%s3447_s5 + $0x17b0] sm:$0xff]  ;;  %v299_v6 = vld [vmem:[%s3447_s5 + $0x2a8] sm:$0xff] }
  0x5f   : > { %2407 = vmatprep.subr.bf16.mxu0 %v2406_v59  ;;  %v1000_v59 = vld [vmem:[%s3447_s5 + $0x1890] sm:$0xff]  ;;  %v2480_v63 = vpack.c.bf16 %v945_v55, %v918_v54  ;;  %v327_v9 = vld [vmem:[%s3447_s5 + $0x388] sm:$0xff]  ;;  %v354_v10 = vld [vmem:[%s3447_s5 + $0x460] sm:$0xff]  ;;  %v2484_v11 = vpack.c.bf16 %v999_v4, %v972_v3  ;;  %v2496_v12 = vpack.c.bf16 %v299_v6, %v272_v1 }
  0x60   : > { %2465 = vmatpush1.bf16.msra.mxu1 %v2464_v13  ;;  %v326_v13 = vld [vmem:[%s3447_s5 + $0x380] sm:$0xff]  ;;  %v2498_v17 = vpack.c.bf16 %v354_v10, %v327_v9  ;;  %v353_v18 = vld [vmem:[%s3447_s5 + $0x458] sm:$0xff]  ;;  %v248_v20 = vld [vmem:[%s3447_s5 + $0x110] sm:$0xff] }
  0x61   : > { %2467 = vmatprep.subr.bf16.mxu1 %v2466_v16  ;;  %v1026_v15 = vld [vmem:[%s3447_s5 + $0x1960] sm:$0xff]  ;;  %v1053_v16 = vld [vmem:[%s3447_s5 + $0x1a38] sm:$0xff]  ;;  %v408_v22 = vld [vmem:[%s3447_s5 + $0x610] sm:$0xff]  ;;  %v2500_v24 = vpack.c.bf16 %v353_v18, %v326_v13 }
  0x62   : > { %2409 = vmatpush1.bf16.msra.mxu0 %v2408_v2  ;;  %v2482_v2 = vpack.c.bf16 %v1000_v59, %v973_v58  ;;  %v381_v21 = vld [vmem:[%s3447_s5 + $0x538] sm:$0xff]  ;;  %v2488_v23 = vpack.c.bf16 %v1053_v16, %v1026_v15  ;;  %v220_v27 = vld [vmem:[%s3447_s5 + $0x30] sm:$0xff]  ;;  %v407_v30 = vld [vmem:[%s3447_s5 + $0x608] sm:$0xff] }
  0x63   : > { %2411 = vmatprep.subr.bf16.mxu0 %v2410_v7  ;;  %v1027_v7 = vld [vmem:[%s3447_s5 + $0x1968] sm:$0xff]  ;;  %v2502_v29 = vpack.c.bf16 %v408_v22, %v381_v21  ;;  %v302_v32 = vld [vmem:[%s3447_s5 + $0x2c0] sm:$0xff]  ;;  %v461_v43 = vld [vmem:[%s3447_s5 + $0x7b8] sm:$0xff] }
  0x64   : > { %2469 = vmatpush1.bf16.msra.mxu1 %v2468_v25  ;;  %v380_v25 = vld [vmem:[%s3447_s5 + $0x530] sm:$0xff]  ;;  %v435_v33 = vld [vmem:[%s3447_s5 + $0x6e8] sm:$0xff]  ;;  %v462_v34 = vld [vmem:[%s3447_s5 + $0x7c0] sm:$0xff] }
  0x65   : > { %2471 = vmatprep.subr.bf16.mxu1 %v2470_v28  ;;  %v247_v28 = vld [vmem:[%s3447_s5 + $0x108] sm:$0xff]  ;;  %v2504_v36 = vpack.c.bf16 %v407_v30, %v380_v25  ;;  %v274_v40 = vld [vmem:[%s3447_s5 + $0x1e0] sm:$0xff]  ;;  %v2506_v42 = vpack.c.bf16 %v462_v34, %v435_v33  ;;  %v356_v45 = vld [vmem:[%s3447_s5 + $0x470] sm:$0xff] }
  0x66   : > { %2413 = vmatpush1.bf16.msra.mxu0 %v2412_v14  ;;  %v2486_v14 = vpack.c.bf16 %v1054_v8, %v1027_v7  ;;  %v2556_v35 = vpack.c.bf16 %v247_v28, %v220_v27  ;;  %v489_v46 = vld [vmem:[%s3447_s5 + $0x898] sm:$0xff]  ;;  %v516_v47 = vld [vmem:[%s3447_s5 + $0x970] sm:$0xff]  ;;  %v515_v55 = vld [vmem:[%s3447_s5 + $0x968] sm:$0xff] }
  0x67   : > { %2415 = vmatprep.subr.bf16.mxu0 %v2414_v19  ;;  %v221_v19 = vld [vmem:[%s3447_s5 + $0x38] sm:$0xff]  ;;  %v328_v52 = vld [vmem:[%s3447_s5 + $0x390] sm:$0xff]  ;;  %v2510_v54 = vpack.c.bf16 %v516_v47, %v489_v46  ;;  %v410_v57 = vld [vmem:[%s3447_s5 + $0x620] sm:$0xff] }
  0x68   : > { %2473 = vmatpush1.bf16.msra.mxu1 %v2472_v37  ;;  %v434_v37 = vld [vmem:[%s3447_s5 + $0x6e0] sm:$0xff]  ;;  %v543_v58 = vld [vmem:[%s3447_s5 + $0xa48] sm:$0xff]  ;;  %v569_v4 = vld [vmem:[%s3447_s5 + $0xb18] sm:$0xff] }
  0x69   : > { %2475 = vmatprep.subr.bf16.mxu1 %v2474_v41  ;;  %v301_v41 = vld [vmem:[%s3447_s5 + $0x2b8] sm:$0xff]  ;;  %v2508_v49 = vpack.c.bf16 %v461_v43, %v434_v37  ;;  %v570_v59 = vld [vmem:[%s3447_s5 + $0xb20] sm:$0xff]  ;;  %v464_v6 = vld [vmem:[%s3447_s5 + $0x7d0] sm:$0xff] }
  0x6a   : > { %2417 = vmatpush1.bf16.msra.mxu0 %v2416_v26  ;;  %v2554_v26 = vpack.c.bf16 %v248_v20, %v221_v19  ;;  %v2560_v48 = vpack.c.bf16 %v301_v41, %v274_v40  ;;  %v382_v1 = vld [vmem:[%s3447_s5 + $0x540] sm:$0xff]  ;;  %v2514_v3 = vpack.c.bf16 %v570_v59, %v543_v58  ;;  %v597_v7 = vld [vmem:[%s3447_s5 + $0xbf8] sm:$0xff]  ;;  %v624_v8 = vld [vmem:[%s3447_s5 + $0xcd0] sm:$0xff] }
  0x6b   : > { %2419 = vmatprep.subr.bf16.mxu0 %v2418_v31  ;;  %v275_v31 = vld [vmem:[%s3447_s5 + $0x1e8] sm:$0xff]  ;;  %v436_v13 = vld [vmem:[%s3447_s5 + $0x6f0] sm:$0xff]  ;;  %v2518_v15 = vpack.c.bf16 %v624_v8, %v597_v7  ;;  %v518_v18 = vld [vmem:[%s3447_s5 + $0x980] sm:$0xff] }
  0x6c   : > { %2477 = vmatpush1.bf16.msra.mxu1 %v2476_v50  ;;  %v488_v50 = vld [vmem:[%s3447_s5 + $0x890] sm:$0xff]  ;;  %v623_v16 = vld [vmem:[%s3447_s5 + $0xcc8] sm:$0xff]  ;;  %v678_v20 = vld [vmem:[%s3447_s5 + $0xe80] sm:$0xff] }
  0x6d   : > { %2479 = vmatprep.subr.bf16.mxu1 %v2478_v53  ;;  %v355_v53 = vld [vmem:[%s3447_s5 + $0x468] sm:$0xff]  ;;  %v2512_v61 = vpack.c.bf16 %v515_v55, %v488_v50  ;;  %v490_v25 = vld [vmem:[%s3447_s5 + $0x8a0] sm:$0xff]  ;;  %v677_v28 = vld [vmem:[%s3447_s5 + $0xe78] sm:$0xff] }
  0x6e   : > { %2421 = vmatpush1.bf16.msra.mxu0 %v2420_v39  ;;  %v2558_v39 = vpack.c.bf16 %v302_v32, %v275_v31  ;;  %v2564_v60 = vpack.c.bf16 %v355_v53, %v328_v52  ;;  %v651_v19 = vld [vmem:[%s3447_s5 + $0xda8] sm:$0xff]  ;;  %v572_v30 = vld [vmem:[%s3447_s5 + $0xb30] sm:$0xff]  ;;  %v705_v31 = vld [vmem:[%s3447_s5 + $0xf58] sm:$0xff] }
  0x6f   : > { %2423 = vmatprep.subr.bf16.mxu0 %v2422_v44  ;;  %v329_v44 = vld [vmem:[%s3447_s5 + $0x398] sm:$0xff]  ;;  %v2522_v27 = vpack.c.bf16 %v678_v20, %v651_v19  ;;  %v732_v32 = vld [vmem:[%s3447_s5 + $0x1030] sm:$0xff]  ;;  %v731_v41 = vld [vmem:[%s3447_s5 + $0x1028] sm:$0xff] }
  0x70   : > { %2481 = vmatpush1.bf16.msra.mxu1 %v2480_v63  ;;  %v542_v63 = vld [vmem:[%s3447_s5 + $0xa40] sm:$0xff]  ;;  %v544_v37 = vld [vmem:[%s3447_s5 + $0xa50] sm:$0xff]  ;;  %v2526_v40 = vpack.c.bf16 %v732_v32, %v705_v31  ;;  %v785_v53 = vld [vmem:[%s3447_s5 + $0x11d8] sm:$0xff] }
  0x71   : > { %2483 = vmatprep.subr.bf16.mxu1 %v2482_v2  ;;  %v409_v2 = vld [vmem:[%s3447_s5 + $0x618] sm:$0xff]  ;;  %v2516_v10 = vpack.c.bf16 %v569_v4, %v542_v63  ;;  %v626_v43 = vld [vmem:[%s3447_s5 + $0xce0] sm:$0xff]  ;;  %v680_v55 = vld [vmem:[%s3447_s5 + $0xe90] sm:$0xff] }
  0x72   : > { %2425 = vmatpush1.bf16.msra.mxu0 %v2424_v51  ;;  %v2562_v51 = vpack.c.bf16 %v356_v45, %v329_v44  ;;  %v2568_v9 = vpack.c.bf16 %v409_v2, %v382_v1  ;;  %v759_v44 = vld [vmem:[%s3447_s5 + $0x1108] sm:$0xff]  ;;  %v786_v45 = vld [vmem:[%s3447_s5 + $0x11e0] sm:$0xff]  ;;  %v652_v63 = vld [vmem:[%s3447_s5 + $0xdb0] sm:$0xff] }
  0x73   : > { %2491 = vmatprep.subr.bf16.mxu0 %v2490_v56  ;;  %v383_v56 = vld [vmem:[%s3447_s5 + $0x548] sm:$0xff]  ;;  %v598_v50 = vld [vmem:[%s3447_s5 + $0xc00] sm:$0xff]  ;;  %v2530_v52 = vpack.c.bf16 %v786_v45, %v759_v44 }
  0x74   : > { %2485 = vmatpush1.bf16.msra.mxu1 %v2484_v11  ;;  %v596_v11 = vld [vmem:[%s3447_s5 + $0xbf0] sm:$0xff]  ;;  %v839_v2 = vld [vmem:[%s3447_s5 + $0x1388] sm:$0xff]  ;;  %v734_v4 = vld [vmem:[%s3447_s5 + $0x1040] sm:$0xff] }
  0x75   : > { %1286 = vmatmul.mubr.f32.vlgmr.msra.gmra.mrb[0].mxu0 %v3591_v62  ;;  %2487 = vmatprep.subr.bf16.mxu1 %v2486_v14  ;;  %v463_v14 = vld [vmem:[%s3447_s5 + $0x7c8] sm:$0xff]  ;;  %v2520_v22 = vpack.c.bf16 %v623_v16, %v596_v11  ;;  %v706_v11 = vld [vmem:[%s3447_s5 + $0xf60] sm:$0xff]  ;;  %v788_v16 = vld [vmem:[%s3447_s5 + $0x11f0] sm:$0xff] }
  0x76   : > { %2493 = vmatpush1.bf16.msra.mxu0 %v2492_v0  ;;  %1427 = vmatprep.mubr.f32.mxu0 %v3526_v38  ;;  %v2566_v0 = vpack.c.bf16 %v410_v57, %v383_v56  ;;  %v2572_v21 = vpack.c.bf16 %v463_v14, %v436_v13  ;;  %v813_v56 = vld [vmem:[%s3447_s5 + $0x12b8] sm:$0xff]  ;;  %v840_v57 = vld [vmem:[%s3447_s5 + $0x1390] sm:$0xff] }
  0x77   : > { %2495 = vmatprep.subr.bf16.mxu0 %v2494_v5  ;;  %v437_v5 = vld [vmem:[%s3447_s5 + $0x6f8] sm:$0xff]  ;;  %v2534_v1 = vpack.c.bf16 %v840_v57, %v813_v56 }
  0x78   : > { %2489 = vmatpush1.bf16.msra.mxu1 %v2488_v23  ;;  %v650_v23 = vld [vmem:[%s3447_s5 + $0xda0] sm:$0xff]  ;;  %v893_v14 = vld [vmem:[%s3447_s5 + $0x1538] sm:$0xff] }
  0x79   : > { %2555 = vmatprep.subr.bf16.mxu1 %v2554_v26  ;;  %v517_v26 = vld [vmem:[%s3447_s5 + $0x978] sm:$0xff]  ;;  %v2524_v34 = vpack.c.bf16 %v677_v28, %v650_v23  ;;  %v760_v23 = vld [vmem:[%s3447_s5 + $0x1110] sm:$0xff]  ;;  %v842_v28 = vld [vmem:[%s3447_s5 + $0x13a0] sm:$0xff] }
  0x7a   : > { %2497 = vmatpush1.bf16.msra.mxu0 %v2496_v12  ;;  %v2570_v12 = vpack.c.bf16 %v464_v6, %v437_v5  ;;  %v2576_v33 = vpack.c.bf16 %v517_v26, %v490_v25  ;;  %v867_v5 = vld [vmem:[%s3447_s5 + $0x1468] sm:$0xff]  ;;  %v894_v6 = vld [vmem:[%s3447_s5 + $0x1540] sm:$0xff] }
  0x7b   : > { %2499 = vmatprep.subr.bf16.mxu0 %v2498_v17  ;;  %1357 = vmatmul.mubr.f32.vlgmr.msra.gmra.mrb[0].mxu1 %v3591_v62  ;;  %v491_v17 = vld [vmem:[%s3447_s5 + $0x8a8] sm:$0xff]  ;;  %v2538_v13 = vpack.c.bf16 %v894_v6, %v867_v5 }
  0x7c   : > { %2557 = vmatpush1.bf16.msra.mxu1 %v2556_v35  ;;  %1498 = vmatprep.mubr.f32.mxu1 %v3526_v38  ;;  %v704_v35 = vld [vmem:[%s3447_s5 + $0xf50] sm:$0xff]  ;;  %v947_v26 = vld [vmem:[%s3447_s5 + $0x16e8] sm:$0xff] }
  0x7d   : > { %2559 = vmatprep.subr.bf16.mxu1 %v2558_v39  ;;  %v571_v39 = vld [vmem:[%s3447_s5 + $0xb28] sm:$0xff]  ;;  %v2528_v47 = vpack.c.bf16 %v731_v41, %v704_v35  ;;  %v814_v35 = vld [vmem:[%s3447_s5 + $0x12c0] sm:$0xff]  ;;  %v896_v41 = vld [vmem:[%s3447_s5 + $0x1550] sm:$0xff] }
  0x7e   : > { %2501 = vmatpush1.bf16.msra.mxu0 %v2500_v24  ;;  %v2574_v24 = vpack.c.bf16 %v518_v18, %v491_v17  ;;  %v2580_v46 = vpack.c.bf16 %v571_v39, %v544_v37  ;;  %v921_v17 = vld [vmem:[%s3447_s5 + $0x1618] sm:$0xff]  ;;  %v948_v18 = vld [vmem:[%s3447_s5 + $0x16f0] sm:$0xff] }
  0x7f   : > { %2503 = vmatprep.subr.bf16.mxu0 %v2502_v29  ;;  %v545_v29 = vld [vmem:[%s3447_s5 + $0xa58] sm:$0xff]  ;;  %v2542_v25 = vpack.c.bf16 %v948_v18, %v921_v17 }
  0x80   : > { %2561 = vmatpush1.bf16.msra.mxu1 %v2560_v48  ;;  %v758_v48 = vld [vmem:[%s3447_s5 + $0x1100] sm:$0xff]  ;;  %v1001_v39 = vld [vmem:[%s3447_s5 + $0x1898] sm:$0xff] }
  0x81   : > { %2563 = vmatprep.subr.bf16.mxu1 %v2562_v51  ;;  %v625_v51 = vld [vmem:[%s3447_s5 + $0xcd8] sm:$0xff]  ;;  %v2532_v59 = vpack.c.bf16 %v785_v53, %v758_v48  ;;  %v868_v48 = vld [vmem:[%s3447_s5 + $0x1470] sm:$0xff]  ;;  %v950_v53 = vld [vmem:[%s3447_s5 + $0x1700] sm:$0xff] }
  0x82   : > { %2505 = vmatpush1.bf16.msra.mxu0 %v2504_v36  ;;  %v2578_v36 = vpack.c.bf16 %v572_v30, %v545_v29  ;;  %v2584_v58 = vpack.c.bf16 %v625_v51, %v598_v50  ;;  %v975_v29 = vld [vmem:[%s3447_s5 + $0x17c8] sm:$0xff]  ;;  %v1002_v30 = vld [vmem:[%s3447_s5 + $0x18a0] sm:$0xff] }
  0x83   : > { %2507 = vmatprep.subr.bf16.mxu0 %v2506_v42  ;;  %v599_v42 = vld [vmem:[%s3447_s5 + $0xc08] sm:$0xff]  ;;  %v2546_v37 = vpack.c.bf16 %v1002_v30, %v975_v29 }
  0x84   : > { %2565 = vmatpush1.bf16.msra.mxu1 %v2564_v60  ;;  %v812_v60 = vld [vmem:[%s3447_s5 + $0x12b0] sm:$0xff]  ;;  %v1055_v51 = vld [vmem:[%s3447_s5 + $0x1a48] sm:$0xff] }
  0x85   : > { %2567 = vmatprep.subr.bf16.mxu1 %v2566_v0  ;;  %v679_v0 = vld [vmem:[%s3447_s5 + $0xe88] sm:$0xff]  ;;  %v2536_v8 = vpack.c.bf16 %v839_v2, %v812_v60  ;;  %v922_v60 = vld [vmem:[%s3447_s5 + $0x1620] sm:$0xff]  ;;  %v1004_v2 = vld [vmem:[%s3447_s5 + $0x18b0] sm:$0xff] }
  0x86   : > { %2509 = vmatpush1.bf16.msra.mxu0 %v2508_v49  ;;  %v2582_v49 = vpack.c.bf16 %v626_v43, %v599_v42  ;;  %v2588_v7 = vpack.c.bf16 %v679_v0, %v652_v63  ;;  %v1029_v42 = vld [vmem:[%s3447_s5 + $0x1978] sm:$0xff]  ;;  %v1056_v43 = vld [vmem:[%s3447_s5 + $0x1a50] sm:$0xff] }
  0x87   : > { %2511 = vmatprep.subr.bf16.mxu0 %v2510_v54  ;;  %v653_v54 = vld [vmem:[%s3447_s5 + $0xdb8] sm:$0xff]  ;;  %v2550_v50 = vpack.c.bf16 %v1056_v43, %v1029_v42 }
  0x88   : > { %2569 = vmatpush1.bf16.msra.mxu1 %v2568_v9  ;;  %v866_v9 = vld [vmem:[%s3447_s5 + $0x1460] sm:$0xff]  ;;  %v249_v0 = vld [vmem:[%s3447_s5 + $0x118] sm:$0xff] }
  0x89   : > { %2571 = vmatprep.subr.bf16.mxu1 %v2570_v12  ;;  %v733_v12 = vld [vmem:[%s3447_s5 + $0x1038] sm:$0xff]  ;;  %v2540_v20 = vpack.c.bf16 %v893_v14, %v866_v9  ;;  %v976_v9 = vld [vmem:[%s3447_s5 + $0x17d0] sm:$0xff]  ;;  %v1058_v14 = vld [vmem:[%s3447_s5 + $0x1a60] sm:$0xff] }
  0x8a   : > { %2513 = vmatpush1.bf16.msra.mxu0 %v2512_v61  ;;  %v2586_v61 = vpack.c.bf16 %v680_v55, %v653_v54  ;;  %v2592_v19 = vpack.c.bf16 %v733_v12, %v706_v11  ;;  %v223_v54 = vld [vmem:[%s3447_s5 + $0x48] sm:$0xff]  ;;  %v250_v55 = vld [vmem:[%s3447_s5 + $0x120] sm:$0xff] }
  0x8b   : > { %2515 = vmatprep.subr.bf16.mxu0 %v2514_v3  ;;  %v707_v3 = vld [vmem:[%s3447_s5 + $0xf68] sm:$0xff]  ;;  %v2618_v63 = vpack.c.bf16 %v250_v55, %v223_v54 }
  0x8c   : > { %2573 = vmatpush1.bf16.msra.mxu1 %v2572_v21  ;;  %v920_v21 = vld [vmem:[%s3447_s5 + $0x1610] sm:$0xff]  ;;  %v303_v12 = vld [vmem:[%s3447_s5 + $0x2c8] sm:$0xff] }
  0x8d   : > { %2575 = vmatprep.subr.bf16.mxu1 %v2574_v24  ;;  %v787_v24 = vld [vmem:[%s3447_s5 + $0x11e8] sm:$0xff]  ;;  %v2544_v32 = vpack.c.bf16 %v947_v26, %v920_v21  ;;  %v1030_v21 = vld [vmem:[%s3447_s5 + $0x1980] sm:$0xff]  ;;  %v252_v26 = vld [vmem:[%s3447_s5 + $0x130] sm:$0xff] }
  0x8e   : > { %2517 = vmatpush1.bf16.msra.mxu0 %v2516_v10  ;;  %v2590_v10 = vpack.c.bf16 %v734_v4, %v707_v3  ;;  %v2596_v31 = vpack.c.bf16 %v787_v24, %v760_v23  ;;  %v277_v3 = vld [vmem:[%s3447_s5 + $0x1f8] sm:$0xff]  ;;  %v304_v4 = vld [vmem:[%s3447_s5 + $0x2d0] sm:$0xff] }
  0x8f   : > { %2519 = vmatprep.subr.bf16.mxu0 %v2518_v15  ;;  %v761_v15 = vld [vmem:[%s3447_s5 + $0x1118] sm:$0xff]  ;;  %v2622_v11 = vpack.c.bf16 %v304_v4, %v277_v3  ;;  %v546_v3 = vld [vmem:[%s3447_s5 + $0xa60] sm:$0xff] }
  0x90   : > { %2577 = vmatpush1.bf16.msra.mxu1 %v2576_v33  ;;  %v974_v33 = vld [vmem:[%s3447_s5 + $0x17c0] sm:$0xff]  ;;  %v357_v24 = vld [vmem:[%s3447_s5 + $0x478] sm:$0xff] }
  0x91   : > { %2579 = vmatprep.subr.bf16.mxu1 %v2578_v36  ;;  %v841_v36 = vld [vmem:[%s3447_s5 + $0x1398] sm:$0xff]  ;;  %v2548_v45 = vpack.c.bf16 %v1001_v39, %v974_v33  ;;  %v224_v33 = vld [vmem:[%s3447_s5 + $0x50] sm:$0xff]  ;;  %v306_v39 = vld [vmem:[%s3447_s5 + $0x2e0] sm:$0xff] }
  0x92   : > { %2521 = vmatpush1.bf16.msra.mxu0 %v2520_v22  ;;  %v2594_v22 = vpack.c.bf16 %v788_v16, %v761_v15  ;;  %v2600_v44 = vpack.c.bf16 %v841_v36, %v814_v35  ;;  %v331_v15 = vld [vmem:[%s3447_s5 + $0x3a8] sm:$0xff]  ;;  %v358_v16 = vld [vmem:[%s3447_s5 + $0x480] sm:$0xff] }
  0x93   : > { %2523 = vmatprep.subr.bf16.mxu0 %v2522_v27  ;;  %v815_v27 = vld [vmem:[%s3447_s5 + $0x12c8] sm:$0xff]  ;;  %v2626_v23 = vpack.c.bf16 %v358_v16, %v331_v15  ;;  %v600_v15 = vld [vmem:[%s3447_s5 + $0xc10] sm:$0xff] }
  0x94   : > { %2581 = vmatpush1.bf16.msra.mxu1 %v2580_v46  ;;  %v1028_v46 = vld [vmem:[%s3447_s5 + $0x1970] sm:$0xff]  ;;  %v411_v36 = vld [vmem:[%s3447_s5 + $0x628] sm:$0xff] }
  0x95   : > { %2583 = vmatprep.subr.bf16.mxu1 %v2582_v49  ;;  %v895_v49 = vld [vmem:[%s3447_s5 + $0x1548] sm:$0xff]  ;;  %v2552_v57 = vpack.c.bf16 %v1055_v51, %v1028_v46  ;;  %v278_v46 = vld [vmem:[%s3447_s5 + $0x200] sm:$0xff]  ;;  %v360_v51 = vld [vmem:[%s3447_s5 + $0x490] sm:$0xff] }
  0x96   : > { %2525 = vmatpush1.bf16.msra.mxu0 %v2524_v34  ;;  %v2598_v34 = vpack.c.bf16 %v842_v28, %v815_v27  ;;  %v2604_v56 = vpack.c.bf16 %v895_v49, %v868_v48  ;;  %v385_v27 = vld [vmem:[%s3447_s5 + $0x558] sm:$0xff]  ;;  %v412_v28 = vld [vmem:[%s3447_s5 + $0x630] sm:$0xff] }
  0x97   : > { %2527 = vmatprep.subr.bf16.mxu0 %v2526_v40  ;;  %v869_v40 = vld [vmem:[%s3447_s5 + $0x1478] sm:$0xff]  ;;  %v2630_v35 = vpack.c.bf16 %v412_v28, %v385_v27  ;;  %v654_v27 = vld [vmem:[%s3447_s5 + $0xdc0] sm:$0xff] }
  0x98   : > { %2585 = vmatpush1.bf16.msra.mxu1 %v2584_v58  ;;  %v222_v58 = vld [vmem:[%s3447_s5 + $0x40] sm:$0xff]  ;;  %v465_v49 = vld [vmem:[%s3447_s5 + $0x7d8] sm:$0xff] }
  0x99   : > { %2587 = vmatprep.subr.bf16.mxu1 %v2586_v61  ;;  %v949_v61 = vld [vmem:[%s3447_s5 + $0x16f8] sm:$0xff]  ;;  %v2620_v6 = vpack.c.bf16 %v249_v0, %v222_v58  ;;  %v332_v58 = vld [vmem:[%s3447_s5 + $0x3b0] sm:$0xff]  ;;  %v547_v0 = vld [vmem:[%s3447_s5 + $0xa68] sm:$0xff] }
  0x9a   : > { %2529 = vmatpush1.bf16.msra.mxu0 %v2528_v47  ;;  %v2602_v47 = vpack.c.bf16 %v896_v41, %v869_v40  ;;  %v2608_v5 = vpack.c.bf16 %v949_v61, %v922_v60  ;;  %v439_v40 = vld [vmem:[%s3447_s5 + $0x708] sm:$0xff]  ;;  %v466_v41 = vld [vmem:[%s3447_s5 + $0x7e0] sm:$0xff] }
  0x9b   : > { %2531 = vmatprep.subr.bf16.mxu0 %v2530_v52  ;;  %v923_v52 = vld [vmem:[%s3447_s5 + $0x1628] sm:$0xff]  ;;  %v2634_v48 = vpack.c.bf16 %v466_v41, %v439_v40  ;;  %v708_v40 = vld [vmem:[%s3447_s5 + $0xf70] sm:$0xff] }
  0x9c   : > { %2589 = vmatpush1.bf16.msra.mxu1 %v2588_v7  ;;  %v276_v7 = vld [vmem:[%s3447_s5 + $0x1f0] sm:$0xff]  ;;  %v519_v61 = vld [vmem:[%s3447_s5 + $0x988] sm:$0xff] }
  0x9d   : > { %2591 = vmatprep.subr.bf16.mxu1 %v2590_v10  ;;  %v1003_v10 = vld [vmem:[%s3447_s5 + $0x18a8] sm:$0xff]  ;;  %v2624_v18 = vpack.c.bf16 %v303_v12, %v276_v7  ;;  %v628_v12 = vld [vmem:[%s3447_s5 + $0xcf0] sm:$0xff] }
  0x9e   : > { %2533 = vmatpush1.bf16.msra.mxu0 %v2532_v59  ;;  %v2606_v59 = vpack.c.bf16 %v950_v53, %v923_v52  ;;  %v2612_v17 = vpack.c.bf16 %v1003_v10, %v976_v9  ;;  %v493_v52 = vld [vmem:[%s3447_s5 + $0x8b8] sm:$0xff]  ;;  %v520_v53 = vld [vmem:[%s3447_s5 + $0x990] sm:$0xff] }
  0x9f   : > { %2535 = vmatprep.subr.bf16.mxu0 %v2534_v1  ;;  %v977_v1 = vld [vmem:[%s3447_s5 + $0x17d8] sm:$0xff]  ;;  %v2638_v60 = vpack.c.bf16 %v520_v53, %v493_v52  ;;  %v468_v10 = vld [vmem:[%s3447_s5 + $0x7f0] sm:$0xff]  ;;  %v762_v52 = vld [vmem:[%s3447_s5 + $0x1120] sm:$0xff] }
  0xa0   : > { %2593 = vmatpush1.bf16.msra.mxu1 %v2592_v19  ;;  %v330_v19 = vld [vmem:[%s3447_s5 + $0x3a0] sm:$0xff]  ;;  %v441_v9 = vld [vmem:[%s3447_s5 + $0x718] sm:$0xff] }
  0xa1   : > { %2595 = vmatprep.subr.bf16.mxu1 %v2594_v22  ;;  %v1057_v22 = vld [vmem:[%s3447_s5 + $0x1a58] sm:$0xff]  ;;  %v2628_v30 = vpack.c.bf16 %v357_v24, %v330_v19  ;;  %v2698_v16 = vpack.c.bf16 %v468_v10, %v441_v9  ;;  %v682_v24 = vld [vmem:[%s3447_s5 + $0xea0] sm:$0xff] }
  0xa2   : > { %2537 = vmatpush1.bf16.msra.mxu0 %v2536_v8  ;;  %v2610_v8 = vpack.c.bf16 %v1004_v2, %v977_v1  ;;  %v2616_v29 = vpack.c.bf16 %v1057_v22, %v1030_v21  ;;  %v495_v21 = vld [vmem:[%s3447_s5 + $0x8c8] sm:$0xff]  ;;  %v522_v22 = vld [vmem:[%s3447_s5 + $0x9a0] sm:$0xff] }
  0xa3   : > { %2539 = vmatprep.subr.bf16.mxu0 %v2538_v13  ;;  %v1031_v13 = vld [vmem:[%s3447_s5 + $0x1988] sm:$0xff]  ;;  %v2702_v28 = vpack.c.bf16 %v522_v22, %v495_v21 }
  0xa4   : > { %2597 = vmatpush1.bf16.msra.mxu1 %v2596_v31  ;;  %v384_v31 = vld [vmem:[%s3447_s5 + $0x550] sm:$0xff] }
  0xa5   : > { %2599 = vmatprep.subr.bf16.mxu1 %v2598_v34  ;;  %v251_v34 = vld [vmem:[%s3447_s5 + $0x128] sm:$0xff]  ;;  %v2632_v43 = vpack.c.bf16 %v411_v36, %v384_v31  ;;  %v736_v36 = vld [vmem:[%s3447_s5 + $0x1050] sm:$0xff] }
  0xa6   : > { %2541 = vmatpush1.bf16.msra.mxu0 %v2540_v20  ;;  %v2614_v20 = vpack.c.bf16 %v1058_v14, %v1031_v13  ;;  %v2684_v42 = vpack.c.bf16 %v251_v34, %v224_v33  ;;  %v549_v33 = vld [vmem:[%s3447_s5 + $0xa78] sm:$0xff]  ;;  %v576_v34 = vld [vmem:[%s3447_s5 + $0xb50] sm:$0xff] }
  0xa7   : > { %2543 = vmatprep.subr.bf16.mxu0 %v2542_v25  ;;  %v225_v25 = vld [vmem:[%s3447_s5 + $0x58] sm:$0xff]  ;;  %v2706_v41 = vpack.c.bf16 %v576_v34, %v549_v33 }
  0xa8   : > { %2601 = vmatpush1.bf16.msra.mxu1 %v2600_v44  ;;  %v438_v44 = vld [vmem:[%s3447_s5 + $0x700] sm:$0xff] }
  0xa9   : > { %2603 = vmatprep.subr.bf16.mxu1 %v2602_v47  ;;  %v305_v47 = vld [vmem:[%s3447_s5 + $0x2d8] sm:$0xff]  ;;  %v2636_v55 = vpack.c.bf16 %v465_v49, %v438_v44  ;;  %v790_v49 = vld [vmem:[%s3447_s5 + $0x1200] sm:$0xff] }
  0xaa   : > { %2545 = vmatpush1.bf16.msra.mxu0 %v2544_v32  ;;  %v2682_v32 = vpack.c.bf16 %v252_v26, %v225_v25  ;;  %v2688_v54 = vpack.c.bf16 %v305_v47, %v278_v46  ;;  %v603_v46 = vld [vmem:[%s3447_s5 + $0xc28] sm:$0xff]  ;;  %v630_v47 = vld [vmem:[%s3447_s5 + $0xd00] sm:$0xff] }
  0xab   : > { %2547 = vmatprep.subr.bf16.mxu0 %v2546_v37  ;;  %v279_v37 = vld [vmem:[%s3447_s5 + $0x208] sm:$0xff]  ;;  %v2710_v53 = vpack.c.bf16 %v630_v47, %v603_v46 }
  0xac   : > { %2605 = vmatpush1.bf16.msra.mxu1 %v2604_v56  ;;  %v492_v56 = vld [vmem:[%s3447_s5 + $0x8b0] sm:$0xff] }
  0xad   : > { %2607 = vmatprep.subr.bf16.mxu1 %v2606_v59  ;;  %v359_v59 = vld [vmem:[%s3447_s5 + $0x488] sm:$0xff]  ;;  %v2640_v2 = vpack.c.bf16 %v519_v61, %v492_v56  ;;  %v844_v61 = vld [vmem:[%s3447_s5 + $0x13b0] sm:$0xff] }
  0xae   : > { %2549 = vmatpush1.bf16.msra.mxu0 %v2548_v45  ;;  %v2686_v45 = vpack.c.bf16 %v306_v39, %v279_v37  ;;  %v2692_v1 = vpack.c.bf16 %v359_v59, %v332_v58  ;;  %v657_v58 = vld [vmem:[%s3447_s5 + $0xdd8] sm:$0xff]  ;;  %v684_v59 = vld [vmem:[%s3447_s5 + $0xeb0] sm:$0xff] }
  0xaf   : > { %2551 = vmatprep.subr.bf16.mxu0 %v2550_v50  ;;  %v333_v50 = vld [vmem:[%s3447_s5 + $0x3b8] sm:$0xff] }
  0xb0   : > { %2609 = vmatpush1.bf16.msra.mxu1 %v2608_v5  ;;  %v386_v5 = vld [vmem:[%s3447_s5 + $0x560] sm:$0xff] }
  0xb1   : > { %2611 = vmatprep.subr.bf16.mxu1 %v2610_v8  ;;  %v573_v8 = vld [vmem:[%s3447_s5 + $0xb38] sm:$0xff] }
  0xb2   : > { %2553 = vmatpush1.bf16.msra.mxu0 %v2552_v57  ;;  %v2690_v57 = vpack.c.bf16 %v360_v51, %v333_v50  ;;  %v2644_v14 = vpack.c.bf16 %v573_v8, %v546_v3  ;;  %v898_v8 = vld [vmem:[%s3447_s5 + $0x1560] sm:$0xff] }
  0xb3   : > { %2619 = vmatprep.subr.bf16.mxu0 %v2618_v63  ;;  %v414_v63 = vld [vmem:[%s3447_s5 + $0x640] sm:$0xff] }
  0xb4   : > { %2613 = vmatpush1.bf16.msra.mxu1 %v2612_v17  ;;  %v440_v17 = vld [vmem:[%s3447_s5 + $0x710] sm:$0xff] }
  0xb5   : > { %1428 = vmatmul.mubr.f32.vlgmr.msra.gmra.mrb[2].mxu0 %v3591_v62  ;;  %2615 = vmatprep.subr.bf16.mxu1 %v2614_v20  ;;  %v627_v20 = vld [vmem:[%s3447_s5 + $0xce8] sm:$0xff] }
  0xb6   : > { %2621 = vmatpush1.bf16.msra.mxu0 %v2620_v6  ;;  %1569 = vmatprep.mubr.f32.mxu0 %v3526_v38  ;;  %v413_v6 = vld [vmem:[%s3447_s5 + $0x638] sm:$0xff]  ;;  %v2648_v26 = vpack.c.bf16 %v627_v20, %v600_v15  ;;  %v952_v20 = vld [vmem:[%s3447_s5 + $0x1710] sm:$0xff] }
  0xb7   : > { %2623 = vmatprep.subr.bf16.mxu0 %v2622_v11  ;;  %v601_v11 = vld [vmem:[%s3447_s5 + $0xc18] sm:$0xff]  ;;  %v2696_v13 = vpack.c.bf16 %v413_v6, %v386_v5  ;;  %v711_v5 = vld [vmem:[%s3447_s5 + $0xf88] sm:$0xff]  ;;  %v738_v6 = vld [vmem:[%s3447_s5 + $0x1060] sm:$0xff] }
  0xb8   : > { %2617 = vmatpush1.bf16.msra.mxu1 %v2616_v29  ;;  %v2646_v19 = vpack.c.bf16 %v628_v12, %v601_v11  ;;  %v494_v29 = vld [vmem:[%s3447_s5 + $0x8c0] sm:$0xff]  ;;  %v2718_v12 = vpack.c.bf16 %v738_v6, %v711_v5 }
  0xb9   : > { %2683 = vmatprep.subr.bf16.mxu1 %v2682_v32  ;;  %v681_v32 = vld [vmem:[%s3447_s5 + $0xe98] sm:$0xff]  ;;  %v870_v11 = vld [vmem:[%s3447_s5 + $0x1480] sm:$0xff] }
  0xba   : > { %2625 = vmatpush1.bf16.msra.mxu0 %v2624_v18  ;;  %v467_v18 = vld [vmem:[%s3447_s5 + $0x7e8] sm:$0xff]  ;;  %v2652_v39 = vpack.c.bf16 %v681_v32, %v654_v27  ;;  %v1006_v32 = vld [vmem:[%s3447_s5 + $0x18c0] sm:$0xff] }
  0xbb   : > { %2627 = vmatprep.subr.bf16.mxu0 %v2626_v23  ;;  %1499 = vmatmul.mubr.f32.vlgmr.msra.gmra.mrb[2].mxu1 %v3591_v62  ;;  %v387_v62 = vld [vmem:[%s3447_s5 + $0x568] sm:$0xff]  ;;  %v2700_v25 = vpack.c.bf16 %v467_v18, %v440_v17  ;;  %v765_v17 = vld [vmem:[%s3447_s5 + $0x1138] sm:$0xff]  ;;  %v792_v18 = vld [vmem:[%s3447_s5 + $0x1210] sm:$0xff] }
  0xbc   : > { %2685 = vmatpush1.bf16.msra.mxu1 %v2684_v42  ;;  %1640 = vmatprep.mubr.f32.mxu1 %v3526_v38  ;;  %v574_v38 = vld [vmem:[%s3447_s5 + $0xb40] sm:$0xff]  ;;  %v2694_v4 = vpack.c.bf16 %v414_v63, %v387_v62  ;;  %v655_v23 = vld [vmem:[%s3447_s5 + $0xdc8] sm:$0xff]  ;;  %v548_v42 = vld [vmem:[%s3447_s5 + $0xa70] sm:$0xff] }
  0xbd   : > { %2687 = vmatprep.subr.bf16.mxu1 %v2686_v45  ;;  %v2642_v7 = vpack.c.bf16 %v574_v38, %v547_v0  ;;  %v2650_v31 = vpack.c.bf16 %v682_v24, %v655_v23  ;;  %v735_v45 = vld [vmem:[%s3447_s5 + $0x1048] sm:$0xff]  ;;  %v816_v0 = vld [vmem:[%s3447_s5 + $0x12d0] sm:$0xff]  ;;  %v2714_v38 = vpack.c.bf16 %v684_v59, %v657_v58  ;;  %v2722_v24 = vpack.c.bf16 %v792_v18, %v765_v17  ;;  %v3868_v17 = vld [vmem:[%s4514_s0] sm:$0xff] }
  0xbe   : > { %2629 = vmatpush1.bf16.msra.mxu0 %v2628_v30  ;;  %v521_v30 = vld [vmem:[%s3447_s5 + $0x998] sm:$0xff]  ;;  %v2656_v51 = vpack.c.bf16 %v735_v45, %v708_v40  ;;  %v924_v23 = vld [vmem:[%s3447_s5 + $0x1630] sm:$0xff] }
  0xbf   : > { %2631 = vmatprep.subr.bf16.mxu0 %v2630_v35  ;;  %v709_v35 = vld [vmem:[%s3447_s5 + $0xf78] sm:$0xff]  ;;  %v2704_v37 = vpack.c.bf16 %v521_v30, %v494_v29  ;;  %v819_v29 = vld [vmem:[%s3447_s5 + $0x12e8] sm:$0xff]  ;;  %v846_v30 = vld [vmem:[%s3447_s5 + $0x13c0] sm:$0xff] }
  0xc0   : > { %2689 = vmatpush1.bf16.msra.mxu1 %v2688_v54  ;;  %v2654_v44 = vpack.c.bf16 %v736_v36, %v709_v35  ;;  %v602_v54 = vld [vmem:[%s3447_s5 + $0xc20] sm:$0xff]  ;;  %v2726_v36 = vpack.c.bf16 %v846_v30, %v819_v29  ;;  %v1060_v45 = vld [vmem:[%s3447_s5 + $0x1a70] sm:$0xff]  ;;  %v389_v29 = vld [vmem:[%s3447_s5 + $0x578] sm:$0xff] }
  0xc1   : > { %2691 = vmatprep.subr.bf16.mxu1 %v2690_v57  ;;  %v789_v57 = vld [vmem:[%s3447_s5 + $0x11f8] sm:$0xff]  ;;  %v978_v35 = vld [vmem:[%s3447_s5 + $0x17e0] sm:$0xff]  ;;  %v416_v30 = vld [vmem:[%s3447_s5 + $0x650] sm:$0xff] }
  0xc2   : > { %2633 = vmatpush1.bf16.msra.mxu0 %v2632_v43  ;;  %v575_v43 = vld [vmem:[%s3447_s5 + $0xb48] sm:$0xff]  ;;  %v2660_v63 = vpack.c.bf16 %v789_v57, %v762_v52  ;;  %v254_v57 = vld [vmem:[%s3447_s5 + $0x140] sm:$0xff] }
  0xc3   : > { %2635 = vmatprep.subr.bf16.mxu0 %v2634_v48  ;;  %v763_v48 = vld [vmem:[%s3447_s5 + $0x1128] sm:$0xff]  ;;  %v2708_v50 = vpack.c.bf16 %v575_v43, %v548_v42  ;;  %v873_v42 = vld [vmem:[%s3447_s5 + $0x1498] sm:$0xff]  ;;  %v900_v43 = vld [vmem:[%s3447_s5 + $0x1570] sm:$0xff] }
  0xc4   : > { %2693 = vmatpush1.bf16.msra.mxu1 %v2692_v1  ;;  %v2658_v56 = vpack.c.bf16 %v790_v49, %v763_v48  ;;  %v656_v1 = vld [vmem:[%s3447_s5 + $0xdd0] sm:$0xff]  ;;  %v2730_v49 = vpack.c.bf16 %v900_v43, %v873_v42  ;;  %v443_v42 = vld [vmem:[%s3447_s5 + $0x728] sm:$0xff]  ;;  %v470_v43 = vld [vmem:[%s3447_s5 + $0x800] sm:$0xff] }
  0xc5   : > { %2695 = vmatprep.subr.bf16.mxu1 %v2694_v4  ;;  %v843_v4 = vld [vmem:[%s3447_s5 + $0x13a8] sm:$0xff]  ;;  %v1032_v48 = vld [vmem:[%s3447_s5 + $0x1990] sm:$0xff] }
  0xc6   : > { %2637 = vmatpush1.bf16.msra.mxu0 %v2636_v55  ;;  %v629_v55 = vld [vmem:[%s3447_s5 + $0xcf8] sm:$0xff]  ;;  %v2664_v10 = vpack.c.bf16 %v843_v4, %v816_v0  ;;  %v308_v4 = vld [vmem:[%s3447_s5 + $0x2f0] sm:$0xff] }
  0xc7   : > { %2639 = vmatprep.subr.bf16.mxu0 %v2638_v60  ;;  %v817_v60 = vld [vmem:[%s3447_s5 + $0x12d8] sm:$0xff]  ;;  %v2712_v62 = vpack.c.bf16 %v629_v55, %v602_v54  ;;  %v927_v54 = vld [vmem:[%s3447_s5 + $0x1648] sm:$0xff]  ;;  %v954_v55 = vld [vmem:[%s3447_s5 + $0x1720] sm:$0xff] }
  0xc8   : > { %2697 = vmatpush1.bf16.msra.mxu1 %v2696_v13  ;;  %v2662_v3 = vpack.c.bf16 %v844_v61, %v817_v60  ;;  %v710_v13 = vld [vmem:[%s3447_s5 + $0xf80] sm:$0xff]  ;;  %v2734_v61 = vpack.c.bf16 %v954_v55, %v927_v54  ;;  %v497_v54 = vld [vmem:[%s3447_s5 + $0x8d8] sm:$0xff]  ;;  %v524_v55 = vld [vmem:[%s3447_s5 + $0x9b0] sm:$0xff] }
  0xc9   : > { %2699 = vmatprep.subr.bf16.mxu1 %v2698_v16  ;;  %v897_v16 = vld [vmem:[%s3447_s5 + $0x1558] sm:$0xff]  ;;  %v226_v60 = vld [vmem:[%s3447_s5 + $0x60] sm:$0xff] }
  0xca   : > { %2641 = vmatpush1.bf16.msra.mxu0 %v2640_v2  ;;  %v683_v2 = vld [vmem:[%s3447_s5 + $0xea8] sm:$0xff]  ;;  %v2668_v22 = vpack.c.bf16 %v897_v16, %v870_v11  ;;  %v362_v16 = vld [vmem:[%s3447_s5 + $0x4a0] sm:$0xff] }
  0xcb   : > { %2643 = vmatprep.subr.bf16.mxu0 %v2642_v7  ;;  %v871_v7 = vld [vmem:[%s3447_s5 + $0x1488] sm:$0xff]  ;;  %v2716_v9 = vpack.c.bf16 %v683_v2, %v656_v1  ;;  %v981_v1 = vld [vmem:[%s3447_s5 + $0x17f8] sm:$0xff]  ;;  %v1008_v2 = vld [vmem:[%s3447_s5 + $0x18d0] sm:$0xff] }
  0xcc   : > { %2701 = vmatpush1.bf16.msra.mxu1 %v2700_v25  ;;  %v2666_v15 = vpack.c.bf16 %v898_v8, %v871_v7  ;;  %v764_v25 = vld [vmem:[%s3447_s5 + $0x1130] sm:$0xff]  ;;  %v2738_v8 = vpack.c.bf16 %v1008_v2, %v981_v1  ;;  %v551_v1 = vld [vmem:[%s3447_s5 + $0xa88] sm:$0xff]  ;;  %v578_v2 = vld [vmem:[%s3447_s5 + $0xb60] sm:$0xff] }
  0xcd   : > { %2703 = vmatprep.subr.bf16.mxu1 %v2702_v28  ;;  %v951_v28 = vld [vmem:[%s3447_s5 + $0x1708] sm:$0xff]  ;;  %v280_v7 = vld [vmem:[%s3447_s5 + $0x210] sm:$0xff] }
  0xce   : > { %2645 = vmatpush1.bf16.msra.mxu0 %v2644_v14  ;;  %v737_v14 = vld [vmem:[%s3447_s5 + $0x1058] sm:$0xff]  ;;  %v2672_v34 = vpack.c.bf16 %v951_v28, %v924_v23  ;;  %v3880_v28 = vld [vmem:[%s4514_s0 + $0x8] sm:$0xff] }
  0xcf   : > { %2647 = vmatprep.subr.bf16.mxu0 %v2646_v19  ;;  %v925_v19 = vld [vmem:[%s3447_s5 + $0x1638] sm:$0xff]  ;;  %v2720_v21 = vpack.c.bf16 %v737_v14, %v710_v13  ;;  %v1035_v13 = vld [vmem:[%s3447_s5 + $0x19a8] sm:$0xff]  ;;  %v1062_v14 = vld [vmem:[%s3447_s5 + $0x1a80] sm:$0xff] }
  0xd0   : > { %2705 = vmatpush1.bf16.msra.mxu1 %v2704_v37  ;;  %v2670_v27 = vpack.c.bf16 %v952_v20, %v925_v19  ;;  %v818_v37 = vld [vmem:[%s3447_s5 + $0x12e0] sm:$0xff]  ;;  %v1061_v23 = vld [vmem:[%s3447_s5 + $0x1a78] sm:$0xff] }
  0xd1   : > { %2707 = vmatprep.subr.bf16.mxu1 %v2706_v41  ;;  %v1005_v41 = vld [vmem:[%s3447_s5 + $0x18b8] sm:$0xff]  ;;  %v334_v20 = vld [vmem:[%s3447_s5 + $0x3c0] sm:$0xff] }
  0xd2   : > { %2649 = vmatpush1.bf16.msra.mxu0 %v2648_v26  ;;  %v791_v26 = vld [vmem:[%s3447_s5 + $0x1208] sm:$0xff]  ;;  %v2676_v47 = vpack.c.bf16 %v1005_v41, %v978_v35  ;;  %v228_v35 = vld [vmem:[%s3447_s5 + $0x70] sm:$0xff]  ;;  %v310_v41 = vld [vmem:[%s3447_s5 + $0x300] sm:$0xff] }
  0xd3   : > { %2651 = vmatprep.subr.bf16.mxu0 %v2650_v31  ;;  %v979_v31 = vld [vmem:[%s3447_s5 + $0x17e8] sm:$0xff]  ;;  %v2724_v33 = vpack.c.bf16 %v791_v26, %v764_v25  ;;  %v361_v25 = vld [vmem:[%s3447_s5 + $0x498] sm:$0xff] }
  0xd4   : > { %2709 = vmatpush1.bf16.msra.mxu1 %v2708_v50  ;;  %v2674_v40 = vpack.c.bf16 %v1006_v32, %v979_v31  ;;  %v872_v50 = vld [vmem:[%s3447_s5 + $0x1490] sm:$0xff]  ;;  %v229_v26 = vld [vmem:[%s3447_s5 + $0x78] sm:$0xff]  ;;  %v2756_v32 = vpack.c.bf16 %v361_v25, %v334_v20  ;;  %v526_v25 = vld [vmem:[%s3447_s5 + $0x9c0] sm:$0xff] }
  0xd5   : > { %2711 = vmatprep.subr.bf16.mxu1 %v2710_v53  ;;  %v1059_v53 = vld [vmem:[%s3447_s5 + $0x1a68] sm:$0xff]  ;;  %v444_v20 = vld [vmem:[%s3447_s5 + $0x730] sm:$0xff] }
  0xd6   : > { %2653 = vmatpush1.bf16.msra.mxu0 %v2652_v39  ;;  %v845_v39 = vld [vmem:[%s3447_s5 + $0x13b8] sm:$0xff]  ;;  %v2680_v59 = vpack.c.bf16 %v1059_v53, %v1032_v48  ;;  %v282_v48 = vld [vmem:[%s3447_s5 + $0x220] sm:$0xff]  ;;  %v364_v53 = vld [vmem:[%s3447_s5 + $0x4b0] sm:$0xff] }
  0xd7   : > { %2655 = vmatprep.subr.bf16.mxu0 %v2654_v44  ;;  %v1033_v44 = vld [vmem:[%s3447_s5 + $0x1998] sm:$0xff]  ;;  %v2728_v46 = vpack.c.bf16 %v845_v39, %v818_v37  ;;  %v2758_v37 = vpack.c.bf16 %v416_v30, %v389_v29  ;;  %v415_v39 = vld [vmem:[%s3447_s5 + $0x648] sm:$0xff] }
  0xd8   : > { %2713 = vmatpush1.bf16.msra.mxu1 %v2712_v62  ;;  %v2678_v52 = vpack.c.bf16 %v1060_v45, %v1033_v44  ;;  %v926_v62 = vld [vmem:[%s3447_s5 + $0x1640] sm:$0xff] }
  0xd9   : > { %2715 = vmatprep.subr.bf16.mxu1 %v2714_v38  ;;  %v253_v38 = vld [vmem:[%s3447_s5 + $0x138] sm:$0xff] }
  0xda   : > { %2657 = vmatpush1.bf16.msra.mxu0 %v2656_v51  ;;  %v899_v51 = vld [vmem:[%s3447_s5 + $0x1568] sm:$0xff]  ;;  %v2748_v6 = vpack.c.bf16 %v253_v38, %v226_v60  ;;  %v336_v60 = vld [vmem:[%s3447_s5 + $0x3d0] sm:$0xff]  ;;  %v418_v38 = vld [vmem:[%s3447_s5 + $0x660] sm:$0xff] }
  0xdb   : > { %2659 = vmatprep.subr.bf16.mxu0 %v2658_v56  ;;  %v227_v56 = vld [vmem:[%s3447_s5 + $0x68] sm:$0xff]  ;;  %v2732_v58 = vpack.c.bf16 %v899_v51, %v872_v50  ;;  %v2762_v50 = vpack.c.bf16 %v470_v43, %v443_v42  ;;  %v469_v51 = vld [vmem:[%s3447_s5 + $0x7f8] sm:$0xff] }
  0xdc   : > { %2717 = vmatpush1.bf16.msra.mxu1 %v2716_v9  ;;  %v2746_v0 = vpack.c.bf16 %v254_v57, %v227_v56  ;;  %v980_v9 = vld [vmem:[%s3447_s5 + $0x17f0] sm:$0xff] }
  0xdd   : > { %2719 = vmatprep.subr.bf16.mxu1 %v2718_v12  ;;  %v307_v12 = vld [vmem:[%s3447_s5 + $0x2e8] sm:$0xff] }
  0xde   : > { %2661 = vmatpush1.bf16.msra.mxu0 %v2660_v63  ;;  %v953_v63 = vld [vmem:[%s3447_s5 + $0x1718] sm:$0xff]  ;;  %v2752_v19 = vpack.c.bf16 %v307_v12, %v280_v7  ;;  %v390_v7 = vld [vmem:[%s3447_s5 + $0x580] sm:$0xff]  ;;  %v472_v12 = vld [vmem:[%s3447_s5 + $0x810] sm:$0xff] }
  0xdf   : > { %2663 = vmatprep.subr.bf16.mxu0 %v2662_v3  ;;  %v281_v3 = vld [vmem:[%s3447_s5 + $0x218] sm:$0xff]  ;;  %v2736_v5 = vpack.c.bf16 %v953_v63, %v926_v62  ;;  %v2766_v62 = vpack.c.bf16 %v524_v55, %v497_v54  ;;  %v523_v63 = vld [vmem:[%s3447_s5 + $0x9a8] sm:$0xff] }
  0xe0   : > { %2721 = vmatpush1.bf16.msra.mxu1 %v2720_v21  ;;  %v2750_v11 = vpack.c.bf16 %v308_v4, %v281_v3  ;;  %v2742_v21 = vpack.c.bf16 %v1062_v14, %v1035_v13  ;;  %v605_v13 = vld [vmem:[%s3447_s5 + $0xc38] sm:$0xff]  ;;  %v632_v14 = vld [vmem:[%s3447_s5 + $0xd10] sm:$0xff] }
  0xe1   : > { %2723 = vmatprep.subr.bf16.mxu1 %v2722_v24 }
  0xe2   : > { %2665 = vmatpush1.bf16.msra.mxu0 %v2664_v10  ;;  %v1007_v10 = vld [vmem:[%s3447_s5 + $0x18c8] sm:$0xff] }
  0xe3   : > { %2667 = vmatprep.subr.bf16.mxu0 %v2666_v15  ;;  %v335_v15 = vld [vmem:[%s3447_s5 + $0x3c8] sm:$0xff]  ;;  %v2740_v18 = vpack.c.bf16 %v1007_v10, %v980_v9  ;;  %v2770_v9 = vpack.c.bf16 %v578_v2, %v551_v1  ;;  %v577_v10 = vld [vmem:[%s3447_s5 + $0xb58] sm:$0xff] }
  0xe4   : > { %2725 = vmatpush1.bf16.msra.mxu1 %v2724_v33  ;;  %v2754_v24 = vpack.c.bf16 %v362_v16, %v335_v15  ;;  %v388_v33 = vld [vmem:[%s3447_s5 + $0x570] sm:$0xff] }
  0xe5   : > { %2727 = vmatprep.subr.bf16.mxu1 %v2726_v36  ;;  %v255_v36 = vld [vmem:[%s3447_s5 + $0x148] sm:$0xff]  ;;  %v2760_v45 = vpack.c.bf16 %v415_v39, %v388_v33  ;;  %v498_v33 = vld [vmem:[%s3447_s5 + $0x8e0] sm:$0xff]  ;;  %v580_v39 = vld [vmem:[%s3447_s5 + $0xb70] sm:$0xff] }
  0xe6   : > { %2669 = vmatpush1.bf16.msra.mxu0 %v2668_v22  ;;  %v1034_v22 = vld [vmem:[%s3447_s5 + $0x19a0] sm:$0xff]  ;;  %v2812_v44 = vpack.c.bf16 %v255_v36, %v228_v35  ;;  %v685_v36 = vld [vmem:[%s3447_s5 + $0xeb8] sm:$0xff] }
  0xe7   : > { %2671 = vmatprep.subr.bf16.mxu0 %v2670_v27  ;;  %v256_v27 = vld [vmem:[%s3447_s5 + $0x150] sm:$0xff]  ;;  %v2744_v31 = vpack.c.bf16 %v1061_v23, %v1034_v22  ;;  %v2774_v22 = vpack.c.bf16 %v632_v14, %v605_v13  ;;  %v631_v23 = vld [vmem:[%s3447_s5 + $0xd08] sm:$0xff] }
  0xe8   : > { %2729 = vmatpush1.bf16.msra.mxu1 %v2728_v46  ;;  %v442_v46 = vld [vmem:[%s3447_s5 + $0x720] sm:$0xff] }
  0xe9   : > { %2731 = vmatprep.subr.bf16.mxu1 %v2730_v49  ;;  %v309_v49 = vld [vmem:[%s3447_s5 + $0x2f8] sm:$0xff]  ;;  %v2764_v57 = vpack.c.bf16 %v469_v51, %v442_v46  ;;  %v552_v46 = vld [vmem:[%s3447_s5 + $0xa90] sm:$0xff]  ;;  %v634_v51 = vld [vmem:[%s3447_s5 + $0xd20] sm:$0xff] }
  0xea   : > { %2673 = vmatpush1.bf16.msra.mxu0 %v2672_v34  ;;  %v2810_v34 = vpack.c.bf16 %v256_v27, %v229_v26  ;;  %v2816_v56 = vpack.c.bf16 %v309_v49, %v282_v48  ;;  %v659_v26 = vld [vmem:[%s3447_s5 + $0xde8] sm:$0xff]  ;;  %v686_v27 = vld [vmem:[%s3447_s5 + $0xec0] sm:$0xff] }
  0xeb   : > { %2675 = vmatprep.subr.bf16.mxu0 %v2674_v40  ;;  %v283_v40 = vld [vmem:[%s3447_s5 + $0x228] sm:$0xff]  ;;  %v2778_v35 = vpack.c.bf16 %v686_v27, %v659_v26 }
  0xec   : > { %2733 = vmatpush1.bf16.msra.mxu1 %v2732_v58  ;;  %v496_v58 = vld [vmem:[%s3447_s5 + $0x8d0] sm:$0xff]  ;;  %v739_v49 = vld [vmem:[%s3447_s5 + $0x1068] sm:$0xff] }
  0xed   : > { %2735 = vmatprep.subr.bf16.mxu1 %v2734_v61  ;;  %v363_v61 = vld [vmem:[%s3447_s5 + $0x4a8] sm:$0xff]  ;;  %v2768_v4 = vpack.c.bf16 %v523_v63, %v496_v58  ;;  %v606_v58 = vld [vmem:[%s3447_s5 + $0xc40] sm:$0xff]  ;;  %v688_v63 = vld [vmem:[%s3447_s5 + $0xed0] sm:$0xff] }
  0xee   : > { %2677 = vmatpush1.bf16.msra.mxu0 %v2676_v47  ;;  %v2814_v47 = vpack.c.bf16 %v310_v41, %v283_v40  ;;  %v2820_v3 = vpack.c.bf16 %v363_v61, %v336_v60  ;;  %v713_v40 = vld [vmem:[%s3447_s5 + $0xf98] sm:$0xff]  ;;  %v740_v41 = vld [vmem:[%s3447_s5 + $0x1070] sm:$0xff] }
  0xef   : > { %2679 = vmatprep.subr.bf16.mxu0 %v2678_v52  ;;  %v337_v52 = vld [vmem:[%s3447_s5 + $0x3d8] sm:$0xff]  ;;  %v2782_v48 = vpack.c.bf16 %v740_v41, %v713_v40 }
  0xf0   : > { %2737 = vmatpush1.bf16.msra.mxu1 %v2736_v5  ;;  %v550_v5 = vld [vmem:[%s3447_s5 + $0xa80] sm:$0xff]  ;;  %v793_v61 = vld [vmem:[%s3447_s5 + $0x1218] sm:$0xff] }
  0xf1   : > { %2739 = vmatprep.subr.bf16.mxu1 %v2738_v8  ;;  %v417_v8 = vld [vmem:[%s3447_s5 + $0x658] sm:$0xff]  ;;  %v2772_v16 = vpack.c.bf16 %v577_v10, %v550_v5  ;;  %v660_v5 = vld [vmem:[%s3447_s5 + $0xdf0] sm:$0xff]  ;;  %v742_v10 = vld [vmem:[%s3447_s5 + $0x1080] sm:$0xff] }
  0xf2   : > { %2681 = vmatpush1.bf16.msra.mxu0 %v2680_v59  ;;  %v2818_v59 = vpack.c.bf16 %v364_v53, %v337_v52  ;;  %v2824_v15 = vpack.c.bf16 %v417_v8, %v390_v7  ;;  %v767_v52 = vld [vmem:[%s3447_s5 + $0x1148] sm:$0xff]  ;;  %v794_v53 = vld [vmem:[%s3447_s5 + $0x1220] sm:$0xff] }
  0xf3   : > { %2747 = vmatprep.subr.bf16.mxu0 %v2746_v0  ;;  %v391_v0 = vld [vmem:[%s3447_s5 + $0x588] sm:$0xff]  ;;  %v2786_v60 = vpack.c.bf16 %v794_v53, %v767_v52 }
  0xf4   : > { %2741 = vmatpush1.bf16.msra.mxu1 %v2740_v18  ;;  %v604_v18 = vld [vmem:[%s3447_s5 + $0xc30] sm:$0xff]  ;;  %v847_v8 = vld [vmem:[%s3447_s5 + $0x13c8] sm:$0xff] }
  0xf5   : > { %1570 = vmatmul.mubr.f32.vlgmr.msra.gmra.mrb[4].mxu0 %v3868_v17  ;;  %2743 = vmatprep.subr.bf16.mxu1 %v2742_v21  ;;  %v471_v21 = vld [vmem:[%s3447_s5 + $0x808] sm:$0xff]  ;;  %v2776_v30 = vpack.c.bf16 %v631_v23, %v604_v18  ;;  %v714_v18 = vld [vmem:[%s3447_s5 + $0xfa0] sm:$0xff]  ;;  %v796_v23 = vld [vmem:[%s3447_s5 + $0x1230] sm:$0xff] }
  0xf6   : > { %2749 = vmatpush1.bf16.msra.mxu0 %v2748_v6  ;;  %1711 = vmatprep.mubr.f32.mxu0 %v3880_v28  ;;  %v2822_v6 = vpack.c.bf16 %v418_v38, %v391_v0  ;;  %v2828_v29 = vpack.c.bf16 %v471_v21, %v444_v20  ;;  %v821_v0 = vld [vmem:[%s3447_s5 + $0x12f8] sm:$0xff]  ;;  %v848_v38 = vld [vmem:[%s3447_s5 + $0x13d0] sm:$0xff] }
  0xf7   : > { %2751 = vmatprep.subr.bf16.mxu0 %v2750_v11  ;;  %v445_v11 = vld [vmem:[%s3447_s5 + $0x738] sm:$0xff]  ;;  %v2790_v7 = vpack.c.bf16 %v848_v38, %v821_v0 }
  0xf8   : > { %2745 = vmatpush1.bf16.msra.mxu1 %v2744_v31  ;;  %v658_v31 = vld [vmem:[%s3447_s5 + $0xde0] sm:$0xff]  ;;  %v901_v21 = vld [vmem:[%s3447_s5 + $0x1578] sm:$0xff] }
  0xf9   : > { %2811 = vmatprep.subr.bf16.mxu1 %v2810_v34  ;;  %v525_v34 = vld [vmem:[%s3447_s5 + $0x9b8] sm:$0xff]  ;;  %v2780_v43 = vpack.c.bf16 %v685_v36, %v658_v31  ;;  %v768_v31 = vld [vmem:[%s3447_s5 + $0x1150] sm:$0xff]  ;;  %v850_v36 = vld [vmem:[%s3447_s5 + $0x13e0] sm:$0xff] }
  0xfa   : > { %2753 = vmatpush1.bf16.msra.mxu0 %v2752_v19  ;;  %v2826_v19 = vpack.c.bf16 %v472_v12, %v445_v11  ;;  %v2832_v42 = vpack.c.bf16 %v525_v34, %v498_v33  ;;  %v875_v11 = vld [vmem:[%s3447_s5 + $0x14a8] sm:$0xff]  ;;  %v902_v12 = vld [vmem:[%s3447_s5 + $0x1580] sm:$0xff] }
  0xfb   : > { %2755 = vmatprep.subr.bf16.mxu0 %v2754_v24  ;;  %1641 = vmatmul.mubr.f32.vlgmr.msra.gmra.mrb[4].mxu1 %v3868_v17  ;;  %v499_v24 = vld [vmem:[%s3447_s5 + $0x8e8] sm:$0xff]  ;;  %v2794_v20 = vpack.c.bf16 %v902_v12, %v875_v11 }
  0xfc   : > { %2813 = vmatpush1.bf16.msra.mxu1 %v2812_v44  ;;  %1782 = vmatprep.mubr.f32.mxu1 %v3880_v28  ;;  %v712_v44 = vld [vmem:[%s3447_s5 + $0xf90] sm:$0xff]  ;;  %v955_v34 = vld [vmem:[%s3447_s5 + $0x1728] sm:$0xff] }
  0xfd   : > { %2815 = vmatprep.subr.bf16.mxu1 %v2814_v47  ;;  %v579_v47 = vld [vmem:[%s3447_s5 + $0xb68] sm:$0xff]  ;;  %v2784_v55 = vpack.c.bf16 %v739_v49, %v712_v44  ;;  %v822_v44 = vld [vmem:[%s3447_s5 + $0x1300] sm:$0xff]  ;;  %v904_v49 = vld [vmem:[%s3447_s5 + $0x1590] sm:$0xff] }
  0xfe   : > { %2757 = vmatpush1.bf16.msra.mxu0 %v2756_v32  ;;  %v2830_v32 = vpack.c.bf16 %v526_v25, %v499_v24  ;;  %v2836_v54 = vpack.c.bf16 %v579_v47, %v552_v46  ;;  %v929_v24 = vld [vmem:[%s3447_s5 + $0x1658] sm:$0xff]  ;;  %v956_v25 = vld [vmem:[%s3447_s5 + $0x1730] sm:$0xff] }
  0xff   : > { %2759 = vmatprep.subr.bf16.mxu0 %v2758_v37  ;;  %v553_v37 = vld [vmem:[%s3447_s5 + $0xa98] sm:$0xff]  ;;  %v2798_v33 = vpack.c.bf16 %v956_v25, %v929_v24 }
 0x100   : > { %2817 = vmatpush1.bf16.msra.mxu1 %v2816_v56  ;;  %v766_v56 = vld [vmem:[%s3447_s5 + $0x1140] sm:$0xff]  ;;  %v1009_v47 = vld [vmem:[%s3447_s5 + $0x18d8] sm:$0xff] }
 0x101   : > { %2819 = vmatprep.subr.bf16.mxu1 %v2818_v59  ;;  %v633_v59 = vld [vmem:[%s3447_s5 + $0xd18] sm:$0xff]  ;;  %v2788_v2 = vpack.c.bf16 %v793_v61, %v766_v56  ;;  %v876_v56 = vld [vmem:[%s3447_s5 + $0x14b0] sm:$0xff]  ;;  %v958_v61 = vld [vmem:[%s3447_s5 + $0x1740] sm:$0xff] }
 0x102   : > { %2761 = vmatpush1.bf16.msra.mxu0 %v2760_v45  ;;  %v2834_v45 = vpack.c.bf16 %v580_v39, %v553_v37  ;;  %v2840_v1 = vpack.c.bf16 %v633_v59, %v606_v58  ;;  %v983_v37 = vld [vmem:[%s3447_s5 + $0x1808] sm:$0xff]  ;;  %v1010_v39 = vld [vmem:[%s3447_s5 + $0x18e0] sm:$0xff] }
 0x103   : > { %2763 = vmatprep.subr.bf16.mxu0 %v2762_v50  ;;  %v607_v50 = vld [vmem:[%s3447_s5 + $0xc48] sm:$0xff]  ;;  %v2802_v46 = vpack.c.bf16 %v1010_v39, %v983_v37  ;;  %v1086_v37 = vlaneseq }
 0x104   : > { %2821 = vmatpush1.bf16.msra.mxu1 %v2820_v3  ;;  %v820_v3 = vld [vmem:[%s3447_s5 + $0x12f0] sm:$0xff]  ;;  %v1063_v59 = vld [vmem:[%s3447_s5 + $0x1a88] sm:$0xff] }
 0x105   : > { %2823 = vmatprep.subr.bf16.mxu1 %v2822_v6  ;;  %v687_v6 = vld [vmem:[%s3447_s5 + $0xec8] sm:$0xff]  ;;  %v2792_v14 = vpack.c.bf16 %v847_v8, %v820_v3  ;;  %v930_v3 = vld [vmem:[%s3447_s5 + $0x1660] sm:$0xff]  ;;  %v1012_v8 = vld [vmem:[%s3447_s5 + $0x18f0] sm:$0xff] }
 0x106   : > { %2765 = vmatpush1.bf16.msra.mxu0 %v2764_v57  ;;  %v2838_v57 = vpack.c.bf16 %v634_v51, %v607_v50  ;;  %v2844_v13 = vpack.c.bf16 %v687_v6, %v660_v5  ;;  %v1037_v50 = vld [vmem:[%s3447_s5 + $0x19b8] sm:$0xff]  ;;  %v1064_v51 = vld [vmem:[%s3447_s5 + $0x1a90] sm:$0xff] }
 0x107   : > { %2767 = vmatprep.subr.bf16.mxu0 %v2766_v62  ;;  %v661_v62 = vld [vmem:[%s3447_s5 + $0xdf8] sm:$0xff]  ;;  %v2806_v58 = vpack.c.bf16 %v1064_v51, %v1037_v50  ;;  %v474_v50 = vld [vmem:[%s3447_s5 + $0x820] sm:$0xff]  ;;  %v4035_v51 = vshrl.u32 %v1086_v37, 7  ;;  %v475_v37 = vld [vmem:[%s3447_s5 + $0x828] sm:$0xff] }
 0x108   : > { %2825 = vmatpush1.bf16.msra.mxu1 %v2824_v15  ;;  %v874_v15 = vld [vmem:[%s3447_s5 + $0x14a0] sm:$0xff]  ;;  %v257_v6 = vld [vmem:[%s3447_s5 + $0x158] sm:$0xff] }
 0x109   : > { %2827 = vmatprep.subr.bf16.mxu1 %v2826_v19  ;;  %v741_v19 = vld [vmem:[%s3447_s5 + $0x1078] sm:$0xff]  ;;  %v2796_v27 = vpack.c.bf16 %v901_v21, %v874_v15  ;;  %v984_v15 = vld [vmem:[%s3447_s5 + $0x1810] sm:$0xff]  ;;  %v1066_v21 = vld [vmem:[%s3447_s5 + $0x1aa0] sm:$0xff] }
 0x10a   : > { %2769 = vmatpush1.bf16.msra.mxu0 %v2768_v4  ;;  %v2842_v4 = vpack.c.bf16 %v688_v63, %v661_v62  ;;  %v2848_v26 = vpack.c.bf16 %v741_v19, %v714_v18  ;;  %v231_v62 = vld [vmem:[%s3447_s5 + $0x88] sm:$0xff]  ;;  %v258_v63 = vld [vmem:[%s3447_s5 + $0x160] sm:$0xff] }
 0x10b   : > { %2771 = vmatprep.subr.bf16.mxu0 %v2770_v9  ;;  %v715_v9 = vld [vmem:[%s3447_s5 + $0xfa8] sm:$0xff]  ;;  %v2874_v5 = vpack.c.bf16 %v258_v63, %v231_v62  ;;  %v501_v62 = vld [vmem:[%s3447_s5 + $0x8f8] sm:$0xff]  ;;  %v528_v63 = vld [vmem:[%s3447_s5 + $0x9d0] sm:$0xff] }
 0x10c   : > { %2829 = vmatpush1.bf16.msra.mxu1 %v2828_v29  ;;  %v928_v29 = vld [vmem:[%s3447_s5 + $0x1650] sm:$0xff]  ;;  %v311_v19 = vld [vmem:[%s3447_s5 + $0x308] sm:$0xff] }
 0x10d   : > { %2831 = vmatprep.subr.bf16.mxu1 %v2830_v32  ;;  %v795_v32 = vld [vmem:[%s3447_s5 + $0x1228] sm:$0xff]  ;;  %v2800_v41 = vpack.c.bf16 %v955_v34, %v928_v29  ;;  %v1038_v29 = vld [vmem:[%s3447_s5 + $0x19c0] sm:$0xff]  ;;  %v260_v34 = vld [vmem:[%s3447_s5 + $0x170] sm:$0xff] }
 0x10e   : > { %2773 = vmatpush1.bf16.msra.mxu0 %v2772_v16  ;;  %v2846_v16 = vpack.c.bf16 %v742_v10, %v715_v9  ;;  %v2852_v40 = vpack.c.bf16 %v795_v32, %v768_v31  ;;  %v285_v9 = vld [vmem:[%s3447_s5 + $0x238] sm:$0xff]  ;;  %v312_v10 = vld [vmem:[%s3447_s5 + $0x310] sm:$0xff] }
 0x10f   : > { %2775 = vmatprep.subr.bf16.mxu0 %v2774_v22  ;;  %v769_v22 = vld [vmem:[%s3447_s5 + $0x1158] sm:$0xff]  ;;  %v2878_v18 = vpack.c.bf16 %v312_v10, %v285_v9  ;;  %v395_v9 = vld [vmem:[%s3447_s5 + $0x5a8] sm:$0xff]  ;;  %v422_v10 = vld [vmem:[%s3447_s5 + $0x680] sm:$0xff] }
 0x110   : > { %2833 = vmatpush1.bf16.msra.mxu1 %v2832_v42  ;;  %v982_v42 = vld [vmem:[%s3447_s5 + $0x1800] sm:$0xff]  ;;  %v365_v32 = vld [vmem:[%s3447_s5 + $0x4b8] sm:$0xff] }
 0x111   : > { %2835 = vmatprep.subr.bf16.mxu1 %v2834_v45  ;;  %v849_v45 = vld [vmem:[%s3447_s5 + $0x13d8] sm:$0xff]  ;;  %v2804_v53 = vpack.c.bf16 %v1009_v47, %v982_v42  ;;  %v287_v47 = vld [vmem:[%s3447_s5 + $0x248] sm:$0xff] }
 0x112   : > { %2777 = vmatpush1.bf16.msra.mxu0 %v2776_v30  ;;  %v2850_v30 = vpack.c.bf16 %v796_v23, %v769_v22  ;;  %v2856_v52 = vpack.c.bf16 %v849_v45, %v822_v44  ;;  %v339_v22 = vld [vmem:[%s3447_s5 + $0x3e8] sm:$0xff]  ;;  %v366_v23 = vld [vmem:[%s3447_s5 + $0x4c0] sm:$0xff] }
 0x113   : > { %2779 = vmatprep.subr.bf16.mxu0 %v2778_v35  ;;  %v823_v35 = vld [vmem:[%s3447_s5 + $0x1308] sm:$0xff]  ;;  %v2882_v31 = vpack.c.bf16 %v366_v23, %v339_v22  ;;  %v581_v22 = vld [vmem:[%s3447_s5 + $0xb78] sm:$0xff] }
 0x114   : > { %2837 = vmatpush1.bf16.msra.mxu1 %v2836_v54  ;;  %v1036_v54 = vld [vmem:[%s3447_s5 + $0x19b0] sm:$0xff]  ;;  %v259_v44 = vld [vmem:[%s3447_s5 + $0x168] sm:$0xff]  ;;  %v449_v23 = vld [vmem:[%s3447_s5 + $0x758] sm:$0xff] }
 0x115   : > { %2839 = vmatprep.subr.bf16.mxu1 %v2838_v57  ;;  %v903_v57 = vld [vmem:[%s3447_s5 + $0x1588] sm:$0xff]  ;;  %v2808_v38 = vpack.c.bf16 %v1063_v59, %v1036_v54  ;;  %v446_v54 = vld [vmem:[%s3447_s5 + $0x740] sm:$0xff]  ;;  %v473_v59 = vld [vmem:[%s3447_s5 + $0x818] sm:$0xff] }
 0x116   : > { %2781 = vmatpush1.bf16.msra.mxu0 %v2780_v43  ;;  %v2854_v43 = vpack.c.bf16 %v850_v36, %v823_v35  ;;  %v2860_v0 = vpack.c.bf16 %v903_v57, %v876_v56  ;;  %v393_v35 = vld [vmem:[%s3447_s5 + $0x598] sm:$0xff]  ;;  %v420_v36 = vld [vmem:[%s3447_s5 + $0x670] sm:$0xff]  ;;  %v286_v56 = vld [vmem:[%s3447_s5 + $0x240] sm:$0xff] }
 0x117   : > { %2783 = vmatprep.subr.bf16.mxu0 %v2782_v48  ;;  %v877_v48 = vld [vmem:[%s3447_s5 + $0x14b8] sm:$0xff]  ;;  %v2886_v45 = vpack.c.bf16 %v420_v36, %v393_v35  ;;  %v448_v36 = vld [vmem:[%s3447_s5 + $0x750] sm:$0xff] }
 0x118   : > { %2841 = vmatpush1.bf16.msra.mxu1 %v2840_v1  ;;  %v230_v1 = vld [vmem:[%s3447_s5 + $0x80] sm:$0xff]  ;;  %v313_v57 = vld [vmem:[%s3447_s5 + $0x318] sm:$0xff] }
 0x119   : > { %2843 = vmatprep.subr.bf16.mxu1 %v2842_v4  ;;  %v957_v4 = vld [vmem:[%s3447_s5 + $0x1738] sm:$0xff]  ;;  %v2876_v12 = vpack.c.bf16 %v257_v6, %v230_v1  ;;  %v2944_v1 = vpack.c.bf16 %v313_v57, %v286_v56  ;;  %v367_v6 = vld [vmem:[%s3447_s5 + $0x4c8] sm:$0xff]  ;;  %v584_v57 = vld [vmem:[%s3447_s5 + $0xb90] sm:$0xff] }
 0x11a   : > { %2785 = vmatpush1.bf16.msra.mxu0 %v2784_v55  ;;  %v2858_v55 = vpack.c.bf16 %v904_v49, %v877_v48  ;;  %v2864_v11 = vpack.c.bf16 %v957_v4, %v930_v3  ;;  %v314_v48 = vld [vmem:[%s3447_s5 + $0x320] sm:$0xff]  ;;  %v447_v49 = vld [vmem:[%s3447_s5 + $0x748] sm:$0xff]  ;;  %v4060_v3 = vsub.s32 1, %v4035_v51  ;;  %v557_v56 = vld [vmem:[%s3447_s5 + $0xab8] sm:$0xff] }
 0x11b   : > { %2787 = vmatprep.subr.bf16.mxu0 %v2786_v60  ;;  %v931_v60 = vld [vmem:[%s3447_s5 + $0x1668] sm:$0xff] }
 0x11c   : > { %2845 = vmatpush1.bf16.msra.mxu1 %v2844_v13  ;;  %v284_v13 = vld [vmem:[%s3447_s5 + $0x230] sm:$0xff] }
 0x11d   : > { %2847 = vmatprep.subr.bf16.mxu1 %v2846_v16  ;;  %v1011_v16 = vld [vmem:[%s3447_s5 + $0x18e8] sm:$0xff]  ;;  %v2880_v25 = vpack.c.bf16 %v311_v19, %v284_v13  ;;  %v394_v19 = vld [vmem:[%s3447_s5 + $0x5a0] sm:$0xff] }
 0x11e   : > { %2789 = vmatpush1.bf16.msra.mxu0 %v2788_v2  ;;  %v2862_v2 = vpack.c.bf16 %v958_v61, %v931_v60  ;;  %v2868_v24 = vpack.c.bf16 %v1011_v16, %v984_v15  ;;  %v341_v60 = vld [vmem:[%s3447_s5 + $0x3f8] sm:$0xff]  ;;  %v368_v61 = vld [vmem:[%s3447_s5 + $0x4d0] sm:$0xff]  ;;  %v554_v16 = vld [vmem:[%s3447_s5 + $0xaa0] sm:$0xff] }
 0x11f   : > { %2791 = vmatprep.subr.bf16.mxu0 %v2790_v7  ;;  %v985_v7 = vld [vmem:[%s3447_s5 + $0x1818] sm:$0xff]  ;;  %v2946_v4 = vpack.c.bf16 %v368_v61, %v341_v60 }
 0x120   : > { %2849 = vmatpush1.bf16.msra.mxu1 %v2848_v26  ;;  %v338_v26 = vld [vmem:[%s3447_s5 + $0x3e0] sm:$0xff] }
 0x121   : > { %2851 = vmatprep.subr.bf16.mxu1 %v2850_v30  ;;  %v1065_v30 = vld [vmem:[%s3447_s5 + $0x1a98] sm:$0xff] }
 0x122   : > { %2793 = vmatpush1.bf16.msra.mxu0 %v2792_v14  ;;  %v2866_v14 = vpack.c.bf16 %v1012_v8, %v985_v7  ;;  %v2872_v39 = vpack.c.bf16 %v1065_v30, %v1038_v29  ;;  %v2894_v7 = vpack.c.bf16 %v528_v63, %v501_v62  ;;  %v527_v8 = vld [vmem:[%s3447_s5 + $0x9c8] sm:$0xff] }
 0x123   : > { %2795 = vmatprep.subr.bf16.mxu0 %v2794_v20  ;;  %v1039_v20 = vld [vmem:[%s3447_s5 + $0x19c8] sm:$0xff] }
 0x124   : > { %2853 = vmatpush1.bf16.msra.mxu1 %v2852_v40  ;;  %v2884_v40 = vpack.c.bf16 %v365_v32, %v338_v26  ;;  %v609_v26 = vld [vmem:[%s3447_s5 + $0xc58] sm:$0xff] }
 0x125   : > { %2855 = vmatprep.subr.bf16.mxu1 %v2854_v43  ;;  %v232_v43 = vld [vmem:[%s3447_s5 + $0x90] sm:$0xff] }
 0x126   : > { %2797 = vmatpush1.bf16.msra.mxu0 %v2796_v27  ;;  %v2870_v27 = vpack.c.bf16 %v1066_v21, %v1039_v20  ;;  %v421_v20 = vld [vmem:[%s3447_s5 + $0x678] sm:$0xff] }
 0x127   : > { %2799 = vmatprep.subr.bf16.mxu0 %v2798_v33  ;;  %v233_v33 = vld [vmem:[%s3447_s5 + $0x98] sm:$0xff] }
 0x128   : > { %2857 = vmatpush1.bf16.msra.mxu1 %v2856_v52  ;;  %v2938_v42 = vpack.c.bf16 %v260_v34, %v233_v33  ;;  %v2940_v52 = vpack.c.bf16 %v259_v44, %v232_v43  ;;  %v2900_v33 = vpack.c.bf16 %v581_v22, %v554_v16  ;;  %v608_v34 = vld [vmem:[%s3447_s5 + $0xc50] sm:$0xff]  ;;  %v663_v43 = vld [vmem:[%s3447_s5 + $0xe08] sm:$0xff]  ;;  %v690_v44 = vld [vmem:[%s3447_s5 + $0xee0] sm:$0xff] }
 0x129   : > { %2859 = vmatprep.subr.bf16.mxu1 %v2858_v55  ;;  %v2942_v55 = vpack.c.bf16 %v314_v48, %v287_v47  ;;  %v4102_v47 = vsub.s32 3, %v4035_v51  ;;  %v770_v16 = vld [vmem:[%s3447_s5 + $0x1160] sm:$0xff]  ;;  %v797_v22 = vld [vmem:[%s3447_s5 + $0x1238] sm:$0xff] }
 0x12a   : > { %2801 = vmatpush1.bf16.msra.mxu0 %v2800_v41  ;;  %v392_v41 = vld [vmem:[%s3447_s5 + $0x590] sm:$0xff] }
 0x12b   : > { %2803 = vmatprep.subr.bf16.mxu0 %v2802_v46  ;;  %v419_v46 = vld [vmem:[%s3447_s5 + $0x668] sm:$0xff] }
 0x12c   : > { %2861 = vmatpush1.bf16.msra.mxu1 %v2860_v0  ;;  %v4053_v0 = vld [vmem:[%s4042_s10] sm:$0xff] }
 0x12d   : > { %2863 = vmatprep.subr.bf16.mxu1 %v2862_v2  ;;  %v2892_v2 = vpack.c.bf16 %v473_v59, %v446_v54  ;;  %v2906_v54 = vpack.c.bf16 %v690_v44, %v663_v43  ;;  %v744_v59 = vld [vmem:[%s3447_s5 + $0x1090] sm:$0xff]  ;;  %v1101_v61 = vrot.slane %v4053_v0, %v4102_v47  ;;  %v878_v43 = vld [vmem:[%s3447_s5 + $0x14c0] sm:$0xff] }
 0x12e   : > { %2805 = vmatpush1.bf16.msra.mxu0 %v2804_v53  ;;  %v2888_v53 = vpack.c.bf16 %v419_v46, %v392_v41  ;;  %v503_v41 = vld [vmem:[%s3447_s5 + $0x908] sm:$0xff]  ;;  %v2956_v46 = vpack.c.bf16 %v475_v37, %v448_v36  ;;  %v746_v37 = vld [vmem:[%s3447_s5 + $0x10a0] sm:$0xff] }
 0x12f   : > { %2807 = vmatprep.subr.bf16.mxu0 %v2806_v58  ;;  %v2890_v58 = vpack.c.bf16 %v474_v50, %v447_v49  ;;  %v662_v49 = vld [vmem:[%s3447_s5 + $0xe00] sm:$0xff]  ;;  %v719_v36 = vld [vmem:[%s3447_s5 + $0xfc8] sm:$0xff] }
 0x130   : > { %2865 = vmatpush1.bf16.msra.mxu1 %v2864_v11  ;;  %v582_v11 = vld [vmem:[%s3447_s5 + $0xb80] sm:$0xff]  ;;  %v2974_v44 = vpack.c.bf16 %v746_v37, %v719_v36  ;;  %v261_v37 = vld [vmem:[%s3447_s5 + $0x178] sm:$0xff] }
 0x131   : > { %2867 = vmatprep.subr.bf16.mxu1 %v2866_v14  ;;  %v1093_v14 = vrot.slane %v4053_v0, %v4060_v3 }
 0x132   : > { %2809 = vmatpush1.bf16.msra.mxu0 %v2808_v38  ;;  %v4056_v38 = vsub.s32 0, %v4035_v51 }
 0x133   : > { %2875 = vmatprep.subr.bf16.mxu0 %v2874_v5  ;;  %v340_v5 = vld [vmem:[%s3447_s5 + $0x3f0] sm:$0xff] }
 0x134   : > { %2869 = vmatpush1.bf16.msra.mxu1 %v2868_v24  ;;  %v2948_v13 = vpack.c.bf16 %v367_v6, %v340_v5  ;;  %v476_v24 = vld [vmem:[%s3447_s5 + $0x830] sm:$0xff]  ;;  %v743_v6 = vld [vmem:[%s3447_s5 + $0x1088] sm:$0xff] }
 0x135   : > { %1712 = vmatmul.mubr.f32.vlgmr.msra.gmra.mrb[6].mxu0 %v3868_v17  ;;  %2871 = vmatprep.subr.bf16.mxu1 %v2870_v27  ;;  %v636_v27 = vld [vmem:[%s3447_s5 + $0xd30] sm:$0xff]  ;;  %v2954_v35 = vpack.c.bf16 %v476_v24, %v449_v23  ;;  %v665_v23 = vld [vmem:[%s3447_s5 + $0xe18] sm:$0xff] }
 0x136   : > { %2877 = vmatpush1.bf16.msra.mxu0 %v2876_v12  ;;  %1853 = vmatprep.mubr.f32.mxu0 %v3880_v28  ;;  %v1089_v12 = vrot.slane %v4053_v0, %v4056_v38  ;;  %v692_v24 = vld [vmem:[%s3447_s5 + $0xef0] sm:$0xff] }
 0x137   : > { %2879 = vmatprep.subr.bf16.mxu0 %v2878_v18  ;;  %v2950_v18 = vpack.c.bf16 %v422_v10, %v395_v9  ;;  %v638_v9 = vld [vmem:[%s3447_s5 + $0xd40] sm:$0xff]  ;;  %v771_v10 = vld [vmem:[%s3447_s5 + $0x1168] sm:$0xff] }
 0x138   : > { %2873 = vmatpush1.bf16.msra.mxu1 %v2872_v39  ;;  %v2902_v39 = vpack.c.bf16 %v636_v27, %v609_v26  ;;  %v852_v26 = vld [vmem:[%s3447_s5 + $0x13f0] sm:$0xff] }
 0x139   : > { %2939 = vmatprep.subr.bf16.mxu1 %v2938_v42  ;;  %v530_v42 = vld [vmem:[%s3447_s5 + $0x9e0] sm:$0xff] }
 0x13a   : > { %2881 = vmatpush1.bf16.msra.mxu0 %v2880_v25  ;;  %v2958_v50 = vpack.c.bf16 %v530_v42, %v503_v41 }
 0x13b   : > { %2883 = vmatprep.subr.bf16.mxu0 %v2882_v31  ;;  %1783 = vmatmul.mubr.f32.vlgmr.msra.gmra.mrb[6].mxu1 %v3868_v17  ;;  %v500_v17 = vld [vmem:[%s3447_s5 + $0x8f0] sm:$0xff]  ;;  %v2952_v31 = vpack.c.bf16 %v421_v20, %v394_v19  ;;  %v610_v19 = vld [vmem:[%s3447_s5 + $0xc60] sm:$0xff]  ;;  %v637_v20 = vld [vmem:[%s3447_s5 + $0xd38] sm:$0xff] }
 0x13c   : > { %2941 = vmatpush1.bf16.msra.mxu1 %v2940_v52  ;;  %1924 = vmatprep.mubr.f32.mxu1 %v3880_v28  ;;  %v555_v28 = vld [vmem:[%s3447_s5 + $0xaa8] sm:$0xff]  ;;  %v2896_v15 = vpack.c.bf16 %v527_v8, %v500_v17  ;;  %v502_v52 = vld [vmem:[%s3447_s5 + $0x900] sm:$0xff]  ;;  %v556_v17 = vld [vmem:[%s3447_s5 + $0xab0] sm:$0xff]  ;;  %v2968_v27 = vpack.c.bf16 %v637_v20, %v610_v19 }
 0x13d   : > { %2943 = vmatprep.subr.bf16.mxu1 %v2942_v55  ;;  %v2898_v21 = vpack.c.bf16 %v582_v11, %v555_v28  ;;  %v689_v55 = vld [vmem:[%s3447_s5 + $0xed8] sm:$0xff]  ;;  %v611_v8 = vld [vmem:[%s3447_s5 + $0xc68] sm:$0xff]  ;;  %v798_v28 = vld [vmem:[%s3447_s5 + $0x1240] sm:$0xff] }
 0x13e   : > { %2885 = vmatpush1.bf16.msra.mxu0 %v2884_v40  ;;  %v635_v40 = vld [vmem:[%s3447_s5 + $0xd28] sm:$0xff]  ;;  %v2908_v63 = vpack.c.bf16 %v689_v55, %v662_v49  ;;  %v960_v55 = vld [vmem:[%s3447_s5 + $0x1750] sm:$0xff] }
 0x13f   : > { %2887 = vmatprep.subr.bf16.mxu0 %v2886_v45  ;;  %v4099_v45 = vsub.s32 2, %v4035_v51  ;;  %v2904_v48 = vpack.c.bf16 %v635_v40, %v608_v34  ;;  %v906_v40 = vld [vmem:[%s3447_s5 + $0x15a0] sm:$0xff]  ;;  %v1040_v19 = vld [vmem:[%s3447_s5 + $0x19d0] sm:$0xff] }
 0x140   : > { %2945 = vmatpush1.bf16.msra.mxu1 %v2944_v1  ;;  %v716_v1 = vld [vmem:[%s3447_s5 + $0xfb0] sm:$0xff] }
 0x141   : > { %2947 = vmatprep.subr.bf16.mxu1 %v2946_v4  ;;  %v1097_v60 = vrot.slane %v4053_v0, %v4099_v45  ;;  %v583_v4 = vld [vmem:[%s3447_s5 + $0xb88] sm:$0xff] }
 0x142   : > { %2889 = vmatpush1.bf16.msra.mxu0 %v2888_v53  ;;  %v529_v53 = vld [vmem:[%s3447_s5 + $0x9d8] sm:$0xff] }
 0x143   : > { %2891 = vmatprep.subr.bf16.mxu0 %v2890_v58  ;;  %v717_v58 = vld [vmem:[%s3447_s5 + $0xfb8] sm:$0xff]  ;;  %v2960_v62 = vpack.c.bf16 %v529_v53, %v502_v52  ;;  %v800_v53 = vld [vmem:[%s3447_s5 + $0x1250] sm:$0xff] }
 0x144   : > { %2949 = vmatpush1.bf16.msra.mxu1 %v2948_v13  ;;  %v2910_v5 = vpack.c.bf16 %v744_v59, %v717_v58  ;;  %v773_v52 = vld [vmem:[%s3447_s5 + $0x1178] sm:$0xff]  ;;  %v932_v58 = vld [vmem:[%s3447_s5 + $0x1670] sm:$0xff] }
 0x145   : > { %2951 = vmatprep.subr.bf16.mxu1 %v2950_v18  ;;  %v2966_v18 = vpack.c.bf16 %v638_v9, %v611_v8  ;;  %v2978_v59 = vpack.c.bf16 %v800_v53, %v773_v52  ;;  %v826_v9 = vld [vmem:[%s3447_s5 + $0x1320] sm:$0xff]  ;;  %v315_v53 = vld [vmem:[%s3447_s5 + $0x328] sm:$0xff] }
 0x146   : > { %2893 = vmatpush1.bf16.msra.mxu0 %v2892_v2  ;;  %v2962_v2 = vpack.c.bf16 %v584_v57, %v557_v56 }
 0x147   : > { %2895 = vmatprep.subr.bf16.mxu0 %v2894_v7 }
 0x148   : > { %v1287_v25 = vpop.f32.mrb[0].mxu0  ;;  %2953 = vmatpush1.bf16.msra.mxu1 %v2952_v31  ;;  %v2970_v31 = vpack.c.bf16 %v692_v24, %v665_v23  ;;  %v1067_v24 = vld [vmem:[%s3447_s5 + $0x1aa8] sm:$0xff] }
 0x149   : > { %v1288_v29 = vadd.f32 %v1287_v25, %v1089_v12  ;;  %v1289_v30 = vpop.f32.mrb[1].mxu0  ;;  %2955 = vmatprep.subr.bf16.mxu1 %v2954_v35  ;;  %v825_v25 = vld [vmem:[%s3447_s5 + $0x1318] sm:$0xff]  ;;  %v851_v35 = vld [vmem:[%s3447_s5 + $0x13e8] sm:$0xff] }
 0x14a   : > { %v1290_v32 = vadd.f32 %v1289_v30, %v1093_v14  ;;  %2897 = vmatpush1.bf16.msra.mxu0 %v2896_v15  ;;  %v2964_v14 = vpack.c.bf16 %v583_v4, %v556_v17  ;;  %v2912_v15 = vpack.c.bf16 %v743_v6, %v716_v1  ;;  %v824_v30 = vld [vmem:[%s3447_s5 + $0x1310] sm:$0xff]  ;;  %v2918_v34 = vpack.c.bf16 %v852_v26, %v825_v25  ;;  %v827_v1 = vld [vmem:[%s3447_s5 + $0x1328] sm:$0xff]  ;;  %v1014_v4 = vld [vmem:[%s3447_s5 + $0x1900] sm:$0xff] }
 0x14b   : > { %2214 = vst [vmem:[%s4084_s19] sm:$0xff] %v1288_v29  ;;  %2899 = vmatprep.subr.bf16.mxu0 %v2898_v21  ;;  %v2914_v21 = vpack.c.bf16 %v798_v28, %v771_v10  ;;  %v2916_v29 = vpack.c.bf16 %v797_v22, %v770_v16  ;;  %v2920_v42 = vpack.c.bf16 %v851_v35, %v824_v30  ;;  %v987_v17 = vld [vmem:[%s3447_s5 + $0x1828] sm:$0xff]  ;;  %v853_v10 = vld [vmem:[%s3447_s5 + $0x13f8] sm:$0xff]  ;;  %v962_v26 = vld [vmem:[%s3447_s5 + $0x1760] sm:$0xff] }
 0x14c   : > { %2215 = vst [vmem:[%s4084_s19 + $0x8] sm:$0xff] %v1290_v32  ;;  %2957 = vmatpush1.bf16.msra.mxu1 %v2956_v46  ;;  %v664_v32 = vld [vmem:[%s3447_s5 + $0xe10] sm:$0xff]  ;;  %v718_v46 = vld [vmem:[%s3447_s5 + $0xfc0] sm:$0xff]  ;;  %v2930_v28 = vpack.c.bf16 %v1014_v4, %v987_v17  ;;  %v2984_v16 = vpack.c.bf16 %v853_v10, %v826_v9  ;;  %v907_v22 = vld [vmem:[%s3447_s5 + $0x15a8] sm:$0xff] }
 0x14d   : > { %2959 = vmatprep.subr.bf16.mxu1 %v2958_v50  ;;  %v905_v50 = vld [vmem:[%s3447_s5 + $0x1598] sm:$0xff]  ;;  %v935_v25 = vld [vmem:[%s3447_s5 + $0x1688] sm:$0xff] }
 0x14e   : > { %2901 = vmatpush1.bf16.msra.mxu0 %v2900_v33  ;;  %v1358_v7 = vpop.f32.mrb[0].mxu1  ;;  %v691_v33 = vld [vmem:[%s3447_s5 + $0xee8] sm:$0xff]  ;;  %v2924_v57 = vpack.c.bf16 %v905_v50, %v878_v43  ;;  %v961_v35 = vld [vmem:[%s3447_s5 + $0x1758] sm:$0xff] }
 0x14f   : > { %2903 = vmatprep.subr.bf16.mxu0 %v2902_v39  ;;  %v1359_v11 = vadd.f32 %v1358_v7, %v1097_v60  ;;  %v1360_v12 = vpop.f32.mrb[1].mxu1  ;;  %v879_v39 = vld [vmem:[%s3447_s5 + $0x14c8] sm:$0xff]  ;;  %v2972_v41 = vpack.c.bf16 %v691_v33, %v664_v32  ;;  %v772_v60 = vld [vmem:[%s3447_s5 + $0x1170] sm:$0xff]  ;;  %v986_v7 = vld [vmem:[%s3447_s5 + $0x1820] sm:$0xff]  ;;  %v2990_v33 = vpack.c.bf16 %v962_v26, %v935_v25 }
 0x150   : > { %v1361_v13 = vadd.f32 %v1360_v12, %v1101_v61  ;;  %2961 = vmatpush1.bf16.msra.mxu1 %v2960_v62  ;;  %v2922_v49 = vpack.c.bf16 %v906_v40, %v879_v39  ;;  %v799_v61 = vld [vmem:[%s3447_s5 + $0x1248] sm:$0xff]  ;;  %v881_v12 = vld [vmem:[%s3447_s5 + $0x14d8] sm:$0xff]  ;;  %v234_v32 = vld [vmem:[%s3447_s5 + $0xa0] sm:$0xff] }
 0x151   : > { %2216 = vst [vmem:[%s4084_s19 + $0x10] sm:$0xff] %v1359_v11  ;;  %2963 = vmatprep.subr.bf16.mxu1 %v2962_v2  ;;  %v854_v2 = vld [vmem:[%s3447_s5 + $0x1400] sm:$0xff]  ;;  %v1013_v11 = vld [vmem:[%s3447_s5 + $0x18f8] sm:$0xff]  ;;  %v1016_v40 = vld [vmem:[%s3447_s5 + $0x1910] sm:$0xff] }
 0x152   : > { %2905 = vmatpush1.bf16.msra.mxu0 %v2904_v48  ;;  %2217 = vst [vmem:[%s4084_s19 + $0x18] sm:$0xff] %v1361_v13  ;;  %v745_v48 = vld [vmem:[%s3447_s5 + $0x1098] sm:$0xff]  ;;  %v2982_v8 = vpack.c.bf16 %v854_v2, %v827_v1  ;;  %v908_v13 = vld [vmem:[%s3447_s5 + $0x15b0] sm:$0xff]  ;;  %v1015_v50 = vld [vmem:[%s3447_s5 + $0x1908] sm:$0xff] }
 0x153   : > { %2907 = vmatprep.subr.bf16.mxu0 %v2906_v54  ;;  %v933_v54 = vld [vmem:[%s3447_s5 + $0x1678] sm:$0xff]  ;;  %v2976_v56 = vpack.c.bf16 %v745_v48, %v718_v46  ;;  %v2986_v20 = vpack.c.bf16 %v908_v13, %v881_v12  ;;  %v288_v46 = vld [vmem:[%s3447_s5 + $0x250] sm:$0xff]  ;;  %v263_v13 = vld [vmem:[%s3447_s5 + $0x188] sm:$0xff] }
 0x154   : > { %2965 = vmatpush1.bf16.msra.mxu1 %v2964_v14  ;;  %v2926_v62 = vpack.c.bf16 %v960_v55, %v933_v54  ;;  %v1041_v14 = vld [vmem:[%s3447_s5 + $0x19d8] sm:$0xff]  ;;  %v1043_v54 = vld [vmem:[%s3447_s5 + $0x19e8] sm:$0xff]  ;;  %v1070_v55 = vld [vmem:[%s3447_s5 + $0x1ac0] sm:$0xff] }
 0x155   : > { %2967 = vmatprep.subr.bf16.mxu1 %v2966_v18  ;;  %v2932_v18 = vpack.c.bf16 %v1013_v11, %v986_v7  ;;  %v989_v39 = vld [vmem:[%s3447_s5 + $0x1838] sm:$0xff]  ;;  %v236_v12 = vld [vmem:[%s3447_s5 + $0xb0] sm:$0xff]  ;;  %v290_v25 = vld [vmem:[%s3447_s5 + $0x260] sm:$0xff] }
 0x156   : > { %2909 = vmatpush1.bf16.msra.mxu0 %v2908_v63  ;;  %v959_v63 = vld [vmem:[%s3447_s5 + $0x1748] sm:$0xff]  ;;  %v2994_v48 = vpack.c.bf16 %v1016_v40, %v989_v39  ;;  %v1069_v1 = vld [vmem:[%s3447_s5 + $0x1ab8] sm:$0xff]  ;;  %v504_v39 = vld [vmem:[%s3447_s5 + $0x910] sm:$0xff] }
 0x157   : > { %2911 = vmatprep.subr.bf16.mxu0 %v2910_v5  ;;  %v2980_v5 = vpack.c.bf16 %v799_v61, %v772_v60  ;;  %v2928_v6 = vpack.c.bf16 %v959_v63, %v932_v58  ;;  %v4193_v58 = vld [vmem:[%s4514_s0] sm:$0xff]  ;;  %v3008_v60 = vpack.c.bf16 %v315_v53, %v288_v46  ;;  %v369_v17 = vld [vmem:[%s3447_s5 + $0x4d8] sm:$0xff]  ;;  %v399_v46 = vld [vmem:[%s3447_s5 + $0x5c8] sm:$0xff] }
 0x158   : > { %2969 = vmatpush1.bf16.msra.mxu1 %v2968_v27  ;;  %v235_v27 = vld [vmem:[%s3447_s5 + $0xa8] sm:$0xff]  ;;  %v342_v61 = vld [vmem:[%s3447_s5 + $0x400] sm:$0xff]  ;;  %v237_v4 = vld [vmem:[%s3447_s5 + $0xb8] sm:$0xff] }
 0x159   : > { %2971 = vmatprep.subr.bf16.mxu1 %v2970_v31  ;;  %v2936_v31 = vpack.c.bf16 %v1067_v24, %v1040_v19  ;;  %v1042_v63 = vld [vmem:[%s3447_s5 + $0x19e0] sm:$0xff]  ;;  %v397_v7 = vld [vmem:[%s3447_s5 + $0x5b8] sm:$0xff]  ;;  %v3012_v10 = vpack.c.bf16 %v369_v17, %v342_v61  ;;  %v451_v19 = vld [vmem:[%s3447_s5 + $0x768] sm:$0xff] }
 0x15a   : > { %2913 = vmatpush1.bf16.msra.mxu0 %v2912_v15  ;;  %v1068_v15 = vld [vmem:[%s3447_s5 + $0x1ab0] sm:$0xff]  ;;  %v3000_v9 = vpack.c.bf16 %v1069_v1, %v1042_v63  ;;  %v317_v26 = vld [vmem:[%s3447_s5 + $0x338] sm:$0xff] }
 0x15b   : > { %2915 = vmatprep.subr.bf16.mxu0 %v2914_v21  ;;  %v880_v21 = vld [vmem:[%s3447_s5 + $0x14d0] sm:$0xff]  ;;  %v2934_v23 = vpack.c.bf16 %v1068_v15, %v1041_v14  ;;  %v423_v15 = vld [vmem:[%s3447_s5 + $0x688] sm:$0xff]  ;;  %v453_v63 = vld [vmem:[%s3447_s5 + $0x778] sm:$0xff] }
 0x15c   : > { %2973 = vmatpush1.bf16.msra.mxu1 %v2972_v41  ;;  %v2988_v30 = vpack.c.bf16 %v907_v22, %v880_v21  ;;  %v289_v41 = vld [vmem:[%s3447_s5 + $0x258] sm:$0xff]  ;;  %v3068_v21 = vpack.c.bf16 %v263_v13, %v236_v12  ;;  %v480_v1 = vld [vmem:[%s3447_s5 + $0x850] sm:$0xff]  ;;  %v479_v13 = vld [vmem:[%s3447_s5 + $0x848] sm:$0xff] }
 0x15d   : > { %2975 = vmatprep.subr.bf16.mxu1 %v2974_v44  ;;  %v3004_v44 = vpack.c.bf16 %v261_v37, %v234_v32  ;;  %v505_v32 = vld [vmem:[%s3447_s5 + $0x918] sm:$0xff]  ;;  %v4232_v37 = vsub.s32 5, %v4035_v51  ;;  %v452_v12 = vld [vmem:[%s3447_s5 + $0x770] sm:$0xff] }
 0x15e   : > { %2917 = vmatpush1.bf16.msra.mxu0 %v2916_v29  ;;  %v262_v29 = vld [vmem:[%s3447_s5 + $0x180] sm:$0xff]  ;;  %v613_v17 = vld [vmem:[%s3447_s5 + $0xc78] sm:$0xff] }
 0x15f   : > { %2919 = vmatprep.subr.bf16.mxu0 %v2918_v34  ;;  %v934_v34 = vld [vmem:[%s3447_s5 + $0x1680] sm:$0xff]  ;;  %v3002_v36 = vpack.c.bf16 %v262_v29, %v235_v27  ;;  %v477_v29 = vld [vmem:[%s3447_s5 + $0x838] sm:$0xff] }
 0x160   : > { %2977 = vmatpush1.bf16.msra.mxu1 %v2976_v56  ;;  %v2992_v43 = vpack.c.bf16 %v961_v35, %v934_v34  ;;  %v343_v56 = vld [vmem:[%s3447_s5 + $0x408] sm:$0xff]  ;;  %v4228_v34 = vsub.s32 4, %v4035_v51  ;;  %v3072_v35 = vpack.c.bf16 %v317_v26, %v290_v25  ;;  %v666_v25 = vld [vmem:[%s3447_s5 + $0xe20] sm:$0xff] }
 0x161   : > { %2979 = vmatprep.subr.bf16.mxu1 %v2978_v59 }
 0x162   : > { %2921 = vmatpush1.bf16.msra.mxu0 %v2920_v42  ;;  %v316_v42 = vld [vmem:[%s3447_s5 + $0x330] sm:$0xff] }
 0x163   : > { %2923 = vmatprep.subr.bf16.mxu0 %v2922_v49  ;;  %v988_v49 = vld [vmem:[%s3447_s5 + $0x1830] sm:$0xff]  ;;  %v3006_v52 = vpack.c.bf16 %v316_v42, %v289_v41  ;;  %v371_v42 = vld [vmem:[%s3447_s5 + $0x4e8] sm:$0xff] }
 0x164   : > { %2981 = vmatpush1.bf16.msra.mxu1 %v2980_v5  ;;  %v2996_v59 = vpack.c.bf16 %v1015_v50, %v988_v49  ;;  %v264_v5 = vld [vmem:[%s3447_s5 + $0x190] sm:$0xff]  ;;  %v559_v49 = vld [vmem:[%s3447_s5 + $0xac8] sm:$0xff]  ;;  %v586_v50 = vld [vmem:[%s3447_s5 + $0xba0] sm:$0xff] }
 0x165   : > { %2983 = vmatprep.subr.bf16.mxu1 %v2982_v8  ;;  %v424_v8 = vld [vmem:[%s3447_s5 + $0x690] sm:$0xff]  ;;  %v3066_v11 = vpack.c.bf16 %v264_v5, %v237_v4  ;;  %v3026_v61 = vpack.c.bf16 %v586_v50, %v559_v49  ;;  %v747_v49 = vld [vmem:[%s3447_s5 + $0x10a8] sm:$0xff] }
 0x166   : > { %2925 = vmatpush1.bf16.msra.mxu0 %v2924_v57  ;;  %v370_v57 = vld [vmem:[%s3447_s5 + $0x4e0] sm:$0xff]  ;;  %v3014_v14 = vpack.c.bf16 %v424_v8, %v397_v7  ;;  %v344_v41 = vld [vmem:[%s3447_s5 + $0x410] sm:$0xff] }
 0x167   : > { %2927 = vmatprep.subr.bf16.mxu0 %v2926_v62  ;;  %v2998_v62 = vpack.c.bf16 %v1070_v55, %v1043_v54  ;;  %v3010_v2 = vpack.c.bf16 %v370_v57, %v343_v56  ;;  %v3076_v53 = vpack.c.bf16 %v371_v42, %v344_v41  ;;  %v1109_v54 = vrot.slane %v4053_v0, %v4232_v37  ;;  %v558_v56 = vld [vmem:[%s3447_s5 + $0xac0] sm:$0xff]  ;;  %v640_v4 = vld [vmem:[%s3447_s5 + $0xd50] sm:$0xff] }
 0x168   : > { %2985 = vmatpush1.bf16.msra.mxu1 %v2984_v16  ;;  %v291_v16 = vld [vmem:[%s3447_s5 + $0x268] sm:$0xff]  ;;  %v720_v42 = vld [vmem:[%s3447_s5 + $0xfd0] sm:$0xff] }
 0x169   : > { %2987 = vmatprep.subr.bf16.mxu1 %v2986_v20  ;;  %v478_v20 = vld [vmem:[%s3447_s5 + $0x840] sm:$0xff] }
 0x16a   : > { %2929 = vmatpush1.bf16.msra.mxu0 %v2928_v6  ;;  %v4205_v6 = vld [vmem:[%s4514_s0 + $0x8] sm:$0xff]  ;;  %v3018_v27 = vpack.c.bf16 %v478_v20, %v451_v19  ;;  %v694_v20 = vld [vmem:[%s3447_s5 + $0xf00] sm:$0xff] }
 0x16b   : > { %2931 = vmatprep.subr.bf16.mxu0 %v2930_v28  ;;  %v396_v28 = vld [vmem:[%s3447_s5 + $0x5b0] sm:$0xff]  ;;  %v667_v19 = vld [vmem:[%s3447_s5 + $0xe28] sm:$0xff] }
 0x16c   : > { %2989 = vmatpush1.bf16.msra.mxu1 %v2988_v30  ;;  %v3016_v22 = vpack.c.bf16 %v423_v15, %v396_v28  ;;  %v345_v30 = vld [vmem:[%s3447_s5 + $0x418] sm:$0xff]  ;;  %v612_v28 = vld [vmem:[%s3447_s5 + $0xc70] sm:$0xff]  ;;  %v639_v15 = vld [vmem:[%s3447_s5 + $0xd48] sm:$0xff] }
 0x16d   : > { %2991 = vmatprep.subr.bf16.mxu1 %v2990_v33  ;;  %v532_v33 = vld [vmem:[%s3447_s5 + $0x9f0] sm:$0xff] }
 0x16e   : > { %2933 = vmatpush1.bf16.msra.mxu0 %v2932_v18  ;;  %v318_v18 = vld [vmem:[%s3447_s5 + $0x340] sm:$0xff] }
 0x16f   : > { %2935 = vmatprep.subr.bf16.mxu0 %v2934_v23  ;;  %v450_v23 = vld [vmem:[%s3447_s5 + $0x760] sm:$0xff]  ;;  %v3070_v24 = vpack.c.bf16 %v318_v18, %v291_v16  ;;  %v507_v16 = vld [vmem:[%s3447_s5 + $0x928] sm:$0xff] }
 0x170   : > { %2993 = vmatpush1.bf16.msra.mxu1 %v2992_v43  ;;  %v3022_v43 = vpack.c.bf16 %v532_v33, %v505_v32  ;;  %v534_v18 = vld [vmem:[%s3447_s5 + $0xa00] sm:$0xff]  ;;  %v561_v32 = vld [vmem:[%s3447_s5 + $0xad8] sm:$0xff]  ;;  %v588_v33 = vld [vmem:[%s3447_s5 + $0xbb0] sm:$0xff] }
 0x171   : > { %2995 = vmatprep.subr.bf16.mxu1 %v2994_v48  ;;  %v426_v48 = vld [vmem:[%s3447_s5 + $0x6a0] sm:$0xff]  ;;  %v3086_v26 = vpack.c.bf16 %v534_v18, %v507_v16  ;;  %v723_v16 = vld [vmem:[%s3447_s5 + $0xfe8] sm:$0xff] }
 0x172   : > { %2937 = vmatpush1.bf16.msra.mxu0 %v2936_v31  ;;  %v372_v31 = vld [vmem:[%s3447_s5 + $0x4f0] sm:$0xff]  ;;  %v3078_v57 = vpack.c.bf16 %v426_v48, %v399_v46  ;;  %v587_v46 = vld [vmem:[%s3447_s5 + $0xba8] sm:$0xff]  ;;  %v750_v18 = vld [vmem:[%s3447_s5 + $0x10c0] sm:$0xff] }
 0x173   : > { %3003 = vmatprep.subr.bf16.mxu0 %v3002_v36  ;;  %v3020_v36 = vpack.c.bf16 %v477_v29, %v450_v23  ;;  %v3074_v40 = vpack.c.bf16 %v372_v31, %v345_v30  ;;  %v4268_v23 = vsub.s32 7, %v4035_v51  ;;  %v533_v29 = vld [vmem:[%s3447_s5 + $0x9f8] sm:$0xff]  ;;  %v3034_v30 = vpack.c.bf16 %v694_v20, %v667_v19  ;;  %v883_v19 = vld [vmem:[%s3447_s5 + $0x14e8] sm:$0xff]  ;;  %v910_v20 = vld [vmem:[%s3447_s5 + $0x15c0] sm:$0xff] }
 0x174   : > { %2997 = vmatpush1.bf16.msra.mxu1 %v2996_v59  ;;  %v398_v59 = vld [vmem:[%s3447_s5 + $0x5c0] sm:$0xff]  ;;  %v693_v31 = vld [vmem:[%s3447_s5 + $0xef8] sm:$0xff] }
 0x175   : > { %1854 = vmatmul.mubr.f32.vlgmr.msra.gmra.mrb[8].mxu0 %v4193_v58  ;;  %2999 = vmatprep.subr.bf16.mxu1 %v2998_v62  ;;  %v585_v62 = vld [vmem:[%s3447_s5 + $0xb98] sm:$0xff]  ;;  %v3036_v41 = vpack.c.bf16 %v693_v31, %v666_v25  ;;  %v882_v25 = vld [vmem:[%s3447_s5 + $0x14e0] sm:$0xff] }
 0x176   : > { %3005 = vmatpush1.bf16.msra.mxu0 %v3004_v44  ;;  %1995 = vmatprep.mubr.f32.mxu0 %v4205_v6  ;;  %v531_v44 = vld [vmem:[%s3447_s5 + $0x9e8] sm:$0xff]  ;;  %v909_v31 = vld [vmem:[%s3447_s5 + $0x15b8] sm:$0xff] }
 0x177   : > { %3007 = vmatprep.subr.bf16.mxu0 %v3006_v52  ;;  %v1105_v52 = vrot.slane %v4053_v0, %v4228_v34  ;;  %v3024_v55 = vpack.c.bf16 %v531_v44, %v504_v39  ;;  %v1117_v39 = vrot.slane %v4053_v0, %v4268_v23  ;;  %v560_v44 = vld [vmem:[%s3447_s5 + $0xad0] sm:$0xff] }
 0x178   : > { %3001 = vmatpush1.bf16.msra.mxu1 %v3000_v9 }
 0x179   : > { %3067 = vmatprep.subr.bf16.mxu1 %v3066_v11  ;;  %v3082_v11 = vpack.c.bf16 %v480_v1, %v453_v63  ;;  %v614_v63 = vld [vmem:[%s3447_s5 + $0xc80] sm:$0xff]  ;;  %v641_v1 = vld [vmem:[%s3447_s5 + $0xd58] sm:$0xff] }
 0x17a   : > { %3009 = vmatpush1.bf16.msra.mxu0 %v3008_v60  ;;  %v425_v60 = vld [vmem:[%s3447_s5 + $0x698] sm:$0xff] }
 0x17b   : > { %3011 = vmatprep.subr.bf16.mxu0 %v3010_v2  ;;  %1925 = vmatmul.mubr.f32.vlgmr.msra.gmra.mrb[8].mxu1 %v4193_v58  ;;  %v3080_v8 = vpack.c.bf16 %v425_v60, %v398_v59  ;;  %v3092_v59 = vpack.c.bf16 %v587_v46, %v560_v44  ;;  %v3040_v60 = vpack.c.bf16 %v747_v49, %v720_v42  ;;  %v776_v42 = vld [vmem:[%s3447_s5 + $0x1190] sm:$0xff]  ;;  %v963_v46 = vld [vmem:[%s3447_s5 + $0x1768] sm:$0xff]  ;;  %v858_v49 = vld [vmem:[%s3447_s5 + $0x1420] sm:$0xff] }
 0x17c   : > { %3069 = vmatpush1.bf16.msra.mxu1 %v3068_v21  ;;  %2066 = vmatprep.mubr.f32.mxu1 %v4205_v6  ;;  %v4265_v21 = vsub.s32 6, %v4035_v51 }
 0x17d   : > { %3071 = vmatprep.subr.bf16.mxu1 %v3070_v24  ;;  %v3032_v24 = vpack.c.bf16 %v639_v15, %v612_v28  ;;  %v828_v28 = vld [vmem:[%s3447_s5 + $0x1330] sm:$0xff]  ;;  %v855_v15 = vld [vmem:[%s3447_s5 + $0x1408] sm:$0xff] }
 0x17e   : > { %3013 = vmatpush1.bf16.msra.mxu0 %v3012_v10  ;;  %v3028_v10 = vpack.c.bf16 %v585_v62, %v558_v56  ;;  %v1113_v51 = vrot.slane %v4053_v0, %v4265_v21  ;;  %v775_v0 = vld [vmem:[%s3447_s5 + $0x1188] sm:$0xff] }
 0x17f   : > { %3015 = vmatprep.subr.bf16.mxu0 %v3014_v14  ;;  %v3030_v14 = vpack.c.bf16 %v640_v4, %v613_v17  ;;  %v801_v17 = vld [vmem:[%s3447_s5 + $0x1258] sm:$0xff] }
 0x180   : > { %3073 = vmatpush1.bf16.msra.mxu1 %v3072_v35  ;;  %v721_v35 = vld [vmem:[%s3447_s5 + $0xfd8] sm:$0xff] }
 0x181   : > { %3075 = vmatprep.subr.bf16.mxu1 %v3074_v40  ;;  %v669_v4 = vld [vmem:[%s3447_s5 + $0xe38] sm:$0xff] }
 0x182   : > { %3017 = vmatpush1.bf16.msra.mxu0 %v3016_v22  ;;  %v3084_v22 = vpack.c.bf16 %v479_v13, %v452_v12  ;;  %v668_v12 = vld [vmem:[%s3447_s5 + $0xe30] sm:$0xff]  ;;  %v695_v13 = vld [vmem:[%s3447_s5 + $0xf08] sm:$0xff] }
 0x183   : > { %3019 = vmatprep.subr.bf16.mxu0 %v3018_v27  ;;  %v506_v27 = vld [vmem:[%s3447_s5 + $0x920] sm:$0xff] }
 0x184   : > { %3077 = vmatpush1.bf16.msra.mxu1 %v3076_v53  ;;  %v3088_v40 = vpack.c.bf16 %v533_v29, %v506_v27  ;;  %v642_v53 = vld [vmem:[%s3447_s5 + $0xd60] sm:$0xff]  ;;  %v749_v29 = vld [vmem:[%s3447_s5 + $0x10b8] sm:$0xff] }
 0x185   : > { %3079 = vmatprep.subr.bf16.mxu1 %v3078_v57  ;;  %v722_v27 = vld [vmem:[%s3447_s5 + $0xfe0] sm:$0xff] }
 0x186   : > { %3021 = vmatpush1.bf16.msra.mxu0 %v3020_v36  ;;  %v748_v36 = vld [vmem:[%s3447_s5 + $0x10b0] sm:$0xff] }
 0x187   : > { %3023 = vmatprep.subr.bf16.mxu0 %v3022_v43  ;;  %v3090_v43 = vpack.c.bf16 %v588_v33, %v561_v32  ;;  %v3038_v48 = vpack.c.bf16 %v748_v36, %v721_v35  ;;  %v777_v32 = vld [vmem:[%s3447_s5 + $0x1198] sm:$0xff]  ;;  %v804_v33 = vld [vmem:[%s3447_s5 + $0x1270] sm:$0xff] }
 0x188   : > { %v1429_v2 = vpop.f32.mrb[2].mxu0  ;;  %3081 = vmatpush1.bf16.msra.mxu1 %v3080_v8  ;;  %v856_v8 = vld [vmem:[%s3447_s5 + $0x1410] sm:$0xff]  ;;  %v937_v35 = vld [vmem:[%s3447_s5 + $0x1698] sm:$0xff] }
 0x189   : > { %v1430_v5 = vadd.f32 %v1429_v2, %v1105_v52  ;;  %v1431_v7 = vpop.f32.mrb[3].mxu0  ;;  %3083 = vmatprep.subr.bf16.mxu1 %v3082_v11  ;;  %v615_v52 = vld [vmem:[%s3447_s5 + $0xc88] sm:$0xff]  ;;  %v964_v36 = vld [vmem:[%s3447_s5 + $0x1770] sm:$0xff] }
 0x18a   : > { %v1432_v9 = vadd.f32 %v1431_v7, %v1109_v54  ;;  %3025 = vmatpush1.bf16.msra.mxu0 %v3024_v55  ;;  %v802_v54 = vld [vmem:[%s3447_s5 + $0x1260] sm:$0xff]  ;;  %v3094_v62 = vpack.c.bf16 %v642_v53, %v615_v52  ;;  %v829_v7 = vld [vmem:[%s3447_s5 + $0x1338] sm:$0xff]  ;;  %v3054_v44 = vpack.c.bf16 %v964_v36, %v937_v35  ;;  %v992_v35 = vld [vmem:[%s3447_s5 + $0x1850] sm:$0xff] }
 0x18b   : > { %2218 = vst [vmem:[%s4084_s19 + $0x20] sm:$0xff] %v1430_v5  ;;  %3027 = vmatprep.subr.bf16.mxu0 %v3026_v61  ;;  %v774_v61 = vld [vmem:[%s3447_s5 + $0x1180] sm:$0xff]  ;;  %v3042_v2 = vpack.c.bf16 %v802_v54, %v775_v0  ;;  %v696_v5 = vld [vmem:[%s3447_s5 + $0xf10] sm:$0xff]  ;;  %v1019_v36 = vld [vmem:[%s3447_s5 + $0x1928] sm:$0xff] }
 0x18c   : > { %2219 = vst [vmem:[%s4084_s19 + $0x28] sm:$0xff] %v1432_v9  ;;  %3085 = vmatpush1.bf16.msra.mxu1 %v3084_v22  ;;  %v3096_v9 = vpack.c.bf16 %v641_v1, %v614_v63  ;;  %v3098_v11 = vpack.c.bf16 %v696_v5, %v669_v4  ;;  %v3100_v22 = vpack.c.bf16 %v695_v13, %v668_v12  ;;  %v1018_v52 = vld [vmem:[%s3447_s5 + $0x1920] sm:$0xff]  ;;  %v1045_v63 = vld [vmem:[%s3447_s5 + $0x19f8] sm:$0xff]  ;;  %v1072_v1 = vld [vmem:[%s3447_s5 + $0x1ad0] sm:$0xff] }
 0x18d   : > { %3087 = vmatprep.subr.bf16.mxu1 %v3086_v26  ;;  %v3102_v26 = vpack.c.bf16 %v750_v18, %v723_v16  ;;  %v990_v54 = vld [vmem:[%s3447_s5 + $0x1840] sm:$0xff]  ;;  %v1044_v4 = vld [vmem:[%s3447_s5 + $0x19f0] sm:$0xff]  ;;  %v239_v12 = vld [vmem:[%s3447_s5 + $0xc8] sm:$0xff] }
 0x18e   : > { %3029 = vmatpush1.bf16.msra.mxu0 %v3028_v10  ;;  %v1500_v50 = vpop.f32.mrb[2].mxu1  ;;  %v3044_v10 = vpack.c.bf16 %v801_v17, %v774_v61  ;;  %v885_v61 = vld [vmem:[%s3447_s5 + $0x14f8] sm:$0xff]  ;;  %v266_v13 = vld [vmem:[%s3447_s5 + $0x1a0] sm:$0xff] }
 0x18f   : > { %3031 = vmatprep.subr.bf16.mxu0 %v3030_v14  ;;  %v1501_v55 = vadd.f32 %v1500_v50, %v1113_v51  ;;  %v1502_v56 = vpop.f32.mrb[3].mxu1  ;;  %v3046_v14 = vpack.c.bf16 %v856_v8, %v829_v7  ;;  %v3104_v51 = vpack.c.bf16 %v749_v29, %v722_v27  ;;  %v991_v50 = vld [vmem:[%s3447_s5 + $0x1848] sm:$0xff]  ;;  %v884_v7 = vld [vmem:[%s3447_s5 + $0x14f0] sm:$0xff]  ;;  %v238_v16 = vld [vmem:[%s3447_s5 + $0xc0] sm:$0xff] }
 0x190   : > { %v1503_v57 = vadd.f32 %v1502_v56, %v1117_v39  ;;  %3089 = vmatpush1.bf16.msra.mxu1 %v3088_v40  ;;  %v3052_v39 = vpack.c.bf16 %v909_v31, %v882_v25  ;;  %v936_v40 = vld [vmem:[%s3447_s5 + $0x1690] sm:$0xff]  ;;  %v830_v56 = vld [vmem:[%s3447_s5 + $0x1340] sm:$0xff]  ;;  %v911_v8 = vld [vmem:[%s3447_s5 + $0x15c8] sm:$0xff] }
 0x191   : > { %2220 = vst [vmem:[%s4084_s19 + $0x30] sm:$0xff] %v1501_v55  ;;  %3091 = vmatprep.subr.bf16.mxu1 %v3090_v43  ;;  %v803_v43 = vld [vmem:[%s3447_s5 + $0x1268] sm:$0xff]  ;;  %v3056_v0 = vpack.c.bf16 %v963_v46, %v936_v40  ;;  %v993_v25 = vld [vmem:[%s3447_s5 + $0x1858] sm:$0xff]  ;;  %v320_v29 = vld [vmem:[%s3447_s5 + $0x350] sm:$0xff] }
 0x192   : > { %3033 = vmatpush1.bf16.msra.mxu0 %v3032_v24  ;;  %2221 = vst [vmem:[%s4084_s19 + $0x38] sm:$0xff] %v1503_v57  ;;  %v3048_v24 = vpack.c.bf16 %v855_v15, %v828_v28  ;;  %v3108_v53 = vpack.c.bf16 %v803_v43, %v776_v42  ;;  %v857_v57 = vld [vmem:[%s3447_s5 + $0x1418] sm:$0xff]  ;;  %v939_v28 = vld [vmem:[%s3447_s5 + $0x16a8] sm:$0xff]  ;;  %v374_v43 = vld [vmem:[%s3447_s5 + $0x500] sm:$0xff] }
 0x193   : > { %3035 = vmatprep.subr.bf16.mxu0 %v3034_v30  ;;  %v3050_v30 = vpack.c.bf16 %v910_v20, %v883_v19  ;;  %v938_v19 = vld [vmem:[%s3447_s5 + $0x16a0] sm:$0xff]  ;;  %v965_v20 = vld [vmem:[%s3447_s5 + $0x1778] sm:$0xff]  ;;  %v1047_v40 = vld [vmem:[%s3447_s5 + $0x1a08] sm:$0xff] }
 0x194   : > { %3093 = vmatpush1.bf16.msra.mxu1 %v3092_v59  ;;  %v3058_v59 = vpack.c.bf16 %v1018_v52, %v991_v50  ;;  %v293_v27 = vld [vmem:[%s3447_s5 + $0x278] sm:$0xff]  ;;  %v347_v42 = vld [vmem:[%s3447_s5 + $0x428] sm:$0xff]  ;;  %v1046_v50 = vld [vmem:[%s3447_s5 + $0x1a00] sm:$0xff] }
 0x195   : > { %3095 = vmatprep.subr.bf16.mxu1 %v3094_v62  ;;  %v912_v62 = vld [vmem:[%s3447_s5 + $0x15d0] sm:$0xff]  ;;  %v1073_v52 = vld [vmem:[%s3447_s5 + $0x1ad8] sm:$0xff] }
 0x196   : > { %3037 = vmatpush1.bf16.msra.mxu0 %v3036_v41  ;;  %v3106_v41 = vpack.c.bf16 %v804_v33, %v777_v32  ;;  %v3114_v5 = vpack.c.bf16 %v912_v62, %v885_v61  ;;  %v292_v32 = vld [vmem:[%s3447_s5 + $0x270] sm:$0xff] }
 0x197   : > { %3039 = vmatprep.subr.bf16.mxu0 %v3038_v48  ;;  %v831_v48 = vld [vmem:[%s3447_s5 + $0x1348] sm:$0xff]  ;;  %v400_v61 = vld [vmem:[%s3447_s5 + $0x5d0] sm:$0xff] }
 0x198   : > { %3097 = vmatpush1.bf16.msra.mxu1 %v3096_v9  ;;  %v3110_v55 = vpack.c.bf16 %v858_v49, %v831_v48  ;;  %v3062_v9 = vpack.c.bf16 %v1072_v1, %v1045_v63  ;;  %v346_v48 = vld [vmem:[%s3447_s5 + $0x420] sm:$0xff]  ;;  %v240_v63 = vld [vmem:[%s3447_s5 + $0xd0] sm:$0xff]  ;;  %v267_v1 = vld [vmem:[%s3447_s5 + $0x1a8] sm:$0xff] }
 0x199   : > { %3099 = vmatprep.subr.bf16.mxu1 %v3098_v11  ;;  %v966_v11 = vld [vmem:[%s3447_s5 + $0x1780] sm:$0xff] }
 0x19a   : > { %3041 = vmatpush1.bf16.msra.mxu0 %v3040_v60  ;;  %v1017_v60 = vld [vmem:[%s3447_s5 + $0x1918] sm:$0xff]  ;;  %v3118_v18 = vpack.c.bf16 %v966_v11, %v939_v28  ;;  %v454_v28 = vld [vmem:[%s3447_s5 + $0x780] sm:$0xff] }
 0x19b   : > { %3043 = vmatprep.subr.bf16.mxu0 %v3042_v2  ;;  %v3112_v2 = vpack.c.bf16 %v857_v57, %v830_v56  ;;  %v3060_v17 = vpack.c.bf16 %v1017_v60, %v990_v54  ;;  %v672_v54 = vld [vmem:[%s3447_s5 + $0xe50] sm:$0xff]  ;;  %v401_v56 = vld [vmem:[%s3447_s5 + $0x5d8] sm:$0xff] }
 0x19c   : > { %3101 = vmatpush1.bf16.msra.mxu1 %v3100_v22  ;;  %v3130_v22 = vpack.c.bf16 %v266_v13, %v239_v12  ;;  %v428_v57 = vld [vmem:[%s3447_s5 + $0x6b0] sm:$0xff]  ;;  %v294_v12 = vld [vmem:[%s3447_s5 + $0x280] sm:$0xff]  ;;  %v321_v13 = vld [vmem:[%s3447_s5 + $0x358] sm:$0xff] }
 0x19d   : > { %3103 = vmatprep.subr.bf16.mxu1 %v3102_v26  ;;  %v1020_v26 = vld [vmem:[%s3447_s5 + $0x1930] sm:$0xff] }
 0x19e   : > { %3045 = vmatpush1.bf16.msra.mxu0 %v3044_v10  ;;  %v1071_v10 = vld [vmem:[%s3447_s5 + $0x1ac8] sm:$0xff]  ;;  %v3122_v33 = vpack.c.bf16 %v1020_v26, %v993_v25  ;;  %v508_v26 = vld [vmem:[%s3447_s5 + $0x930] sm:$0xff] }
 0x19f   : > { %3047 = vmatprep.subr.bf16.mxu0 %v3046_v14  ;;  %v3116_v14 = vpack.c.bf16 %v911_v8, %v884_v7  ;;  %v3064_v15 = vpack.c.bf16 %v1071_v10, %v1044_v4  ;;  %v726_v4 = vld [vmem:[%s3447_s5 + $0x1000] sm:$0xff]  ;;  %v455_v7 = vld [vmem:[%s3447_s5 + $0x788] sm:$0xff] }
 0x1a0   : > { %3105 = vmatpush1.bf16.msra.mxu1 %v3104_v51  ;;  %v3134_v51 = vpack.c.bf16 %v320_v29, %v293_v27  ;;  %v482_v8 = vld [vmem:[%s3447_s5 + $0x860] sm:$0xff]  ;;  %v348_v29 = vld [vmem:[%s3447_s5 + $0x430] sm:$0xff] }
 0x1a1   : > { %3107 = vmatprep.subr.bf16.mxu1 %v3106_v41  ;;  %v1074_v41 = vld [vmem:[%s3447_s5 + $0x1ae0] sm:$0xff] }
 0x1a2   : > { %3049 = vmatpush1.bf16.msra.mxu0 %v3048_v24  ;;  %v265_v24 = vld [vmem:[%s3447_s5 + $0x198] sm:$0xff]  ;;  %v3126_v49 = vpack.c.bf16 %v1074_v41, %v1047_v40 }
 0x1a3   : > { %3051 = vmatprep.subr.bf16.mxu0 %v3050_v30  ;;  %v3120_v30 = vpack.c.bf16 %v965_v20, %v938_v19  ;;  %v3132_v31 = vpack.c.bf16 %v265_v24, %v238_v16  ;;  %v780_v16 = vld [vmem:[%s3447_s5 + $0x11b0] sm:$0xff]  ;;  %v509_v19 = vld [vmem:[%s3447_s5 + $0x938] sm:$0xff]  ;;  %v3200_v24 = vpack.c.bf16 %v321_v13, %v294_v12  ;;  %v510_v12 = vld [vmem:[%s3447_s5 + $0x940] sm:$0xff] }
 0x1a4   : > { %3109 = vmatpush1.bf16.msra.mxu1 %v3108_v53  ;;  %v3138_v53 = vpack.c.bf16 %v374_v43, %v347_v42  ;;  %v536_v20 = vld [vmem:[%s3447_s5 + $0xa10] sm:$0xff]  ;;  %v562_v42 = vld [vmem:[%s3447_s5 + $0xae0] sm:$0xff]  ;;  %v537_v13 = vld [vmem:[%s3447_s5 + $0xa18] sm:$0xff] }
 0x1a5   : > { %3111 = vmatprep.subr.bf16.mxu1 %v3110_v55  ;;  %v699_v55 = vld [vmem:[%s3447_s5 + $0xf28] sm:$0xff] }
 0x1a6   : > { %3053 = vmatpush1.bf16.msra.mxu0 %v3052_v39  ;;  %v319_v39 = vld [vmem:[%s3447_s5 + $0x348] sm:$0xff]  ;;  %v3194_v62 = vpack.c.bf16 %v699_v55, %v672_v54  ;;  %v644_v54 = vld [vmem:[%s3447_s5 + $0xd70] sm:$0xff] }
 0x1a7   : > { %3055 = vmatprep.subr.bf16.mxu0 %v3054_v44  ;;  %v3124_v44 = vpack.c.bf16 %v1019_v36, %v992_v35  ;;  %v3136_v46 = vpack.c.bf16 %v319_v39, %v292_v32  ;;  %v535_v32 = vld [vmem:[%s3447_s5 + $0xa08] sm:$0xff]  ;;  %v861_v35 = vld [vmem:[%s3447_s5 + $0x1438] sm:$0xff] }
 0x1a8   : > { %3113 = vmatpush1.bf16.msra.mxu1 %v3112_v2  ;;  %v3142_v2 = vpack.c.bf16 %v428_v57, %v401_v56  ;;  %v563_v36 = vld [vmem:[%s3447_s5 + $0xae8] sm:$0xff]  ;;  %v3152_v41 = vpack.c.bf16 %v535_v32, %v508_v26  ;;  %v3216_v26 = vpack.c.bf16 %v537_v13, %v510_v12  ;;  %v1022_v12 = vld [vmem:[%s3447_s5 + $0x1940] sm:$0xff] }
 0x1a9   : > { %3115 = vmatprep.subr.bf16.mxu1 %v3114_v5  ;;  %v753_v5 = vld [vmem:[%s3447_s5 + $0x10d8] sm:$0xff]  ;;  %v591_v32 = vld [vmem:[%s3447_s5 + $0xbc8] sm:$0xff] }
 0x1aa   : > { %3057 = vmatpush1.bf16.msra.mxu0 %v3056_v0  ;;  %v373_v0 = vld [vmem:[%s3447_s5 + $0x4f8] sm:$0xff]  ;;  %v3198_v11 = vpack.c.bf16 %v753_v5, %v726_v4  ;;  %v942_v4 = vld [vmem:[%s3447_s5 + $0x16c0] sm:$0xff] }
 0x1ab   : > { %3059 = vmatprep.subr.bf16.mxu0 %v3058_v59  ;;  %v3128_v59 = vpack.c.bf16 %v1073_v52, %v1046_v50  ;;  %v3140_v60 = vpack.c.bf16 %v373_v0, %v346_v48  ;;  %v888_v50 = vld [vmem:[%s3447_s5 + $0x1510] sm:$0xff]  ;;  %v915_v52 = vld [vmem:[%s3447_s5 + $0x15e8] sm:$0xff]  ;;  %v617_v0 = vld [vmem:[%s3447_s5 + $0xc98] sm:$0xff] }
 0x1ac   : > { %3117 = vmatpush1.bf16.msra.mxu1 %v3116_v14  ;;  %v3146_v14 = vpack.c.bf16 %v482_v8, %v455_v7  ;;  %v969_v5 = vld [vmem:[%s3447_s5 + $0x1798] sm:$0xff]  ;;  %v671_v7 = vld [vmem:[%s3447_s5 + $0xe48] sm:$0xff]  ;;  %v698_v8 = vld [vmem:[%s3447_s5 + $0xf20] sm:$0xff] }
 0x1ad   : > { %3119 = vmatprep.subr.bf16.mxu1 %v3118_v18  ;;  %v807_v18 = vld [vmem:[%s3447_s5 + $0x1288] sm:$0xff] }
 0x1ae   : > { %3061 = vmatpush1.bf16.msra.mxu0 %v3060_v17  ;;  %v427_v17 = vld [vmem:[%s3447_s5 + $0x6a8] sm:$0xff]  ;;  %v3202_v27 = vpack.c.bf16 %v807_v18, %v780_v16  ;;  %v996_v16 = vld [vmem:[%s3447_s5 + $0x1870] sm:$0xff] }
 0x1af   : > { %3063 = vmatprep.subr.bf16.mxu0 %v3062_v9  ;;  %v3196_v9 = vpack.c.bf16 %v267_v1, %v240_v63  ;;  %v3144_v10 = vpack.c.bf16 %v427_v17, %v400_v61  ;;  %v616_v61 = vld [vmem:[%s3447_s5 + $0xc90] sm:$0xff]  ;;  %v483_v1 = vld [vmem:[%s3447_s5 + $0x868] sm:$0xff] }
 0x1b0   : > { %3121 = vmatpush1.bf16.msra.mxu1 %v3120_v30  ;;  %v375_v30 = vld [vmem:[%s3447_s5 + $0x508] sm:$0xff]  ;;  %v456_v63 = vld [vmem:[%s3447_s5 + $0x790] sm:$0xff] }
 0x1b1   : > { %3123 = vmatprep.subr.bf16.mxu1 %v3122_v33  ;;  %v834_v33 = vld [vmem:[%s3447_s5 + $0x1360] sm:$0xff]  ;;  %v3204_v39 = vpack.c.bf16 %v375_v30, %v348_v29  ;;  %v643_v17 = vld [vmem:[%s3447_s5 + $0xd68] sm:$0xff]  ;;  %v724_v29 = vld [vmem:[%s3447_s5 + $0xff0] sm:$0xff] }
 0x1b2   : > { %3065 = vmatpush1.bf16.msra.mxu0 %v3064_v15  ;;  %v481_v15 = vld [vmem:[%s3447_s5 + $0x858] sm:$0xff]  ;;  %v3206_v43 = vpack.c.bf16 %v861_v35, %v834_v33  ;;  %v1023_v18 = vld [vmem:[%s3447_s5 + $0x1948] sm:$0xff] }
 0x1b3   : > { %3131 = vmatprep.subr.bf16.mxu0 %v3130_v22  ;;  %v4384_v22 = vld [vmem:[%s4042_s10 + $0x8] sm:$0xff]  ;;  %v3148_v25 = vpack.c.bf16 %v481_v15, %v454_v28  ;;  %v670_v28 = vld [vmem:[%s3447_s5 + $0xe40] sm:$0xff]  ;;  %v697_v15 = vld [vmem:[%s3447_s5 + $0xf18] sm:$0xff]  ;;  %v3218_v30 = vpack.c.bf16 %v1023_v18, %v996_v16 }
 0x1b4   : > { %3125 = vmatpush1.bf16.msra.mxu1 %v3124_v44  ;;  %v1125_v40 = vrot.slane %v4384_v22, %v4060_v3  ;;  %v402_v44 = vld [vmem:[%s3447_s5 + $0x5e0] sm:$0xff]  ;;  %v751_v35 = vld [vmem:[%s3447_s5 + $0x10c8] sm:$0xff]  ;;  %v1021_v16 = vld [vmem:[%s3447_s5 + $0x1938] sm:$0xff] }
 0x1b5   : > { %1996 = vmatmul.mubr.f32.vlgmr.msra.gmra.mrb[10].mxu0 %v4193_v58  ;;  %3127 = vmatprep.subr.bf16.mxu1 %v3126_v49  ;;  %v589_v49 = vld [vmem:[%s3447_s5 + $0xbb8] sm:$0xff] }
 0x1b6   : > { %3133 = vmatpush1.bf16.msra.mxu0 %v3132_v31  ;;  %2137 = vmatprep.mubr.f32.mxu0 %v4205_v6  ;;  %v3150_v31 = vpack.c.bf16 %v536_v20, %v509_v19  ;;  %v725_v19 = vld [vmem:[%s3447_s5 + $0xff8] sm:$0xff]  ;;  %v752_v20 = vld [vmem:[%s3447_s5 + $0x10d0] sm:$0xff] }
 0x1b7   : > { %3135 = vmatprep.subr.bf16.mxu0 %v3134_v51  ;;  %v590_v51 = vld [vmem:[%s3447_s5 + $0xbc0] sm:$0xff]  ;;  %v3166_v33 = vpack.c.bf16 %v752_v20, %v725_v19  ;;  %v1049_v18 = vld [vmem:[%s3447_s5 + $0x1a18] sm:$0xff]  ;;  %v1076_v19 = vld [vmem:[%s3447_s5 + $0x1af0] sm:$0xff] }
 0x1b8   : > { %3129 = vmatpush1.bf16.msra.mxu1 %v3128_v59  ;;  %v3154_v48 = vpack.c.bf16 %v590_v51, %v563_v36  ;;  %v1050_v51 = vld [vmem:[%s3447_s5 + $0x1a20] sm:$0xff] }
 0x1b9   : > { %3195 = vmatprep.subr.bf16.mxu1 %v3194_v62  ;;  %v3210_v62 = vpack.c.bf16 %v915_v52, %v888_v50  ;;  %v645_v50 = vld [vmem:[%s3447_s5 + $0xd78] sm:$0xff] }
 0x1ba   : > { %3137 = vmatpush1.bf16.msra.mxu0 %v3136_v46  ;;  %v429_v46 = vld [vmem:[%s3447_s5 + $0x6b8] sm:$0xff] }
 0x1bb   : > { %3139 = vmatprep.subr.bf16.mxu0 %v3138_v53  ;;  %2067 = vmatmul.mubr.f32.vlgmr.msra.gmra.mrb[10].mxu1 %v4193_v58  ;;  %v3208_v57 = vpack.c.bf16 %v429_v46, %v402_v44  ;;  %v3168_v46 = vpack.c.bf16 %v751_v35, %v724_v29  ;;  %v1137_v29 = vrot.slane %v4384_v22, %v4228_v34 }
 0x1bc   : > { %3197 = vmatpush3.bf16.msra.mxu1 %v3196_v9  ;;  %2208 = vmatprep.mubr.f32.mxu1 %v4205_v6  ;;  %v1121_v6 = vrot.slane %v4384_v22, %v4056_v38  ;;  %v3212_v9 = vpack.c.bf16 %v483_v1, %v456_v63  ;;  %v914_v63 = vld [vmem:[%s3447_s5 + $0x15e0] sm:$0xff] }
 0x1bd   : > { %3199 = vmatprep.subr.bf16.mxu1 %v3198_v11  ;;  %v3214_v11 = vpack.c.bf16 %v969_v5, %v942_v4  ;;  %v913_v4 = vld [vmem:[%s3447_s5 + $0x15d8] sm:$0xff] }
 0x1be   : > { %3141 = vmatpush1.bf16.msra.mxu0 %v3140_v60  ;;  %v3156_v60 = vpack.c.bf16 %v589_v49, %v562_v42  ;;  %v618_v49 = vld [vmem:[%s3447_s5 + $0xca0] sm:$0xff]  ;;  %v941_v5 = vld [vmem:[%s3447_s5 + $0x16b8] sm:$0xff] }
 0x1bf   : > { %3143 = vmatprep.subr.bf16.mxu0 %v3142_v2  ;;  %v3158_v2 = vpack.c.bf16 %v644_v54, %v617_v0  ;;  %v805_v0 = vld [vmem:[%s3447_s5 + $0x1278] sm:$0xff] }
 0x1c0   : > { %3201 = vmatpush3.bf16.msra.mxu1 %v3200_v24  ;;  %v1129_v24 = vrot.slane %v4384_v22, %v4099_v45  ;;  %v833_v54 = vld [vmem:[%s3447_s5 + $0x1358] sm:$0xff] }
 0x1c1   : > { %3203 = vmatprep.subr.bf16.mxu1 %v3202_v27  ;;  %v3164_v27 = vpack.c.bf16 %v697_v15, %v670_v28  ;;  %v967_v28 = vld [vmem:[%s3447_s5 + $0x1788] sm:$0xff]  ;;  %v994_v15 = vld [vmem:[%s3447_s5 + $0x1860] sm:$0xff] }
 0x1c2   : > { %3145 = vmatpush1.bf16.msra.mxu0 %v3144_v10  ;;  %v3160_v10 = vpack.c.bf16 %v643_v17, %v616_v61  ;;  %v859_v61 = vld [vmem:[%s3447_s5 + $0x1428] sm:$0xff]  ;;  %v886_v17 = vld [vmem:[%s3447_s5 + $0x1500] sm:$0xff]  ;;  %v3188_v20 = vpack.c.bf16 %v1021_v16, %v994_v15 }
 0x1c3   : > { %3147 = vmatprep.subr.bf16.mxu0 %v3146_v14  ;;  %v3162_v14 = vpack.c.bf16 %v698_v8, %v671_v7  ;;  %v968_v7 = vld [vmem:[%s3447_s5 + $0x1790] sm:$0xff]  ;;  %v3180_v8 = vpack.c.bf16 %v913_v4, %v886_v17 }
 0x1c4   : > { %3205 = vmatpush3.bf16.msra.mxu1 %v3204_v39  ;;  %v779_v39 = vld [vmem:[%s3447_s5 + $0x11a8] sm:$0xff] }
 0x1c5   : > { %3207 = vmatprep.subr.bf16.mxu1 %v3206_v43 }
 0x1c6   : > { %3149 = vmatpush1.bf16.msra.mxu0 %v3148_v25  ;;  %v1133_v25 = vrot.slane %v4384_v22, %v4102_v47 }
 0x1c7   : > { %3151 = vmatprep.subr.bf16.mxu0 %v3150_v31  ;;  %v564_v31 = vld [vmem:[%s3447_s5 + $0xaf0] sm:$0xff] }
 0x1c8   : > { %v1571_v53 = vpop.f32.mrb[4].mxu0  ;;  %3209 = vmatpush3.bf16.msra.mxu1 %v3208_v57  ;;  %v3220_v44 = vpack.c.bf16 %v591_v32, %v564_v31 }
 0x1c9   : > { %v1572_v55 = vadd.f32 %v1571_v53, %v1121_v6  ;;  %v1573_v56 = vpop.f32.mrb[5].mxu0  ;;  %3211 = vmatprep.subr.bf16.mxu1 %v3210_v62  ;;  %v1077_v6 = vld [vmem:[%s3447_s5 + $0x1af8] sm:$0xff]  ;;  %v778_v53 = vld [vmem:[%s3447_s5 + $0x11a0] sm:$0xff]  ;;  %v887_v62 = vld [vmem:[%s3447_s5 + $0x1508] sm:$0xff] }
 0x1ca   : > { %v1574_v59 = vadd.f32 %v1573_v56, %v1125_v40  ;;  %3153 = vmatpush1.bf16.msra.mxu0 %v3152_v41  ;;  %v806_v40 = vld [vmem:[%s3447_s5 + $0x1280] sm:$0xff]  ;;  %v3224_v56 = vpack.c.bf16 %v645_v50, %v618_v49  ;;  %v3172_v57 = vpack.c.bf16 %v805_v0, %v778_v53 }
 0x1cb   : > { %2222 = vst [vmem:[%s4084_s19 + $0x40] sm:$0xff] %v1572_v55  ;;  %3155 = vmatprep.subr.bf16.mxu0 %v3154_v48  ;;  %v3222_v48 = vpack.c.bf16 %v1077_v6, %v1050_v51  ;;  %v3170_v52 = vpack.c.bf16 %v806_v40, %v779_v39  ;;  %v860_v55 = vld [vmem:[%s3447_s5 + $0x1430] sm:$0xff] }
 0x1cc   : > { %2223 = vst [vmem:[%s4084_s19 + $0x48] sm:$0xff] %v1574_v59  ;;  %3213 = vmatpush3.bf16.msra.mxu1 %v3212_v9  ;;  %v3174_v59 = vpack.c.bf16 %v860_v55, %v833_v54  ;;  %v3182_v9 = vpack.c.bf16 %v968_v7, %v941_v5 }
 0x1cd   : > { %3215 = vmatprep.subr.bf16.mxu1 %v3214_v11  ;;  %v995_v11 = vld [vmem:[%s3447_s5 + $0x1868] sm:$0xff] }
 0x1ce   : > { %3157 = vmatpush1.bf16.msra.mxu0 %v3156_v60  ;;  %v1642_v36 = vpop.f32.mrb[4].mxu1  ;;  %v832_v60 = vld [vmem:[%s3447_s5 + $0x1350] sm:$0xff] }
 0x1cf   : > { %3159 = vmatprep.subr.bf16.mxu0 %v3158_v2  ;;  %v1643_v41 = vadd.f32 %v1642_v36, %v1129_v24  ;;  %v1644_v42 = vpop.f32.mrb[5].mxu1  ;;  %v3176_v1 = vpack.c.bf16 %v859_v61, %v832_v60  ;;  %v3178_v2 = vpack.c.bf16 %v914_v63, %v887_v62  ;;  %v3190_v24 = vpack.c.bf16 %v1076_v19, %v1049_v18 }
 0x1d0   : > { %v1645_v43 = vadd.f32 %v1644_v42, %v1133_v25  ;;  %3217 = vmatpush3.bf16.msra.mxu1 %v3216_v26  ;;  %v1048_v25 = vld [vmem:[%s3447_s5 + $0x1a10] sm:$0xff]  ;;  %v1075_v26 = vld [vmem:[%s3447_s5 + $0x1ae8] sm:$0xff]  ;;  %v1145_v36 = vrot.slane %v4384_v22, %v4265_v21 }
 0x1d1   : > { %2224 = vst [vmem:[%s4084_s19 + $0x50] sm:$0xff] %v1643_v41  ;;  %3219 = vmatprep.subr.bf16.mxu1 %v3218_v30  ;;  %v1141_v30 = vrot.slane %v4384_v22, %v4232_v37  ;;  %v1080_v41 = vld [vmem:[%s4042_s10 + $0x10] sm:$0xff] }
 0x1d2   : > { %3161 = vmatpush1.bf16.msra.mxu0 %v3160_v10  ;;  %2225 = vst [vmem:[%s4084_s19 + $0x58] sm:$0xff] %v1645_v43  ;;  %v940_v10 = vld [vmem:[%s3447_s5 + $0x16b0] sm:$0xff]  ;;  %v1153_v42 = vrot.slane %v1080_v41, %v4056_v38  ;;  %v1157_v43 = vrot.slane %v1080_v41, %v4060_v3  ;;  %v1165_v50 = vrot.slane %v1080_v41, %v4102_v47 }
 0x1d3   : > { %3163 = vmatprep.subr.bf16.mxu0 %v3162_v14  ;;  %v3184_v13 = vpack.c.bf16 %v967_v28, %v940_v10  ;;  %v3186_v14 = vpack.c.bf16 %v1022_v12, %v995_v11  ;;  %v1169_v55 = vrot.slane %v1080_v41, %v4228_v34  ;;  %v1177_v47 = vrot.slane %v1080_v41, %v4265_v21  ;;  %v1081_v34 = vld [vmem:[%s4042_s10 + $0x18] sm:$0x7] }
 0x1d4   : > { %3221 = vmatpush3.bf16.msra.mxu1 %v3220_v44  ;;  %v1181_v62 = vrot.slane %v1080_v41, %v4268_v23  ;;  %v1193_v4 = vrot.slane %v1081_v34, %v4099_v45  ;;  %v1185_v21 = vrot.slane %v1081_v34, %v4056_v38 }
 0x1d5   : > { %3223 = vmatprep.subr.bf16.mxu1 %v3222_v48 }
 0x1d6   : > { %3165 = vmatpush1.bf16.msra.mxu0 %v3164_v27  ;;  %v3192_v27 = vpack.c.bf16 %v1075_v26, %v1048_v25 }
 0x1d7   : > { %3167 = vmatprep.subr.bf16.mxu0 %v3166_v33 }
 0x1d8   : > { %3225 = vmatpush3.bf16.msra.mxu1 %v3224_v56  ;;  %v1173_v56 = vrot.slane %v1080_v41, %v4232_v37 }
 0x1da   : > { %3169 = vmatpush1.bf16.msra.mxu0 %v3168_v46 }
 0x1db   : > { %3171 = vmatprep.subr.bf16.mxu0 %v3170_v52  ;;  %2209 = vmatmul.mubr.f32.vlgmr.msra.gmra.mrb[12].mxu1 %v4193_v58 }
 0x1de   : > { %3173 = vmatpush1.bf16.msra.mxu0 %v3172_v57 }
 0x1df   : > { %3175 = vmatprep.subr.bf16.mxu0 %v3174_v59 }
 0x1e2   : > { %3177 = vmatpush1.bf16.msra.mxu0 %v3176_v1 }
 0x1e3   : > { %3179 = vmatprep.subr.bf16.mxu0 %v3178_v2 }
 0x1e6   : > { %3181 = vmatpush1.bf16.msra.mxu0 %v3180_v8 }
 0x1e7   : > { %3183 = vmatprep.subr.bf16.mxu0 %v3182_v9 }
 0x1ea   : > { %3185 = vmatpush1.bf16.msra.mxu0 %v3184_v13 }
 0x1eb   : > { %3187 = vmatprep.subr.bf16.mxu0 %v3186_v14 }
 0x1ee   : > { %3189 = vmatpush1.bf16.msra.mxu0 %v3188_v20 }
 0x1ef   : > { %3191 = vmatprep.subr.bf16.mxu0 %v3190_v24 }
 0x1f2   : > { %3193 = vmatpush1.bf16.msra.mxu0 %v3192_v27 }
 0x1f5   : > { %2138 = vmatmul.mubr.f32.vlgmr.msra.gmra.mrb[12].mxu0 %v4193_v58  ;;  %v1149_v58 = vrot.slane %v4384_v22, %v4268_v23  ;;  %v1161_v22 = vrot.slane %v1080_v41, %v4099_v45  ;;  %v1189_v23 = vrot.slane %v1081_v34, %v4060_v3 }
 0x208   : > { %v1713_v31 = vpop.f32.mrb[6].mxu0 }
 0x209   : > { %v1714_v32 = vadd.f32 %v1713_v31, %v1137_v29  ;;  %v1715_v33 = vpop.f32.mrb[7].mxu0 }
 0x20a   : > { %v1716_v35 = vadd.f32 %v1715_v33, %v1141_v30 }
 0x20b   : > { %2226 = vst [vmem:[%s4084_s19 + $0x60] sm:$0xff] %v1714_v32 }
 0x20c   : > { %2227 = vst [vmem:[%s4084_s19 + $0x68] sm:$0xff] %v1716_v35 }
 0x20e   : > { %v1784_v51 = vpop.f32.mrb[6].mxu1 }
 0x20f   : > { %v1785_v6 = vadd.f32 %v1784_v51, %v1145_v36  ;;  %v1786_v39 = vpop.f32.mrb[7].mxu1 }
 0x210   : > { %v1787_v40 = vadd.f32 %v1786_v39, %v1149_v58 }
 0x211   : > { %2228 = vst [vmem:[%s4084_s19 + $0x70] sm:$0xff] %v1785_v6 }
 0x212   : > { %2229 = vst [vmem:[%s4084_s19 + $0x78] sm:$0xff] %v1787_v40 }
 0x248   : > { %v1855_v44 = vpop.f32.mrb[8].mxu0 }
 0x249   : > { %v1856_v46 = vadd.f32 %v1855_v44, %v1153_v42  ;;  %v1857_v48 = vpop.f32.mrb[9].mxu0 }
 0x24a   : > { %v1858_v49 = vadd.f32 %v1857_v48, %v1157_v43 }
 0x24b   : > { %2230 = vst [vmem:[%s4084_s19 + $0x80] sm:$0xff] %v1856_v46 }
 0x24c   : > { %2231 = vst [vmem:[%s4084_s19 + $0x88] sm:$0xff] %v1858_v49 }
 0x24e   : > { %v1926_v52 = vpop.f32.mrb[8].mxu1 }
 0x24f   : > { %v1927_v53 = vadd.f32 %v1926_v52, %v1161_v22  ;;  %v1928_v0 = vpop.f32.mrb[9].mxu1 }
 0x250   : > { %v1929_v54 = vadd.f32 %v1928_v0, %v1165_v50 }
 0x251   : > { %2232 = vst [vmem:[%s4084_s19 + $0x90] sm:$0xff] %v1927_v53 }
 0x252   : > { %2233 = vst [vmem:[%s4084_s19 + $0x98] sm:$0xff] %v1929_v54 }
 0x288   : > { %v1997_v57 = vpop.f32.mrb[10].mxu0 }
 0x289   : > { %v1998_v59 = vadd.f32 %v1997_v57, %v1169_v55  ;;  %v1999_v60 = vpop.f32.mrb[11].mxu0 }
 0x28a   : > { %v2000_v61 = vadd.f32 %v1999_v60, %v1173_v56 }
 0x28b   : > { %2234 = vst [vmem:[%s4084_s19 + $0xa0] sm:$0xff] %v1998_v59 }
 0x28c   : > { %2235 = vst [vmem:[%s4084_s19 + $0xa8] sm:$0xff] %v2000_v61 }
 0x28e   : > { %v2068_v63 = vpop.f32.mrb[10].mxu1 }
 0x28f   : > { %v2069_v1 = vadd.f32 %v2068_v63, %v1177_v47  ;;  %v2070_v2 = vpop.f32.mrb[11].mxu1 }
 0x290   : > { %v2071_v17 = vadd.f32 %v2070_v2, %v1181_v62 }
 0x291   : > { %2236 = vst [vmem:[%s4084_s19 + $0xb0] sm:$0xff] %v2069_v1 }
 0x292   : > { %2237 = vst [vmem:[%s4084_s19 + $0xb8] sm:$0xff] %v2071_v17 }
 0x2ae   : > { %v2359_v37 = vpop.f32.mrb[12].mxu1 }
 0x2af   : > { %v2360_v5 = vpop.f32.mrb[13].mxu1 }
 0x2b0   : > { %v2361_v7 = vadd.f32 %v2360_v5, %v2359_v37 }
 0x2b2   : > { %v2211_v8 = vadd.f32 %v2361_v7, %v1193_v4 }
 0x2b4   : > { %2240 = vst [vmem:[%s4084_s19 + $0xd0] sm:$0xff] %v2211_v8 }
 0x2c8   : > { %v2139_v9 = vpop.f32.mrb[12].mxu0 }
 0x2c9   : > { %v2140_v10 = vadd.f32 %v2139_v9, %v1185_v21  ;;  %v2141_v28 = vpop.f32.mrb[13].mxu0 }
 0x2ca   : > { %v2142_v11 = vadd.f32 %v2141_v28, %v1189_v23 }
 0x2cb   : > { %2238 = vst [vmem:[%s4084_s19 + $0xc0] sm:$0xff] %v2140_v10 }
 0x2cc   : > { %2239 = vst [vmem:[%s4084_s19 + $0xc8] sm:$0xff] %v2142_v11 }
 0x2cd PF: > { %p13_p8 = scmp.ge.s32.totalorder %s3384_s17, 17   ;;  %s4520_s12 = smov %s3330_s13 }
 0x2ce   : > { %s4521_s13 = smov %s3334_s14  ;;  %s4522_s14 = smov %s3394_s20 }
 0x2cf   : > { %s4523_s15 = smov %s3384_s17  ;;  %15 = sbr.rel (!%p13_p8) target bundleno = 3 (0x3), region = 75 }
 0x2d6   :  { %2263 = vsyncpa [#allocation3], 1 }
 0x2d7   :  { %2265 = vsyncpa [#allocation3 + $0x1], 1 }

</bundles_post_ra>
